<compile_context>
chip_gen: v6e
topology: v6e:2x2x1
jax: 0.10.0
libtpu: 0.0.40
codegen_flags: <defaults>
</compile_context>

<pallas_src>
import math

import jax
import jax.numpy as jnp
from jax import lax
from jax.experimental import pallas as pl
from jax.experimental.pallas import tpu as pltpu


# ----------------------------------------------------------------------------
# Parameter construction (torch-like f32 "state dict")
# ----------------------------------------------------------------------------
def make_decoder_params(key, vocab, embed, num_layers, forward_expansion, max_len):
    F = forward_expansion * embed
    L, E, V = num_layers, embed, vocab
    shapes = dict(
        emb=(V, E),
        wq1=(L, E, E), wk1=(L, E, E), wv1=(L, E, E), wo1=(L, E, E), bo1=(L, 1, E),
        g_s=(L, 1, E), b_s=(L, 1, E),
        wq2=(L, E, E), wk2=(L, E, E), wv2=(L, E, E), wo2=(L, E, E), bo2=(L, 1, E),
        g_1=(L, 1, E), b_1=(L, 1, E),
        wf1=(L, E, F), bf1=(L, 1, F), wf2=(L, F, E), bf2=(L, 1, E),
        g_2=(L, 1, E), b_2=(L, 1, E),
        wout=(E, V), bout=(1, V),
    )
    keys = jax.random.split(key, len(shapes))
    params = {}
    for (name, shp), kk in zip(shapes.items(), keys):
        w = 0.05 * jax.random.normal(kk, shp, dtype=jnp.float32)
        if name.startswith("g_"):          # LayerNorm weight ~ 1
            w = w + 1.0
        params[name] = w
    # sinusoidal positional encoding (max_len, E)
    pos = jnp.arange(max_len, dtype=jnp.float32)[:, None]
    freqs = jnp.exp(-jnp.log(10000.0) * jnp.arange(0, E, 2, dtype=jnp.float32) / E)
    pe = jnp.zeros((max_len, E), jnp.float32)
    pe = pe.at[:, 0::2].set(jnp.sin(pos * freqs))
    pe = pe.at[:, 1::2].set(jnp.cos(pos * freqs))
    params["pe"] = pe
    return params


# ----------------------------------------------------------------------------
# Kernel-side weight prep: fuse QKV / KV, fold 1/sqrt(E), cast to bf16, pad V
# ----------------------------------------------------------------------------
def prepare_kernel_weights(params):
    E = params["emb"].shape[1]
    V = params["wout"].shape[1]
    Vp = max(128, ((V + 127) // 128) * 128)          # lane-dense output width
    scale = 1.0 / math.sqrt(E)
    bf = jnp.bfloat16

    wout_p = jnp.zeros((E, Vp), jnp.float32).at[:, :V].set(params["wout"]).astype(bf)
    bout_p = jnp.zeros((1, Vp), jnp.float32).at[:, :V].set(params["bout"])

    kw = dict(
        emb=params["emb"].astype(bf),
        # self-attention: fused [Wq/sqrt(E) | Wk | Wv] -> (L, E, 3E)
        wqkv1=jnp.concatenate(
            [params["wq1"] * scale, params["wk1"], params["wv1"]], axis=-1).astype(bf),
        wo1=params["wo1"].astype(bf), bo1=params["bo1"],
        g_s=params["g_s"], b_s=params["b_s"],
        # cross-attention: Wq/sqrt(E) and fused [Wk | Wv] -> (L, E, 2E)
        wq2=(params["wq2"] * scale).astype(bf),
        wkv2=jnp.concatenate([params["wk2"], params["wv2"]], axis=-1).astype(bf),
        wo2=params["wo2"].astype(bf), bo2=params["bo2"],
        g_1=params["g_1"], b_1=params["b_1"],
        wf1=params["wf1"].astype(bf), bf1=params["bf1"],
        wf2=params["wf2"].astype(bf), bf2=params["bf2"],
        g_2=params["g_2"], b_2=params["b_2"],
        wout=wout_p, bout=bout_p,
    )
    return kw, Vp


# ----------------------------------------------------------------------------
# Kernel
# ----------------------------------------------------------------------------
def _build_kernel(num_layers, heads, embed, trg_len, src_len, batch, vocab, vocab_pad):
    L, H, E, T, S, N, V = num_layers, heads, embed, trg_len, src_len, batch, vocab
    Dh = E // H
    NT = N * T
    bf = jnp.bfloat16

    def layernorm(y, g, b):
        mu = jnp.mean(y, axis=-1, keepdims=True)
        var = jnp.mean(jnp.square(y - mu), axis=-1, keepdims=True)
        return (y - mu) * lax.rsqrt(var + 1e-5) * g + b

    def softmax(e):
        e = e - jnp.max(e, axis=-1, keepdims=True)
        p = jnp.exp(e)
        return p / jnp.sum(p, axis=-1, keepdims=True)

    def attend(q2d, k2d, v2d, wo, bo, bias, t_q, t_k):
        # q2d: (N*t_q, E) f32 (already scaled); k2d/v2d: (N*t_k, E) f32
        # bias: additive mask bias, (N, t_q, t_k) or (N, 1, t_k)
        q3 = q2d.reshape(N, t_q, E)
        k3 = k2d.reshape(N, t_k, E)
        v3 = v2d.reshape(N, t_k, E)
        ctx = None
        for h in range(H):                         # static head loop, no concat
            sl = slice(h * Dh, (h + 1) * Dh)
            qh = q3[:, :, sl].astype(bf)           # (N, t_q, Dh)
            kh = k3[:, :, sl].astype(bf)           # (N, t_k, Dh)
            vh = v3[:, :, sl].astype(bf)
            e = jnp.einsum('nqd,nkd->nqk', qh, kh,
                           preferred_element_type=jnp.float32)    # (N, t_q, t_k)
            p = softmax(e + bias)
            oh = jnp.einsum('nqk,nkd->nqd', p.astype(bf), vh,
                            preferred_element_type=jnp.float32)   # (N, t_q, Dh)
            # accumulate straight through Wo's matching row block (no concat)
            contrib = jnp.dot(oh.reshape(N * t_q, Dh).astype(bf), wo[sl, :],
                              preferred_element_type=jnp.float32)
            ctx = contrib if ctx is None else ctx + contrib
        return ctx + bo

    def kernel(ids_ref, pe_ref, enc_ref, srcm_ref, trgm_ref, emb_ref,
               wqkv1_ref, wo1_ref, bo1_ref, gs_ref, bs_ref,
               wq2_ref, wkv2_ref, wo2_ref, bo2_ref, g1_ref, b1_ref,
               wf1_ref, bf1_ref, wf2_ref, bf2_ref, g2_ref, b2_ref,
               wout_ref, bout_ref, out_ref):
        # ---- embedding: lane-dense one-hot (NT, V) @ (V, E), bf16 in / f32 acc
        ids = ids_ref[...]                                         # (NT, 1) int32
        onehot = (lax.broadcasted_iota(jnp.int32, (NT, V), 1) == ids)
        onehot = onehot.astype(jnp.float32).astype(bf)             # (NT, V)
        x = jnp.dot(onehot, emb_ref[...], preferred_element_type=jnp.float32)
        # PositionalEncoder: x * sqrt(E) + pe ; dropout = identity (eval)
        x = x * jnp.float32(math.sqrt(E)) + pe_ref[...]            # (NT, E) f32

        enc = enc_ref[...]                                         # (N*S, E) bf16

        # ---- masks -> additive biases, computed once (hoisted out of loops)
        neg = jnp.float32(-1e20)
        zero = jnp.float32(0.0)
        trg_bias = jnp.where(trgm_ref[...] == 0.0, neg, zero)      # (N, T, T)
        src_bias = jnp.where(srcm_ref[...] == 0.0, neg, zero)      # (N, 1, S)

        for l in range(L):                                         # static layer loop
            x_bf = x.astype(bf)
            # fused QKV self-attention projection (1/sqrt(E) folded into Wq)
            qkv = jnp.dot(x_bf, wqkv1_ref[l], preferred_element_type=jnp.float32)
            attn = attend(qkv[:, :E], qkv[:, E:2 * E], qkv[:, 2 * E:],
                          wo1_ref[l], bo1_ref[l], trg_bias, T, T)
            query = layernorm(attn + x, gs_ref[l], bs_ref[l])

            # cross-attention: Q from decoder state, fused K/V from encoder out
            q2 = jnp.dot(query.astype(bf), wq2_ref[l],
                         preferred_element_type=jnp.float32)        # (NT, E)
            kv2 = jnp.dot(enc, wkv2_ref[l],
                          preferred_element_type=jnp.float32)       # (N*S, 2E)
            attn2 = attend(q2, kv2[:, :E], kv2[:, E:],
                           wo2_ref[l], bo2_ref[l], src_bias, T, S)
            x1 = layernorm(attn2 + query, g1_ref[l], b1_ref[l])

            # FFN (Linear -> ReLU -> Linear)
            hid = jnp.dot(x1.astype(bf), wf1_ref[l],
                          preferred_element_type=jnp.float32) + bf1_ref[l]
            hid = jnp.maximum(hid, 0.0)
            hid = jnp.dot(hid.astype(bf), wf2_ref[l],
                          preferred_element_type=jnp.float32) + bf2_ref[l]
            x = layernorm(hid + x1, g2_ref[l], b2_ref[l])

        # ---- lane-dense (Vp multiple of 128) output projection
        out_ref[...] = jnp.dot(x.astype(bf), wout_ref[...],
                               preferred_element_type=jnp.float32) + bout_ref[...]

    return kernel


# ----------------------------------------------------------------------------
# Wrapper
# ----------------------------------------------------------------------------
def decoder_forward(params, ids, enc_out, src_mask, trg_mask, *, heads, num_layers):
    N, T = ids.shape
    _, S, E = enc_out.shape
    V = params["emb"].shape[0]
    assert E % heads == 0

    kw, Vp = prepare_kernel_weights(params)

    # glue: fold batch, tile positional encoding, cast encoder memory to bf16
    ids2 = ids.reshape(N * T, 1).astype(jnp.int32)
    pe2 = jnp.tile(params["pe"][:T], (N, 1)).astype(jnp.float32)    # (N*T, E)
    enc2 = enc_out.reshape(N * S, E).astype(jnp.bfloat16)           # (N*S, E)

    kernel = _build_kernel(num_layers, heads, E, T, S, N, V, Vp)

    weight_order = ("emb", "wqkv1", "wo1", "bo1", "g_s", "b_s",
                    "wq2", "wkv2", "wo2", "bo2", "g_1", "b_1",
                    "wf1", "bf1", "wf2", "bf2", "g_2", "b_2",
                    "wout", "bout")
    inputs = [ids2, pe2, enc2,
              src_mask.astype(jnp.float32), trg_mask.astype(jnp.float32)]
    inputs += [kw[n] for n in weight_order]

    vmem = pl.BlockSpec(memory_space=pltpu.MemorySpace.VMEM)
    out = pl.pallas_call(
        kernel,
        in_specs=[vmem] * len(inputs),
        out_specs=vmem,
        out_shape=jax.ShapeDtypeStruct((N * T, Vp), jnp.float32),
        compiler_params=pltpu.CompilerParams(vmem_limit_bytes=32 * 1024 * 1024),
    )(*inputs)
    return out[:, :V].reshape(N, T, V)


# ----------------------------------------------------------------------------
# Pure-JAX reference (f32), mirroring the PyTorch forward in eval mode
# ----------------------------------------------------------------------------
def ref_forward(params, ids, enc_out, src_mask, trg_mask, *, heads, num_layers):
    E = params["emb"].shape[1]
    Dh = E // heads
    T = ids.shape[1]
    pe = params["pe"][:T]

    def layernorm(x, g, b):
        mu = jnp.mean(x, -1, keepdims=True)
        var = jnp.mean((x - mu) ** 2, -1, keepdims=True)
        return (x - mu) / jnp.sqrt(var + 1e-5) * g + b

    def mha(q_in, kv_in, wq, wk, wv, wo, bo, mask):
        q, k, v = q_in @ wq, kv_in @ wk, kv_in @ wv
        Tq, Tk = q.shape[0], k.shape[0]
        qh = q.reshape(Tq, heads, Dh)
        kh = k.reshape(Tk, heads, Dh)
        vh = v.reshape(Tk, heads, Dh)
        e = jnp.einsum("qhd,khd->hqk", qh, kh)
        e = jnp.where(mask[None] == 0.0, -1e20, e)
        p = jax.nn.softmax(e / jnp.sqrt(jnp.float32(E)), axis=-1)
        o = jnp.einsum("hqk,khd->qhd", p, vh).reshape(Tq, E)
        return o @ wo + bo

    def one_example(tok, enc, srcm, trgm):
        x = params["emb"][tok] * jnp.sqrt(jnp.float32(E)) + pe
        for l in range(num_layers):
            attn = mha(x, x, params["wq1"][l], params["wk1"][l], params["wv1"][l],
                       params["wo1"][l], params["bo1"][l], trgm)
            query = layernorm(attn + x, params["g_s"][l], params["b_s"][l])
            attn2 = mha(query, enc, params["wq2"][l], params["wk2"][l], params["wv2"][l],
                        params["wo2"][l], params["bo2"][l], srcm)
            x1 = layernorm(attn2 + query, params["g_1"][l], params["b_1"][l])
            ff = jax.nn.relu(x1 @ params["wf1"][l] + params["bf1"][l])
            ff = ff @ params["wf2"][l] + params["bf2"][l]
            x = layernorm(ff + x1, params["g_2"][l], params["b_2"][l])
        return x @ params["wout"] + params["bout"]

    return jax.vmap(one_example)(ids, enc_out, src_mask, trg_mask)


if __name__ == "__main__":
    N, T, S = 2, 8, 8            # batch, target seq, source seq
    E, H, L, FE = 32, 4, 2, 4    # embed, heads, layers, forward_expansion
    V, MAX_LEN = 64, 16          # trg_vocab_size, max_len

    key = jax.random.PRNGKey(0)
    kp, kid, kenc = jax.random.split(key, 3)
    params = make_decoder_params(kp, V, E, L, FE, MAX_LEN)

    ids = jax.random.randint(kid, (N, T), 0, V, dtype=jnp.int32)
    enc_out = jax.random.normal(kenc, (N, S, E), dtype=jnp.float32)
    trg_mask = jnp.broadcast_to(jnp.tril(jnp.ones((T, T), jnp.float32)), (N, T, T))
    src_mask = jnp.ones((N, 1, S), jnp.float32).at[1, 0, S - 2:].set(0.0)  # pad last 2 of batch 1

    out = decoder_forward(params, ids, enc_out, src_mask, trg_mask, heads=H, num_layers=L)
    out = jax.block_until_ready(out)

    ref = ref_forward(params, ids, enc_out, src_mask, trg_mask, heads=H, num_layers=L)
    assert out.shape == (N, T, V)
    assert bool(jnp.all(jnp.isfinite(out)))
    # bf16 matmuls (f32 accumulation) vs f32 reference -> looser tolerance
    err = float(jnp.max(jnp.abs(out - ref)))
    assert jnp.allclose(out, ref, atol=5e-2, rtol=5e-2), err
    print("KERNEL_OK")
</pallas_src>

<mosaic_0001>
module attributes {stable_mosaic.version = 11 : i64} {
  func.func @kernel(%arg0: memref<16x1xi32, #tpu.memory_space<vmem>>, %arg1: memref<16x32xf32, #tpu.memory_space<vmem>>, %arg2: memref<16x32xbf16, #tpu.memory_space<vmem>>, %arg3: memref<2x1x8xf32, #tpu.memory_space<vmem>>, %arg4: memref<2x8x8xf32, #tpu.memory_space<vmem>>, %arg5: memref<64x32xbf16, #tpu.memory_space<vmem>>, %arg6: memref<2x32x96xbf16, #tpu.memory_space<vmem>>, %arg7: memref<2x32x32xbf16, #tpu.memory_space<vmem>>, %arg8: memref<2x1x32xf32, #tpu.memory_space<vmem>>, %arg9: memref<2x1x32xf32, #tpu.memory_space<vmem>>, %arg10: memref<2x1x32xf32, #tpu.memory_space<vmem>>, %arg11: memref<2x32x32xbf16, #tpu.memory_space<vmem>>, %arg12: memref<2x32x64xbf16, #tpu.memory_space<vmem>>, %arg13: memref<2x32x32xbf16, #tpu.memory_space<vmem>>, %arg14: memref<2x1x32xf32, #tpu.memory_space<vmem>>, %arg15: memref<2x1x32xf32, #tpu.memory_space<vmem>>, %arg16: memref<2x1x32xf32, #tpu.memory_space<vmem>>, %arg17: memref<2x32x128xbf16, #tpu.memory_space<vmem>>, %arg18: memref<2x1x128xf32, #tpu.memory_space<vmem>>, %arg19: memref<2x128x32xbf16, #tpu.memory_space<vmem>>, %arg20: memref<2x1x32xf32, #tpu.memory_space<vmem>>, %arg21: memref<2x1x32xf32, #tpu.memory_space<vmem>>, %arg22: memref<2x1x32xf32, #tpu.memory_space<vmem>>, %arg23: memref<32x128xbf16, #tpu.memory_space<vmem>>, %arg24: memref<1x128xf32, #tpu.memory_space<vmem>>, %arg25: memref<16x128xf32, #tpu.memory_space<vmem>>) attributes {dimension_semantics = [], scalar_prefetch = 0 : i64, scratch_operands = 0 : i64, tpu.core_type = #tpu.core_type<tc>} {
    %c0 = arith.constant 0 : index
    %c0_0 = arith.constant 0 : index
    %0 = vector.load %arg0[%c0, %c0_0] : memref<16x1xi32, #tpu.memory_space<vmem>>, vector<16x1xi32>
    %1 = tpu.iota {dimensions = array<i32: 1>} : vector<16x64xi32>
    %2 = vector.broadcast %0 : vector<16x1xi32> to vector<16x64xi32>
    %3 = arith.cmpi eq, %1, %2 : vector<16x64xi32>
    %4 = arith.extui %3 : vector<16x64xi1> to vector<16x64xi32>
    %5 = arith.sitofp %4 : vector<16x64xi32> to vector<16x64xf32>
    %6 = arith.truncf %5 : vector<16x64xf32> to vector<16x64xbf16>
    %c0_1 = arith.constant 0 : index
    %c0_2 = arith.constant 0 : index
    %7 = vector.load %arg5[%c0_1, %c0_2] : memref<64x32xbf16, #tpu.memory_space<vmem>>, vector<64x32xbf16>
    %cst = arith.constant dense<0.000000e+00> : vector<16x32xf32>
    %8 = tpu.matmul %6, %7, %cst {dimension_numbers = #tpu.dot_dimension_numbers<[1], [0], [0], [1], [0, 0, 1, 1], [], []>} : vector<16x64xbf16>, vector<64x32xbf16>, vector<16x32xf32> -> vector<16x32xf32>
    %cst_3 = arith.constant 5.65685415 : f32
    %9 = vector.broadcast %cst_3 : f32 to vector<16x32xf32>
    %10 = arith.mulf %8, %9 : vector<16x32xf32>
    %c0_4 = arith.constant 0 : index
    %c0_5 = arith.constant 0 : index
    %11 = vector.load %arg1[%c0_4, %c0_5] : memref<16x32xf32, #tpu.memory_space<vmem>>, vector<16x32xf32>
    %12 = arith.addf %10, %11 : vector<16x32xf32>
    %c0_6 = arith.constant 0 : index
    %c0_7 = arith.constant 0 : index
    %13 = vector.load %arg2[%c0_6, %c0_7] : memref<16x32xbf16, #tpu.memory_space<vmem>>, vector<16x32xbf16>
    %c0_8 = arith.constant 0 : index
    %c0_9 = arith.constant 0 : index
    %c0_10 = arith.constant 0 : index
    %14 = vector.load %arg4[%c0_8, %c0_9, %c0_10] : memref<2x8x8xf32, #tpu.memory_space<vmem>>, vector<2x8x8xf32>
    %cst_11 = arith.constant 0.000000e+00 : f32
    %15 = vector.broadcast %cst_11 : f32 to vector<2x8x8xf32>
    %16 = arith.cmpf oeq, %14, %15 : vector<2x8x8xf32>
    %cst_12 = arith.constant -1.000000e+20 : f32
    %cst_13 = arith.constant 0.000000e+00 : f32
    %17 = vector.broadcast %cst_12 : f32 to vector<2x8x8xf32>
    %18 = vector.broadcast %cst_13 : f32 to vector<2x8x8xf32>
    %19 = arith.select %16, %17, %18 : vector<2x8x8xi1>, vector<2x8x8xf32>
    %c0_14 = arith.constant 0 : index
    %c0_15 = arith.constant 0 : index
    %c0_16 = arith.constant 0 : index
    %20 = vector.load %arg3[%c0_14, %c0_15, %c0_16] : memref<2x1x8xf32, #tpu.memory_space<vmem>>, vector<2x1x8xf32>
    %cst_17 = arith.constant 0.000000e+00 : f32
    %21 = vector.broadcast %cst_17 : f32 to vector<2x1x8xf32>
    %22 = arith.cmpf oeq, %20, %21 : vector<2x1x8xf32>
    %cst_18 = arith.constant -1.000000e+20 : f32
    %cst_19 = arith.constant 0.000000e+00 : f32
    %23 = vector.broadcast %cst_18 : f32 to vector<2x1x8xf32>
    %24 = vector.broadcast %cst_19 : f32 to vector<2x1x8xf32>
    %25 = arith.select %22, %23, %24 : vector<2x1x8xi1>, vector<2x1x8xf32>
    %26 = arith.truncf %12 : vector<16x32xf32> to vector<16x32xbf16>
    %c0_20 = arith.constant 0 : index
    %c0_21 = arith.constant 0 : index
    %c0_22 = arith.constant 0 : index
    %27 = vector.load %arg6[%c0_20, %c0_21, %c0_22] : memref<2x32x96xbf16, #tpu.memory_space<vmem>>, vector<1x32x96xbf16>
    %28 = vector.shape_cast %27 : vector<1x32x96xbf16> to vector<32x96xbf16>
    %cst_23 = arith.constant dense<0.000000e+00> : vector<16x96xf32>
    %29 = tpu.matmul %26, %28, %cst_23 {dimension_numbers = #tpu.dot_dimension_numbers<[1], [0], [0], [1], [0, 0, 1, 1], [], []>} : vector<16x32xbf16>, vector<32x96xbf16>, vector<16x96xf32> -> vector<16x96xf32>
    %30 = vector.extract_strided_slice %29 {offsets = [0, 0], sizes = [16, 32], strides = [1, 1]} : vector<16x96xf32> to vector<16x32xf32>
    %31 = vector.extract_strided_slice %29 {offsets = [0, 32], sizes = [16, 32], strides = [1, 1]} : vector<16x96xf32> to vector<16x32xf32>
    %32 = vector.extract_strided_slice %29 {offsets = [0, 64], sizes = [16, 32], strides = [1, 1]} : vector<16x96xf32> to vector<16x32xf32>
    %c0_24 = arith.constant 0 : index
    %c0_25 = arith.constant 0 : index
    %c0_26 = arith.constant 0 : index
    %33 = vector.load %arg7[%c0_24, %c0_25, %c0_26] : memref<2x32x32xbf16, #tpu.memory_space<vmem>>, vector<1x32x32xbf16>
    %34 = vector.shape_cast %33 : vector<1x32x32xbf16> to vector<32x32xbf16>
    %c0_27 = arith.constant 0 : index
    %c0_28 = arith.constant 0 : index
    %c0_29 = arith.constant 0 : index
    %35 = vector.load %arg8[%c0_27, %c0_28, %c0_29] : memref<2x1x32xf32, #tpu.memory_space<vmem>>, vector<1x1x32xf32>
    %36 = vector.shape_cast %35 : vector<1x1x32xf32> to vector<1x32xf32>
    %37 = vector.shape_cast %30 : vector<16x32xf32> to vector<2x8x32xf32>
    %38 = vector.shape_cast %31 : vector<16x32xf32> to vector<2x8x32xf32>
    %39 = vector.shape_cast %32 : vector<16x32xf32> to vector<2x8x32xf32>
    %40 = vector.extract_strided_slice %37 {offsets = [0, 0, 0], sizes = [2, 8, 8], strides = [1, 1, 1]} : vector<2x8x32xf32> to vector<2x8x8xf32>
    %41 = arith.truncf %40 : vector<2x8x8xf32> to vector<2x8x8xbf16>
    %42 = vector.extract_strided_slice %38 {offsets = [0, 0, 0], sizes = [2, 8, 8], strides = [1, 1, 1]} : vector<2x8x32xf32> to vector<2x8x8xf32>
    %43 = arith.truncf %42 : vector<2x8x8xf32> to vector<2x8x8xbf16>
    %44 = vector.extract_strided_slice %39 {offsets = [0, 0, 0], sizes = [2, 8, 8], strides = [1, 1, 1]} : vector<2x8x32xf32> to vector<2x8x8xf32>
    %45 = arith.truncf %44 : vector<2x8x8xf32> to vector<2x8x8xbf16>
    "tpu.trace_start"() <{level = 10 : i32, message = "nqd,nkd->nqk"}> : () -> ()
    %cst_30 = arith.constant dense<0.000000e+00> : vector<2x8x8xf32>
    %46 = tpu.matmul %41, %43, %cst_30 {dimension_numbers = #tpu.dot_dimension_numbers<[2], [2], [1], [1], [0, 0, 0, 1, 1, 1], [0], [0]>} : vector<2x8x8xbf16>, vector<2x8x8xbf16>, vector<2x8x8xf32> -> vector<2x8x8xf32>
    "tpu.trace_stop"() : () -> ()
    %47 = arith.addf %46, %19 : vector<2x8x8xf32>
    %cst_31 = arith.constant dense<0xFF800000> : vector<2x8xf32>
    %48 = vector.multi_reduction <maximumf>, %47, %cst_31 [2] : vector<2x8x8xf32> to vector<2x8xf32>
    %49 = vector.shape_cast %48 : vector<2x8xf32> to vector<2x8x1xf32>
    %50 = vector.broadcast %49 : vector<2x8x1xf32> to vector<2x8x8xf32>
    %51 = arith.subf %47, %50 : vector<2x8x8xf32>
    %52 = math.exp %51 : vector<2x8x8xf32>
    %cst_32 = arith.constant dense<0.000000e+00> : vector<2x8xf32>
    %53 = vector.multi_reduction <add>, %52, %cst_32 [2] : vector<2x8x8xf32> to vector<2x8xf32>
    %54 = vector.shape_cast %53 : vector<2x8xf32> to vector<2x8x1xf32>
    %55 = vector.broadcast %54 : vector<2x8x1xf32> to vector<2x8x8xf32>
    %56 = arith.divf %52, %55 : vector<2x8x8xf32>
    %57 = arith.truncf %56 : vector<2x8x8xf32> to vector<2x8x8xbf16>
    "tpu.trace_start"() <{level = 10 : i32, message = "nqk,nkd->nqd"}> : () -> ()
    %cst_33 = arith.constant dense<0.000000e+00> : vector<2x8x8xf32>
    %58 = tpu.matmul %57, %45, %cst_33 {dimension_numbers = #tpu.dot_dimension_numbers<[2], [1], [1], [2], [0, 0, 0, 1, 1, 2], [0], [0]>} : vector<2x8x8xbf16>, vector<2x8x8xbf16>, vector<2x8x8xf32> -> vector<2x8x8xf32>
    "tpu.trace_stop"() : () -> ()
    %59 = vector.shape_cast %58 : vector<2x8x8xf32> to vector<16x8xf32>
    %60 = arith.truncf %59 : vector<16x8xf32> to vector<16x8xbf16>
    %61 = vector.extract_strided_slice %34 {offsets = [0, 0], sizes = [8, 32], strides = [1, 1]} : vector<32x32xbf16> to vector<8x32xbf16>
    %cst_34 = arith.constant dense<0.000000e+00> : vector<16x32xf32>
    %62 = tpu.matmul %60, %61, %cst_34 {dimension_numbers = #tpu.dot_dimension_numbers<[1], [0], [0], [1], [0, 0, 1, 1], [], []>} : vector<16x8xbf16>, vector<8x32xbf16>, vector<16x32xf32> -> vector<16x32xf32>
    %63 = vector.extract_strided_slice %37 {offsets = [0, 0, 8], sizes = [2, 8, 8], strides = [1, 1, 1]} : vector<2x8x32xf32> to vector<2x8x8xf32>
    %64 = arith.truncf %63 : vector<2x8x8xf32> to vector<2x8x8xbf16>
    %65 = vector.extract_strided_slice %38 {offsets = [0, 0, 8], sizes = [2, 8, 8], strides = [1, 1, 1]} : vector<2x8x32xf32> to vector<2x8x8xf32>
    %66 = arith.truncf %65 : vector<2x8x8xf32> to vector<2x8x8xbf16>
    %67 = vector.extract_strided_slice %39 {offsets = [0, 0, 8], sizes = [2, 8, 8], strides = [1, 1, 1]} : vector<2x8x32xf32> to vector<2x8x8xf32>
    %68 = arith.truncf %67 : vector<2x8x8xf32> to vector<2x8x8xbf16>
    "tpu.trace_start"() <{level = 10 : i32, message = "nqd,nkd->nqk"}> : () -> ()
    %cst_35 = arith.constant dense<0.000000e+00> : vector<2x8x8xf32>
    %69 = tpu.matmul %64, %66, %cst_35 {dimension_numbers = #tpu.dot_dimension_numbers<[2], [2], [1], [1], [0, 0, 0, 1, 1, 1], [0], [0]>} : vector<2x8x8xbf16>, vector<2x8x8xbf16>, vector<2x8x8xf32> -> vector<2x8x8xf32>
    "tpu.trace_stop"() : () -> ()
    %70 = arith.addf %69, %19 : vector<2x8x8xf32>
    %cst_36 = arith.constant dense<0xFF800000> : vector<2x8xf32>
    %71 = vector.multi_reduction <maximumf>, %70, %cst_36 [2] : vector<2x8x8xf32> to vector<2x8xf32>
    %72 = vector.shape_cast %71 : vector<2x8xf32> to vector<2x8x1xf32>
    %73 = vector.broadcast %72 : vector<2x8x1xf32> to vector<2x8x8xf32>
    %74 = arith.subf %70, %73 : vector<2x8x8xf32>
    %75 = math.exp %74 : vector<2x8x8xf32>
    %cst_37 = arith.constant dense<0.000000e+00> : vector<2x8xf32>
    %76 = vector.multi_reduction <add>, %75, %cst_37 [2] : vector<2x8x8xf32> to vector<2x8xf32>
    %77 = vector.shape_cast %76 : vector<2x8xf32> to vector<2x8x1xf32>
    %78 = vector.broadcast %77 : vector<2x8x1xf32> to vector<2x8x8xf32>
    %79 = arith.divf %75, %78 : vector<2x8x8xf32>
    %80 = arith.truncf %79 : vector<2x8x8xf32> to vector<2x8x8xbf16>
    "tpu.trace_start"() <{level = 10 : i32, message = "nqk,nkd->nqd"}> : () -> ()
    %cst_38 = arith.constant dense<0.000000e+00> : vector<2x8x8xf32>
    %81 = tpu.matmul %80, %68, %cst_38 {dimension_numbers = #tpu.dot_dimension_numbers<[2], [1], [1], [2], [0, 0, 0, 1, 1, 2], [0], [0]>} : vector<2x8x8xbf16>, vector<2x8x8xbf16>, vector<2x8x8xf32> -> vector<2x8x8xf32>
    "tpu.trace_stop"() : () -> ()
    %82 = vector.shape_cast %81 : vector<2x8x8xf32> to vector<16x8xf32>
    %83 = arith.truncf %82 : vector<16x8xf32> to vector<16x8xbf16>
    %84 = vector.extract_strided_slice %34 {offsets = [8, 0], sizes = [8, 32], strides = [1, 1]} : vector<32x32xbf16> to vector<8x32xbf16>
    %cst_39 = arith.constant dense<0.000000e+00> : vector<16x32xf32>
    %85 = tpu.matmul %83, %84, %cst_39 {dimension_numbers = #tpu.dot_dimension_numbers<[1], [0], [0], [1], [0, 0, 1, 1], [], []>} : vector<16x8xbf16>, vector<8x32xbf16>, vector<16x32xf32> -> vector<16x32xf32>
    %86 = arith.addf %62, %85 : vector<16x32xf32>
    %87 = vector.extract_strided_slice %37 {offsets = [0, 0, 16], sizes = [2, 8, 8], strides = [1, 1, 1]} : vector<2x8x32xf32> to vector<2x8x8xf32>
    %88 = arith.truncf %87 : vector<2x8x8xf32> to vector<2x8x8xbf16>
    %89 = vector.extract_strided_slice %38 {offsets = [0, 0, 16], sizes = [2, 8, 8], strides = [1, 1, 1]} : vector<2x8x32xf32> to vector<2x8x8xf32>
    %90 = arith.truncf %89 : vector<2x8x8xf32> to vector<2x8x8xbf16>
    %91 = vector.extract_strided_slice %39 {offsets = [0, 0, 16], sizes = [2, 8, 8], strides = [1, 1, 1]} : vector<2x8x32xf32> to vector<2x8x8xf32>
    %92 = arith.truncf %91 : vector<2x8x8xf32> to vector<2x8x8xbf16>
    "tpu.trace_start"() <{level = 10 : i32, message = "nqd,nkd->nqk"}> : () -> ()
    %cst_40 = arith.constant dense<0.000000e+00> : vector<2x8x8xf32>
    %93 = tpu.matmul %88, %90, %cst_40 {dimension_numbers = #tpu.dot_dimension_numbers<[2], [2], [1], [1], [0, 0, 0, 1, 1, 1], [0], [0]>} : vector<2x8x8xbf16>, vector<2x8x8xbf16>, vector<2x8x8xf32> -> vector<2x8x8xf32>
    "tpu.trace_stop"() : () -> ()
    %94 = arith.addf %93, %19 : vector<2x8x8xf32>
    %cst_41 = arith.constant dense<0xFF800000> : vector<2x8xf32>
    %95 = vector.multi_reduction <maximumf>, %94, %cst_41 [2] : vector<2x8x8xf32> to vector<2x8xf32>
    %96 = vector.shape_cast %95 : vector<2x8xf32> to vector<2x8x1xf32>
    %97 = vector.broadcast %96 : vector<2x8x1xf32> to vector<2x8x8xf32>
    %98 = arith.subf %94, %97 : vector<2x8x8xf32>
    %99 = math.exp %98 : vector<2x8x8xf32>
    %cst_42 = arith.constant dense<0.000000e+00> : vector<2x8xf32>
    %100 = vector.multi_reduction <add>, %99, %cst_42 [2] : vector<2x8x8xf32> to vector<2x8xf32>
    %101 = vector.shape_cast %100 : vector<2x8xf32> to vector<2x8x1xf32>
    %102 = vector.broadcast %101 : vector<2x8x1xf32> to vector<2x8x8xf32>
    %103 = arith.divf %99, %102 : vector<2x8x8xf32>
    %104 = arith.truncf %103 : vector<2x8x8xf32> to vector<2x8x8xbf16>
    "tpu.trace_start"() <{level = 10 : i32, message = "nqk,nkd->nqd"}> : () -> ()
    %cst_43 = arith.constant dense<0.000000e+00> : vector<2x8x8xf32>
    %105 = tpu.matmul %104, %92, %cst_43 {dimension_numbers = #tpu.dot_dimension_numbers<[2], [1], [1], [2], [0, 0, 0, 1, 1, 2], [0], [0]>} : vector<2x8x8xbf16>, vector<2x8x8xbf16>, vector<2x8x8xf32> -> vector<2x8x8xf32>
    "tpu.trace_stop"() : () -> ()
    %106 = vector.shape_cast %105 : vector<2x8x8xf32> to vector<16x8xf32>
    %107 = arith.truncf %106 : vector<16x8xf32> to vector<16x8xbf16>
    %108 = vector.extract_strided_slice %34 {offsets = [16, 0], sizes = [8, 32], strides = [1, 1]} : vector<32x32xbf16> to vector<8x32xbf16>
    %cst_44 = arith.constant dense<0.000000e+00> : vector<16x32xf32>
    %109 = tpu.matmul %107, %108, %cst_44 {dimension_numbers = #tpu.dot_dimension_numbers<[1], [0], [0], [1], [0, 0, 1, 1], [], []>} : vector<16x8xbf16>, vector<8x32xbf16>, vector<16x32xf32> -> vector<16x32xf32>
    %110 = arith.addf %86, %109 : vector<16x32xf32>
    %111 = vector.extract_strided_slice %37 {offsets = [0, 0, 24], sizes = [2, 8, 8], strides = [1, 1, 1]} : vector<2x8x32xf32> to vector<2x8x8xf32>
    %112 = arith.truncf %111 : vector<2x8x8xf32> to vector<2x8x8xbf16>
    %113 = vector.extract_strided_slice %38 {offsets = [0, 0, 24], sizes = [2, 8, 8], strides = [1, 1, 1]} : vector<2x8x32xf32> to vector<2x8x8xf32>
    %114 = arith.truncf %113 : vector<2x8x8xf32> to vector<2x8x8xbf16>
    %115 = vector.extract_strided_slice %39 {offsets = [0, 0, 24], sizes = [2, 8, 8], strides = [1, 1, 1]} : vector<2x8x32xf32> to vector<2x8x8xf32>
    %116 = arith.truncf %115 : vector<2x8x8xf32> to vector<2x8x8xbf16>
    "tpu.trace_start"() <{level = 10 : i32, message = "nqd,nkd->nqk"}> : () -> ()
    %cst_45 = arith.constant dense<0.000000e+00> : vector<2x8x8xf32>
    %117 = tpu.matmul %112, %114, %cst_45 {dimension_numbers = #tpu.dot_dimension_numbers<[2], [2], [1], [1], [0, 0, 0, 1, 1, 1], [0], [0]>} : vector<2x8x8xbf16>, vector<2x8x8xbf16>, vector<2x8x8xf32> -> vector<2x8x8xf32>
    "tpu.trace_stop"() : () -> ()
    %118 = arith.addf %117, %19 : vector<2x8x8xf32>
    %cst_46 = arith.constant dense<0xFF800000> : vector<2x8xf32>
    %119 = vector.multi_reduction <maximumf>, %118, %cst_46 [2] : vector<2x8x8xf32> to vector<2x8xf32>
    %120 = vector.shape_cast %119 : vector<2x8xf32> to vector<2x8x1xf32>
    %121 = vector.broadcast %120 : vector<2x8x1xf32> to vector<2x8x8xf32>
    %122 = arith.subf %118, %121 : vector<2x8x8xf32>
    %123 = math.exp %122 : vector<2x8x8xf32>
    %cst_47 = arith.constant dense<0.000000e+00> : vector<2x8xf32>
    %124 = vector.multi_reduction <add>, %123, %cst_47 [2] : vector<2x8x8xf32> to vector<2x8xf32>
    %125 = vector.shape_cast %124 : vector<2x8xf32> to vector<2x8x1xf32>
    %126 = vector.broadcast %125 : vector<2x8x1xf32> to vector<2x8x8xf32>
    %127 = arith.divf %123, %126 : vector<2x8x8xf32>
    %128 = arith.truncf %127 : vector<2x8x8xf32> to vector<2x8x8xbf16>
    "tpu.trace_start"() <{level = 10 : i32, message = "nqk,nkd->nqd"}> : () -> ()
    %cst_48 = arith.constant dense<0.000000e+00> : vector<2x8x8xf32>
    %129 = tpu.matmul %128, %116, %cst_48 {dimension_numbers = #tpu.dot_dimension_numbers<[2], [1], [1], [2], [0, 0, 0, 1, 1, 2], [0], [0]>} : vector<2x8x8xbf16>, vector<2x8x8xbf16>, vector<2x8x8xf32> -> vector<2x8x8xf32>
    "tpu.trace_stop"() : () -> ()
    %130 = vector.shape_cast %129 : vector<2x8x8xf32> to vector<16x8xf32>
    %131 = arith.truncf %130 : vector<16x8xf32> to vector<16x8xbf16>
    %132 = vector.extract_strided_slice %34 {offsets = [24, 0], sizes = [8, 32], strides = [1, 1]} : vector<32x32xbf16> to vector<8x32xbf16>
    %cst_49 = arith.constant dense<0.000000e+00> : vector<16x32xf32>
    %133 = tpu.matmul %131, %132, %cst_49 {dimension_numbers = #tpu.dot_dimension_numbers<[1], [0], [0], [1], [0, 0, 1, 1], [], []>} : vector<16x8xbf16>, vector<8x32xbf16>, vector<16x32xf32> -> vector<16x32xf32>
    %134 = arith.addf %110, %133 : vector<16x32xf32>
    %135 = vector.broadcast %36 : vector<1x32xf32> to vector<16x32xf32>
    %136 = arith.addf %134, %135 : vector<16x32xf32>
    %137 = arith.addf %136, %12 : vector<16x32xf32>
    %c0_50 = arith.constant 0 : index
    %c0_51 = arith.constant 0 : index
    %c0_52 = arith.constant 0 : index
    %138 = vector.load %arg9[%c0_50, %c0_51, %c0_52] : memref<2x1x32xf32, #tpu.memory_space<vmem>>, vector<1x1x32xf32>
    %139 = vector.shape_cast %138 : vector<1x1x32xf32> to vector<1x32xf32>
    %c0_53 = arith.constant 0 : index
    %c0_54 = arith.constant 0 : index
    %c0_55 = arith.constant 0 : index
    %140 = vector.load %arg10[%c0_53, %c0_54, %c0_55] : memref<2x1x32xf32, #tpu.memory_space<vmem>>, vector<1x1x32xf32>
    %141 = vector.shape_cast %140 : vector<1x1x32xf32> to vector<1x32xf32>
    %cst_56 = arith.constant dense<0.000000e+00> : vector<16xf32>
    %142 = vector.multi_reduction <add>, %137, %cst_56 [1] : vector<16x32xf32> to vector<16xf32>
    %143 = vector.shape_cast %142 : vector<16xf32> to vector<16x1xf32>
    %cst_57 = arith.constant 3.200000e+01 : f32
    %144 = vector.broadcast %cst_57 : f32 to vector<16x1xf32>
    %145 = arith.divf %143, %144 : vector<16x1xf32>
    %146 = vector.broadcast %145 : vector<16x1xf32> to vector<16x32xf32>
    %147 = arith.subf %137, %146 : vector<16x32xf32>
    %148 = arith.mulf %147, %147 : vector<16x32xf32>
    %cst_58 = arith.constant dense<0.000000e+00> : vector<16xf32>
    %149 = vector.multi_reduction <add>, %148, %cst_58 [1] : vector<16x32xf32> to vector<16xf32>
    %150 = vector.shape_cast %149 : vector<16xf32> to vector<16x1xf32>
    %cst_59 = arith.constant 3.200000e+01 : f32
    %151 = vector.broadcast %cst_59 : f32 to vector<16x1xf32>
    %152 = arith.divf %150, %151 : vector<16x1xf32>
    %153 = vector.broadcast %145 : vector<16x1xf32> to vector<16x32xf32>
    %154 = arith.subf %137, %153 : vector<16x32xf32>
    %cst_60 = arith.constant 9.99999974E-6 : f32
    %155 = vector.broadcast %cst_60 : f32 to vector<16x1xf32>
    %156 = arith.addf %152, %155 : vector<16x1xf32>
    %157 = math.rsqrt %156 : vector<16x1xf32>
    %158 = vector.broadcast %157 : vector<16x1xf32> to vector<16x32xf32>
    %159 = arith.mulf %154, %158 : vector<16x32xf32>
    %160 = vector.broadcast %139 : vector<1x32xf32> to vector<16x32xf32>
    %161 = arith.mulf %159, %160 : vector<16x32xf32>
    %162 = vector.broadcast %141 : vector<1x32xf32> to vector<16x32xf32>
    %163 = arith.addf %161, %162 : vector<16x32xf32>
    %164 = arith.truncf %163 : vector<16x32xf32> to vector<16x32xbf16>
    %c0_61 = arith.constant 0 : index
    %c0_62 = arith.constant 0 : index
    %c0_63 = arith.constant 0 : index
    %165 = vector.load %arg11[%c0_61, %c0_62, %c0_63] : memref<2x32x32xbf16, #tpu.memory_space<vmem>>, vector<1x32x32xbf16>
    %166 = vector.shape_cast %165 : vector<1x32x32xbf16> to vector<32x32xbf16>
    %cst_64 = arith.constant dense<0.000000e+00> : vector<16x32xf32>
    %167 = tpu.matmul %164, %166, %cst_64 {dimension_numbers = #tpu.dot_dimension_numbers<[1], [0], [0], [1], [0, 0, 1, 1], [], []>} : vector<16x32xbf16>, vector<32x32xbf16>, vector<16x32xf32> -> vector<16x32xf32>
    %c0_65 = arith.constant 0 : index
    %c0_66 = arith.constant 0 : index
    %c0_67 = arith.constant 0 : index
    %168 = vector.load %arg12[%c0_65, %c0_66, %c0_67] : memref<2x32x64xbf16, #tpu.memory_space<vmem>>, vector<1x32x64xbf16>
    %169 = vector.shape_cast %168 : vector<1x32x64xbf16> to vector<32x64xbf16>
    %cst_68 = arith.constant dense<0.000000e+00> : vector<16x64xf32>
    %170 = tpu.matmul %13, %169, %cst_68 {dimension_numbers = #tpu.dot_dimension_numbers<[1], [0], [0], [1], [0, 0, 1, 1], [], []>} : vector<16x32xbf16>, vector<32x64xbf16>, vector<16x64xf32> -> vector<16x64xf32>
    %171 = vector.extract_strided_slice %170 {offsets = [0, 0], sizes = [16, 32], strides = [1, 1]} : vector<16x64xf32> to vector<16x32xf32>
    %172 = vector.extract_strided_slice %170 {offsets = [0, 32], sizes = [16, 32], strides = [1, 1]} : vector<16x64xf32> to vector<16x32xf32>
    %c0_69 = arith.constant 0 : index
    %c0_70 = arith.constant 0 : index
    %c0_71 = arith.constant 0 : index
    %173 = vector.load %arg13[%c0_69, %c0_70, %c0_71] : memref<2x32x32xbf16, #tpu.memory_space<vmem>>, vector<1x32x32xbf16>
    %174 = vector.shape_cast %173 : vector<1x32x32xbf16> to vector<32x32xbf16>
    %c0_72 = arith.constant 0 : index
    %c0_73 = arith.constant 0 : index
    %c0_74 = arith.constant 0 : index
    %175 = vector.load %arg14[%c0_72, %c0_73, %c0_74] : memref<2x1x32xf32, #tpu.memory_space<vmem>>, vector<1x1x32xf32>
    %176 = vector.shape_cast %175 : vector<1x1x32xf32> to vector<1x32xf32>
    %177 = vector.shape_cast %167 : vector<16x32xf32> to vector<2x8x32xf32>
    %178 = vector.shape_cast %171 : vector<16x32xf32> to vector<2x8x32xf32>
    %179 = vector.shape_cast %172 : vector<16x32xf32> to vector<2x8x32xf32>
    %180 = vector.extract_strided_slice %177 {offsets = [0, 0, 0], sizes = [2, 8, 8], strides = [1, 1, 1]} : vector<2x8x32xf32> to vector<2x8x8xf32>
    %181 = arith.truncf %180 : vector<2x8x8xf32> to vector<2x8x8xbf16>
    %182 = vector.extract_strided_slice %178 {offsets = [0, 0, 0], sizes = [2, 8, 8], strides = [1, 1, 1]} : vector<2x8x32xf32> to vector<2x8x8xf32>
    %183 = arith.truncf %182 : vector<2x8x8xf32> to vector<2x8x8xbf16>
    %184 = vector.extract_strided_slice %179 {offsets = [0, 0, 0], sizes = [2, 8, 8], strides = [1, 1, 1]} : vector<2x8x32xf32> to vector<2x8x8xf32>
    %185 = arith.truncf %184 : vector<2x8x8xf32> to vector<2x8x8xbf16>
    "tpu.trace_start"() <{level = 10 : i32, message = "nqd,nkd->nqk"}> : () -> ()
    %cst_75 = arith.constant dense<0.000000e+00> : vector<2x8x8xf32>
    %186 = tpu.matmul %181, %183, %cst_75 {dimension_numbers = #tpu.dot_dimension_numbers<[2], [2], [1], [1], [0, 0, 0, 1, 1, 1], [0], [0]>} : vector<2x8x8xbf16>, vector<2x8x8xbf16>, vector<2x8x8xf32> -> vector<2x8x8xf32>
    "tpu.trace_stop"() : () -> ()
    %187 = vector.broadcast %25 : vector<2x1x8xf32> to vector<2x8x8xf32>
    %188 = arith.addf %186, %187 : vector<2x8x8xf32>
    %cst_76 = arith.constant dense<0xFF800000> : vector<2x8xf32>
    %189 = vector.multi_reduction <maximumf>, %188, %cst_76 [2] : vector<2x8x8xf32> to vector<2x8xf32>
    %190 = vector.shape_cast %189 : vector<2x8xf32> to vector<2x8x1xf32>
    %191 = vector.broadcast %190 : vector<2x8x1xf32> to vector<2x8x8xf32>
    %192 = arith.subf %188, %191 : vector<2x8x8xf32>
    %193 = math.exp %192 : vector<2x8x8xf32>
    %cst_77 = arith.constant dense<0.000000e+00> : vector<2x8xf32>
    %194 = vector.multi_reduction <add>, %193, %cst_77 [2] : vector<2x8x8xf32> to vector<2x8xf32>
    %195 = vector.shape_cast %194 : vector<2x8xf32> to vector<2x8x1xf32>
    %196 = vector.broadcast %195 : vector<2x8x1xf32> to vector<2x8x8xf32>
    %197 = arith.divf %193, %196 : vector<2x8x8xf32>
    %198 = arith.truncf %197 : vector<2x8x8xf32> to vector<2x8x8xbf16>
    "tpu.trace_start"() <{level = 10 : i32, message = "nqk,nkd->nqd"}> : () -> ()
    %cst_78 = arith.constant dense<0.000000e+00> : vector<2x8x8xf32>
    %199 = tpu.matmul %198, %185, %cst_78 {dimension_numbers = #tpu.dot_dimension_numbers<[2], [1], [1], [2], [0, 0, 0, 1, 1, 2], [0], [0]>} : vector<2x8x8xbf16>, vector<2x8x8xbf16>, vector<2x8x8xf32> -> vector<2x8x8xf32>
    "tpu.trace_stop"() : () -> ()
    %200 = vector.shape_cast %199 : vector<2x8x8xf32> to vector<16x8xf32>
    %201 = arith.truncf %200 : vector<16x8xf32> to vector<16x8xbf16>
    %202 = vector.extract_strided_slice %174 {offsets = [0, 0], sizes = [8, 32], strides = [1, 1]} : vector<32x32xbf16> to vector<8x32xbf16>
    %cst_79 = arith.constant dense<0.000000e+00> : vector<16x32xf32>
    %203 = tpu.matmul %201, %202, %cst_79 {dimension_numbers = #tpu.dot_dimension_numbers<[1], [0], [0], [1], [0, 0, 1, 1], [], []>} : vector<16x8xbf16>, vector<8x32xbf16>, vector<16x32xf32> -> vector<16x32xf32>
    %204 = vector.extract_strided_slice %177 {offsets = [0, 0, 8], sizes = [2, 8, 8], strides = [1, 1, 1]} : vector<2x8x32xf32> to vector<2x8x8xf32>
    %205 = arith.truncf %204 : vector<2x8x8xf32> to vector<2x8x8xbf16>
    %206 = vector.extract_strided_slice %178 {offsets = [0, 0, 8], sizes = [2, 8, 8], strides = [1, 1, 1]} : vector<2x8x32xf32> to vector<2x8x8xf32>
    %207 = arith.truncf %206 : vector<2x8x8xf32> to vector<2x8x8xbf16>
    %208 = vector.extract_strided_slice %179 {offsets = [0, 0, 8], sizes = [2, 8, 8], strides = [1, 1, 1]} : vector<2x8x32xf32> to vector<2x8x8xf32>
    %209 = arith.truncf %208 : vector<2x8x8xf32> to vector<2x8x8xbf16>
    "tpu.trace_start"() <{level = 10 : i32, message = "nqd,nkd->nqk"}> : () -> ()
    %cst_80 = arith.constant dense<0.000000e+00> : vector<2x8x8xf32>
    %210 = tpu.matmul %205, %207, %cst_80 {dimension_numbers = #tpu.dot_dimension_numbers<[2], [2], [1], [1], [0, 0, 0, 1, 1, 1], [0], [0]>} : vector<2x8x8xbf16>, vector<2x8x8xbf16>, vector<2x8x8xf32> -> vector<2x8x8xf32>
    "tpu.trace_stop"() : () -> ()
    %211 = vector.broadcast %25 : vector<2x1x8xf32> to vector<2x8x8xf32>
    %212 = arith.addf %210, %211 : vector<2x8x8xf32>
    %cst_81 = arith.constant dense<0xFF800000> : vector<2x8xf32>
    %213 = vector.multi_reduction <maximumf>, %212, %cst_81 [2] : vector<2x8x8xf32> to vector<2x8xf32>
    %214 = vector.shape_cast %213 : vector<2x8xf32> to vector<2x8x1xf32>
    %215 = vector.broadcast %214 : vector<2x8x1xf32> to vector<2x8x8xf32>
    %216 = arith.subf %212, %215 : vector<2x8x8xf32>
    %217 = math.exp %216 : vector<2x8x8xf32>
    %cst_82 = arith.constant dense<0.000000e+00> : vector<2x8xf32>
    %218 = vector.multi_reduction <add>, %217, %cst_82 [2] : vector<2x8x8xf32> to vector<2x8xf32>
    %219 = vector.shape_cast %218 : vector<2x8xf32> to vector<2x8x1xf32>
    %220 = vector.broadcast %219 : vector<2x8x1xf32> to vector<2x8x8xf32>
    %221 = arith.divf %217, %220 : vector<2x8x8xf32>
    %222 = arith.truncf %221 : vector<2x8x8xf32> to vector<2x8x8xbf16>
    "tpu.trace_start"() <{level = 10 : i32, message = "nqk,nkd->nqd"}> : () -> ()
    %cst_83 = arith.constant dense<0.000000e+00> : vector<2x8x8xf32>
    %223 = tpu.matmul %222, %209, %cst_83 {dimension_numbers = #tpu.dot_dimension_numbers<[2], [1], [1], [2], [0, 0, 0, 1, 1, 2], [0], [0]>} : vector<2x8x8xbf16>, vector<2x8x8xbf16>, vector<2x8x8xf32> -> vector<2x8x8xf32>
    "tpu.trace_stop"() : () -> ()
    %224 = vector.shape_cast %223 : vector<2x8x8xf32> to vector<16x8xf32>
    %225 = arith.truncf %224 : vector<16x8xf32> to vector<16x8xbf16>
    %226 = vector.extract_strided_slice %174 {offsets = [8, 0], sizes = [8, 32], strides = [1, 1]} : vector<32x32xbf16> to vector<8x32xbf16>
    %cst_84 = arith.constant dense<0.000000e+00> : vector<16x32xf32>
    %227 = tpu.matmul %225, %226, %cst_84 {dimension_numbers = #tpu.dot_dimension_numbers<[1], [0], [0], [1], [0, 0, 1, 1], [], []>} : vector<16x8xbf16>, vector<8x32xbf16>, vector<16x32xf32> -> vector<16x32xf32>
    %228 = arith.addf %203, %227 : vector<16x32xf32>
    %229 = vector.extract_strided_slice %177 {offsets = [0, 0, 16], sizes = [2, 8, 8], strides = [1, 1, 1]} : vector<2x8x32xf32> to vector<2x8x8xf32>
    %230 = arith.truncf %229 : vector<2x8x8xf32> to vector<2x8x8xbf16>
    %231 = vector.extract_strided_slice %178 {offsets = [0, 0, 16], sizes = [2, 8, 8], strides = [1, 1, 1]} : vector<2x8x32xf32> to vector<2x8x8xf32>
    %232 = arith.truncf %231 : vector<2x8x8xf32> to vector<2x8x8xbf16>
    %233 = vector.extract_strided_slice %179 {offsets = [0, 0, 16], sizes = [2, 8, 8], strides = [1, 1, 1]} : vector<2x8x32xf32> to vector<2x8x8xf32>
    %234 = arith.truncf %233 : vector<2x8x8xf32> to vector<2x8x8xbf16>
    "tpu.trace_start"() <{level = 10 : i32, message = "nqd,nkd->nqk"}> : () -> ()
    %cst_85 = arith.constant dense<0.000000e+00> : vector<2x8x8xf32>
    %235 = tpu.matmul %230, %232, %cst_85 {dimension_numbers = #tpu.dot_dimension_numbers<[2], [2], [1], [1], [0, 0, 0, 1, 1, 1], [0], [0]>} : vector<2x8x8xbf16>, vector<2x8x8xbf16>, vector<2x8x8xf32> -> vector<2x8x8xf32>
    "tpu.trace_stop"() : () -> ()
    %236 = vector.broadcast %25 : vector<2x1x8xf32> to vector<2x8x8xf32>
    %237 = arith.addf %235, %236 : vector<2x8x8xf32>
    %cst_86 = arith.constant dense<0xFF800000> : vector<2x8xf32>
    %238 = vector.multi_reduction <maximumf>, %237, %cst_86 [2] : vector<2x8x8xf32> to vector<2x8xf32>
    %239 = vector.shape_cast %238 : vector<2x8xf32> to vector<2x8x1xf32>
    %240 = vector.broadcast %239 : vector<2x8x1xf32> to vector<2x8x8xf32>
    %241 = arith.subf %237, %240 : vector<2x8x8xf32>
    %242 = math.exp %241 : vector<2x8x8xf32>
    %cst_87 = arith.constant dense<0.000000e+00> : vector<2x8xf32>
    %243 = vector.multi_reduction <add>, %242, %cst_87 [2] : vector<2x8x8xf32> to vector<2x8xf32>
    %244 = vector.shape_cast %243 : vector<2x8xf32> to vector<2x8x1xf32>
    %245 = vector.broadcast %244 : vector<2x8x1xf32> to vector<2x8x8xf32>
    %246 = arith.divf %242, %245 : vector<2x8x8xf32>
    %247 = arith.truncf %246 : vector<2x8x8xf32> to vector<2x8x8xbf16>
    "tpu.trace_start"() <{level = 10 : i32, message = "nqk,nkd->nqd"}> : () -> ()
    %cst_88 = arith.constant dense<0.000000e+00> : vector<2x8x8xf32>
    %248 = tpu.matmul %247, %234, %cst_88 {dimension_numbers = #tpu.dot_dimension_numbers<[2], [1], [1], [2], [0, 0, 0, 1, 1, 2], [0], [0]>} : vector<2x8x8xbf16>, vector<2x8x8xbf16>, vector<2x8x8xf32> -> vector<2x8x8xf32>
    "tpu.trace_stop"() : () -> ()
    %249 = vector.shape_cast %248 : vector<2x8x8xf32> to vector<16x8xf32>
    %250 = arith.truncf %249 : vector<16x8xf32> to vector<16x8xbf16>
    %251 = vector.extract_strided_slice %174 {offsets = [16, 0], sizes = [8, 32], strides = [1, 1]} : vector<32x32xbf16> to vector<8x32xbf16>
    %cst_89 = arith.constant dense<0.000000e+00> : vector<16x32xf32>
    %252 = tpu.matmul %250, %251, %cst_89 {dimension_numbers = #tpu.dot_dimension_numbers<[1], [0], [0], [1], [0, 0, 1, 1], [], []>} : vector<16x8xbf16>, vector<8x32xbf16>, vector<16x32xf32> -> vector<16x32xf32>
    %253 = arith.addf %228, %252 : vector<16x32xf32>
    %254 = vector.extract_strided_slice %177 {offsets = [0, 0, 24], sizes = [2, 8, 8], strides = [1, 1, 1]} : vector<2x8x32xf32> to vector<2x8x8xf32>
    %255 = arith.truncf %254 : vector<2x8x8xf32> to vector<2x8x8xbf16>
    %256 = vector.extract_strided_slice %178 {offsets = [0, 0, 24], sizes = [2, 8, 8], strides = [1, 1, 1]} : vector<2x8x32xf32> to vector<2x8x8xf32>
    %257 = arith.truncf %256 : vector<2x8x8xf32> to vector<2x8x8xbf16>
    %258 = vector.extract_strided_slice %179 {offsets = [0, 0, 24], sizes = [2, 8, 8], strides = [1, 1, 1]} : vector<2x8x32xf32> to vector<2x8x8xf32>
    %259 = arith.truncf %258 : vector<2x8x8xf32> to vector<2x8x8xbf16>
    "tpu.trace_start"() <{level = 10 : i32, message = "nqd,nkd->nqk"}> : () -> ()
    %cst_90 = arith.constant dense<0.000000e+00> : vector<2x8x8xf32>
    %260 = tpu.matmul %255, %257, %cst_90 {dimension_numbers = #tpu.dot_dimension_numbers<[2], [2], [1], [1], [0, 0, 0, 1, 1, 1], [0], [0]>} : vector<2x8x8xbf16>, vector<2x8x8xbf16>, vector<2x8x8xf32> -> vector<2x8x8xf32>
    "tpu.trace_stop"() : () -> ()
    %261 = vector.broadcast %25 : vector<2x1x8xf32> to vector<2x8x8xf32>
    %262 = arith.addf %260, %261 : vector<2x8x8xf32>
    %cst_91 = arith.constant dense<0xFF800000> : vector<2x8xf32>
    %263 = vector.multi_reduction <maximumf>, %262, %cst_91 [2] : vector<2x8x8xf32> to vector<2x8xf32>
    %264 = vector.shape_cast %263 : vector<2x8xf32> to vector<2x8x1xf32>
    %265 = vector.broadcast %264 : vector<2x8x1xf32> to vector<2x8x8xf32>
    %266 = arith.subf %262, %265 : vector<2x8x8xf32>
    %267 = math.exp %266 : vector<2x8x8xf32>
    %cst_92 = arith.constant dense<0.000000e+00> : vector<2x8xf32>
    %268 = vector.multi_reduction <add>, %267, %cst_92 [2] : vector<2x8x8xf32> to vector<2x8xf32>
    %269 = vector.shape_cast %268 : vector<2x8xf32> to vector<2x8x1xf32>
    %270 = vector.broadcast %269 : vector<2x8x1xf32> to vector<2x8x8xf32>
    %271 = arith.divf %267, %270 : vector<2x8x8xf32>
    %272 = arith.truncf %271 : vector<2x8x8xf32> to vector<2x8x8xbf16>
    "tpu.trace_start"() <{level = 10 : i32, message = "nqk,nkd->nqd"}> : () -> ()
    %cst_93 = arith.constant dense<0.000000e+00> : vector<2x8x8xf32>
    %273 = tpu.matmul %272, %259, %cst_93 {dimension_numbers = #tpu.dot_dimension_numbers<[2], [1], [1], [2], [0, 0, 0, 1, 1, 2], [0], [0]>} : vector<2x8x8xbf16>, vector<2x8x8xbf16>, vector<2x8x8xf32> -> vector<2x8x8xf32>
    "tpu.trace_stop"() : () -> ()
    %274 = vector.shape_cast %273 : vector<2x8x8xf32> to vector<16x8xf32>
    %275 = arith.truncf %274 : vector<16x8xf32> to vector<16x8xbf16>
    %276 = vector.extract_strided_slice %174 {offsets = [24, 0], sizes = [8, 32], strides = [1, 1]} : vector<32x32xbf16> to vector<8x32xbf16>
    %cst_94 = arith.constant dense<0.000000e+00> : vector<16x32xf32>
    %277 = tpu.matmul %275, %276, %cst_94 {dimension_numbers = #tpu.dot_dimension_numbers<[1], [0], [0], [1], [0, 0, 1, 1], [], []>} : vector<16x8xbf16>, vector<8x32xbf16>, vector<16x32xf32> -> vector<16x32xf32>
    %278 = arith.addf %253, %277 : vector<16x32xf32>
    %279 = vector.broadcast %176 : vector<1x32xf32> to vector<16x32xf32>
    %280 = arith.addf %278, %279 : vector<16x32xf32>
    %281 = arith.addf %280, %163 : vector<16x32xf32>
    %c0_95 = arith.constant 0 : index
    %c0_96 = arith.constant 0 : index
    %c0_97 = arith.constant 0 : index
    %282 = vector.load %arg15[%c0_95, %c0_96, %c0_97] : memref<2x1x32xf32, #tpu.memory_space<vmem>>, vector<1x1x32xf32>
    %283 = vector.shape_cast %282 : vector<1x1x32xf32> to vector<1x32xf32>
    %c0_98 = arith.constant 0 : index
    %c0_99 = arith.constant 0 : index
    %c0_100 = arith.constant 0 : index
    %284 = vector.load %arg16[%c0_98, %c0_99, %c0_100] : memref<2x1x32xf32, #tpu.memory_space<vmem>>, vector<1x1x32xf32>
    %285 = vector.shape_cast %284 : vector<1x1x32xf32> to vector<1x32xf32>
    %cst_101 = arith.constant dense<0.000000e+00> : vector<16xf32>
    %286 = vector.multi_reduction <add>, %281, %cst_101 [1] : vector<16x32xf32> to vector<16xf32>
    %287 = vector.shape_cast %286 : vector<16xf32> to vector<16x1xf32>
    %cst_102 = arith.constant 3.200000e+01 : f32
    %288 = vector.broadcast %cst_102 : f32 to vector<16x1xf32>
    %289 = arith.divf %287, %288 : vector<16x1xf32>
    %290 = vector.broadcast %289 : vector<16x1xf32> to vector<16x32xf32>
    %291 = arith.subf %281, %290 : vector<16x32xf32>
    %292 = arith.mulf %291, %291 : vector<16x32xf32>
    %cst_103 = arith.constant dense<0.000000e+00> : vector<16xf32>
    %293 = vector.multi_reduction <add>, %292, %cst_103 [1] : vector<16x32xf32> to vector<16xf32>
    %294 = vector.shape_cast %293 : vector<16xf32> to vector<16x1xf32>
    %cst_104 = arith.constant 3.200000e+01 : f32
    %295 = vector.broadcast %cst_104 : f32 to vector<16x1xf32>
    %296 = arith.divf %294, %295 : vector<16x1xf32>
    %297 = vector.broadcast %289 : vector<16x1xf32> to vector<16x32xf32>
    %298 = arith.subf %281, %297 : vector<16x32xf32>
    %cst_105 = arith.constant 9.99999974E-6 : f32
    %299 = vector.broadcast %cst_105 : f32 to vector<16x1xf32>
    %300 = arith.addf %296, %299 : vector<16x1xf32>
    %301 = math.rsqrt %300 : vector<16x1xf32>
    %302 = vector.broadcast %301 : vector<16x1xf32> to vector<16x32xf32>
    %303 = arith.mulf %298, %302 : vector<16x32xf32>
    %304 = vector.broadcast %283 : vector<1x32xf32> to vector<16x32xf32>
    %305 = arith.mulf %303, %304 : vector<16x32xf32>
    %306 = vector.broadcast %285 : vector<1x32xf32> to vector<16x32xf32>
    %307 = arith.addf %305, %306 : vector<16x32xf32>
    %308 = arith.truncf %307 : vector<16x32xf32> to vector<16x32xbf16>
    %c0_106 = arith.constant 0 : index
    %c0_107 = arith.constant 0 : index
    %c0_108 = arith.constant 0 : index
    %309 = vector.load %arg17[%c0_106, %c0_107, %c0_108] : memref<2x32x128xbf16, #tpu.memory_space<vmem>>, vector<1x32x128xbf16>
    %310 = vector.shape_cast %309 : vector<1x32x128xbf16> to vector<32x128xbf16>
    %cst_109 = arith.constant dense<0.000000e+00> : vector<16x128xf32>
    %311 = tpu.matmul %308, %310, %cst_109 {dimension_numbers = #tpu.dot_dimension_numbers<[1], [0], [0], [1], [0, 0, 1, 1], [], []>} : vector<16x32xbf16>, vector<32x128xbf16>, vector<16x128xf32> -> vector<16x128xf32>
    %c0_110 = arith.constant 0 : index
    %c0_111 = arith.constant 0 : index
    %c0_112 = arith.constant 0 : index
    %312 = vector.load %arg18[%c0_110, %c0_111, %c0_112] : memref<2x1x128xf32, #tpu.memory_space<vmem>>, vector<1x1x128xf32>
    %313 = vector.shape_cast %312 : vector<1x1x128xf32> to vector<1x128xf32>
    %314 = vector.broadcast %313 : vector<1x128xf32> to vector<16x128xf32>
    %315 = arith.addf %311, %314 : vector<16x128xf32>
    %cst_113 = arith.constant 0.000000e+00 : f32
    %316 = vector.broadcast %cst_113 : f32 to vector<16x128xf32>
    %317 = arith.maximumf %315, %316 : vector<16x128xf32>
    %318 = arith.truncf %317 : vector<16x128xf32> to vector<16x128xbf16>
    %c0_114 = arith.constant 0 : index
    %c0_115 = arith.constant 0 : index
    %c0_116 = arith.constant 0 : index
    %319 = vector.load %arg19[%c0_114, %c0_115, %c0_116] : memref<2x128x32xbf16, #tpu.memory_space<vmem>>, vector<1x128x32xbf16>
    %320 = vector.shape_cast %319 : vector<1x128x32xbf16> to vector<128x32xbf16>
    %cst_117 = arith.constant dense<0.000000e+00> : vector<16x32xf32>
    %321 = tpu.matmul %318, %320, %cst_117 {dimension_numbers = #tpu.dot_dimension_numbers<[1], [0], [0], [1], [0, 0, 1, 1], [], []>} : vector<16x128xbf16>, vector<128x32xbf16>, vector<16x32xf32> -> vector<16x32xf32>
    %c0_118 = arith.constant 0 : index
    %c0_119 = arith.constant 0 : index
    %c0_120 = arith.constant 0 : index
    %322 = vector.load %arg20[%c0_118, %c0_119, %c0_120] : memref<2x1x32xf32, #tpu.memory_space<vmem>>, vector<1x1x32xf32>
    %323 = vector.shape_cast %322 : vector<1x1x32xf32> to vector<1x32xf32>
    %324 = vector.broadcast %323 : vector<1x32xf32> to vector<16x32xf32>
    %325 = arith.addf %321, %324 : vector<16x32xf32>
    %326 = arith.addf %325, %307 : vector<16x32xf32>
    %c0_121 = arith.constant 0 : index
    %c0_122 = arith.constant 0 : index
    %c0_123 = arith.constant 0 : index
    %327 = vector.load %arg21[%c0_121, %c0_122, %c0_123] : memref<2x1x32xf32, #tpu.memory_space<vmem>>, vector<1x1x32xf32>
    %328 = vector.shape_cast %327 : vector<1x1x32xf32> to vector<1x32xf32>
    %c0_124 = arith.constant 0 : index
    %c0_125 = arith.constant 0 : index
    %c0_126 = arith.constant 0 : index
    %329 = vector.load %arg22[%c0_124, %c0_125, %c0_126] : memref<2x1x32xf32, #tpu.memory_space<vmem>>, vector<1x1x32xf32>
    %330 = vector.shape_cast %329 : vector<1x1x32xf32> to vector<1x32xf32>
    %cst_127 = arith.constant dense<0.000000e+00> : vector<16xf32>
    %331 = vector.multi_reduction <add>, %326, %cst_127 [1] : vector<16x32xf32> to vector<16xf32>
    %332 = vector.shape_cast %331 : vector<16xf32> to vector<16x1xf32>
    %cst_128 = arith.constant 3.200000e+01 : f32
    %333 = vector.broadcast %cst_128 : f32 to vector<16x1xf32>
    %334 = arith.divf %332, %333 : vector<16x1xf32>
    %335 = vector.broadcast %334 : vector<16x1xf32> to vector<16x32xf32>
    %336 = arith.subf %326, %335 : vector<16x32xf32>
    %337 = arith.mulf %336, %336 : vector<16x32xf32>
    %cst_129 = arith.constant dense<0.000000e+00> : vector<16xf32>
    %338 = vector.multi_reduction <add>, %337, %cst_129 [1] : vector<16x32xf32> to vector<16xf32>
    %339 = vector.shape_cast %338 : vector<16xf32> to vector<16x1xf32>
    %cst_130 = arith.constant 3.200000e+01 : f32
    %340 = vector.broadcast %cst_130 : f32 to vector<16x1xf32>
    %341 = arith.divf %339, %340 : vector<16x1xf32>
    %342 = vector.broadcast %334 : vector<16x1xf32> to vector<16x32xf32>
    %343 = arith.subf %326, %342 : vector<16x32xf32>
    %cst_131 = arith.constant 9.99999974E-6 : f32
    %344 = vector.broadcast %cst_131 : f32 to vector<16x1xf32>
    %345 = arith.addf %341, %344 : vector<16x1xf32>
    %346 = math.rsqrt %345 : vector<16x1xf32>
    %347 = vector.broadcast %346 : vector<16x1xf32> to vector<16x32xf32>
    %348 = arith.mulf %343, %347 : vector<16x32xf32>
    %349 = vector.broadcast %328 : vector<1x32xf32> to vector<16x32xf32>
    %350 = arith.mulf %348, %349 : vector<16x32xf32>
    %351 = vector.broadcast %330 : vector<1x32xf32> to vector<16x32xf32>
    %352 = arith.addf %350, %351 : vector<16x32xf32>
    %353 = arith.truncf %352 : vector<16x32xf32> to vector<16x32xbf16>
    %c1 = arith.constant 1 : index
    %c0_132 = arith.constant 0 : index
    %c0_133 = arith.constant 0 : index
    %354 = vector.load %arg6[%c1, %c0_132, %c0_133] : memref<2x32x96xbf16, #tpu.memory_space<vmem>>, vector<1x32x96xbf16>
    %355 = vector.shape_cast %354 : vector<1x32x96xbf16> to vector<32x96xbf16>
    %cst_134 = arith.constant dense<0.000000e+00> : vector<16x96xf32>
    %356 = tpu.matmul %353, %355, %cst_134 {dimension_numbers = #tpu.dot_dimension_numbers<[1], [0], [0], [1], [0, 0, 1, 1], [], []>} : vector<16x32xbf16>, vector<32x96xbf16>, vector<16x96xf32> -> vector<16x96xf32>
    %357 = vector.extract_strided_slice %356 {offsets = [0, 0], sizes = [16, 32], strides = [1, 1]} : vector<16x96xf32> to vector<16x32xf32>
    %358 = vector.extract_strided_slice %356 {offsets = [0, 32], sizes = [16, 32], strides = [1, 1]} : vector<16x96xf32> to vector<16x32xf32>
    %359 = vector.extract_strided_slice %356 {offsets = [0, 64], sizes = [16, 32], strides = [1, 1]} : vector<16x96xf32> to vector<16x32xf32>
    %c1_135 = arith.constant 1 : index
    %c0_136 = arith.constant 0 : index
    %c0_137 = arith.constant 0 : index
    %360 = vector.load %arg7[%c1_135, %c0_136, %c0_137] : memref<2x32x32xbf16, #tpu.memory_space<vmem>>, vector<1x32x32xbf16>
    %361 = vector.shape_cast %360 : vector<1x32x32xbf16> to vector<32x32xbf16>
    %c1_138 = arith.constant 1 : index
    %c0_139 = arith.constant 0 : index
    %c0_140 = arith.constant 0 : index
    %362 = vector.load %arg8[%c1_138, %c0_139, %c0_140] : memref<2x1x32xf32, #tpu.memory_space<vmem>>, vector<1x1x32xf32>
    %363 = vector.shape_cast %362 : vector<1x1x32xf32> to vector<1x32xf32>
    %364 = vector.shape_cast %357 : vector<16x32xf32> to vector<2x8x32xf32>
    %365 = vector.shape_cast %358 : vector<16x32xf32> to vector<2x8x32xf32>
    %366 = vector.shape_cast %359 : vector<16x32xf32> to vector<2x8x32xf32>
    %367 = vector.extract_strided_slice %364 {offsets = [0, 0, 0], sizes = [2, 8, 8], strides = [1, 1, 1]} : vector<2x8x32xf32> to vector<2x8x8xf32>
    %368 = arith.truncf %367 : vector<2x8x8xf32> to vector<2x8x8xbf16>
    %369 = vector.extract_strided_slice %365 {offsets = [0, 0, 0], sizes = [2, 8, 8], strides = [1, 1, 1]} : vector<2x8x32xf32> to vector<2x8x8xf32>
    %370 = arith.truncf %369 : vector<2x8x8xf32> to vector<2x8x8xbf16>
    %371 = vector.extract_strided_slice %366 {offsets = [0, 0, 0], sizes = [2, 8, 8], strides = [1, 1, 1]} : vector<2x8x32xf32> to vector<2x8x8xf32>
    %372 = arith.truncf %371 : vector<2x8x8xf32> to vector<2x8x8xbf16>
    "tpu.trace_start"() <{level = 10 : i32, message = "nqd,nkd->nqk"}> : () -> ()
    %cst_141 = arith.constant dense<0.000000e+00> : vector<2x8x8xf32>
    %373 = tpu.matmul %368, %370, %cst_141 {dimension_numbers = #tpu.dot_dimension_numbers<[2], [2], [1], [1], [0, 0, 0, 1, 1, 1], [0], [0]>} : vector<2x8x8xbf16>, vector<2x8x8xbf16>, vector<2x8x8xf32> -> vector<2x8x8xf32>
    "tpu.trace_stop"() : () -> ()
    %374 = arith.addf %373, %19 : vector<2x8x8xf32>
    %cst_142 = arith.constant dense<0xFF800000> : vector<2x8xf32>
    %375 = vector.multi_reduction <maximumf>, %374, %cst_142 [2] : vector<2x8x8xf32> to vector<2x8xf32>
    %376 = vector.shape_cast %375 : vector<2x8xf32> to vector<2x8x1xf32>
    %377 = vector.broadcast %376 : vector<2x8x1xf32> to vector<2x8x8xf32>
    %378 = arith.subf %374, %377 : vector<2x8x8xf32>
    %379 = math.exp %378 : vector<2x8x8xf32>
    %cst_143 = arith.constant dense<0.000000e+00> : vector<2x8xf32>
    %380 = vector.multi_reduction <add>, %379, %cst_143 [2] : vector<2x8x8xf32> to vector<2x8xf32>
    %381 = vector.shape_cast %380 : vector<2x8xf32> to vector<2x8x1xf32>
    %382 = vector.broadcast %381 : vector<2x8x1xf32> to vector<2x8x8xf32>
    %383 = arith.divf %379, %382 : vector<2x8x8xf32>
    %384 = arith.truncf %383 : vector<2x8x8xf32> to vector<2x8x8xbf16>
    "tpu.trace_start"() <{level = 10 : i32, message = "nqk,nkd->nqd"}> : () -> ()
    %cst_144 = arith.constant dense<0.000000e+00> : vector<2x8x8xf32>
    %385 = tpu.matmul %384, %372, %cst_144 {dimension_numbers = #tpu.dot_dimension_numbers<[2], [1], [1], [2], [0, 0, 0, 1, 1, 2], [0], [0]>} : vector<2x8x8xbf16>, vector<2x8x8xbf16>, vector<2x8x8xf32> -> vector<2x8x8xf32>
    "tpu.trace_stop"() : () -> ()
    %386 = vector.shape_cast %385 : vector<2x8x8xf32> to vector<16x8xf32>
    %387 = arith.truncf %386 : vector<16x8xf32> to vector<16x8xbf16>
    %388 = vector.extract_strided_slice %361 {offsets = [0, 0], sizes = [8, 32], strides = [1, 1]} : vector<32x32xbf16> to vector<8x32xbf16>
    %cst_145 = arith.constant dense<0.000000e+00> : vector<16x32xf32>
    %389 = tpu.matmul %387, %388, %cst_145 {dimension_numbers = #tpu.dot_dimension_numbers<[1], [0], [0], [1], [0, 0, 1, 1], [], []>} : vector<16x8xbf16>, vector<8x32xbf16>, vector<16x32xf32> -> vector<16x32xf32>
    %390 = vector.extract_strided_slice %364 {offsets = [0, 0, 8], sizes = [2, 8, 8], strides = [1, 1, 1]} : vector<2x8x32xf32> to vector<2x8x8xf32>
    %391 = arith.truncf %390 : vector<2x8x8xf32> to vector<2x8x8xbf16>
    %392 = vector.extract_strided_slice %365 {offsets = [0, 0, 8], sizes = [2, 8, 8], strides = [1, 1, 1]} : vector<2x8x32xf32> to vector<2x8x8xf32>
    %393 = arith.truncf %392 : vector<2x8x8xf32> to vector<2x8x8xbf16>
    %394 = vector.extract_strided_slice %366 {offsets = [0, 0, 8], sizes = [2, 8, 8], strides = [1, 1, 1]} : vector<2x8x32xf32> to vector<2x8x8xf32>
    %395 = arith.truncf %394 : vector<2x8x8xf32> to vector<2x8x8xbf16>
    "tpu.trace_start"() <{level = 10 : i32, message = "nqd,nkd->nqk"}> : () -> ()
    %cst_146 = arith.constant dense<0.000000e+00> : vector<2x8x8xf32>
    %396 = tpu.matmul %391, %393, %cst_146 {dimension_numbers = #tpu.dot_dimension_numbers<[2], [2], [1], [1], [0, 0, 0, 1, 1, 1], [0], [0]>} : vector<2x8x8xbf16>, vector<2x8x8xbf16>, vector<2x8x8xf32> -> vector<2x8x8xf32>
    "tpu.trace_stop"() : () -> ()
    %397 = arith.addf %396, %19 : vector<2x8x8xf32>
    %cst_147 = arith.constant dense<0xFF800000> : vector<2x8xf32>
    %398 = vector.multi_reduction <maximumf>, %397, %cst_147 [2] : vector<2x8x8xf32> to vector<2x8xf32>
    %399 = vector.shape_cast %398 : vector<2x8xf32> to vector<2x8x1xf32>
    %400 = vector.broadcast %399 : vector<2x8x1xf32> to vector<2x8x8xf32>
    %401 = arith.subf %397, %400 : vector<2x8x8xf32>
    %402 = math.exp %401 : vector<2x8x8xf32>
    %cst_148 = arith.constant dense<0.000000e+00> : vector<2x8xf32>
    %403 = vector.multi_reduction <add>, %402, %cst_148 [2] : vector<2x8x8xf32> to vector<2x8xf32>
    %404 = vector.shape_cast %403 : vector<2x8xf32> to vector<2x8x1xf32>
    %405 = vector.broadcast %404 : vector<2x8x1xf32> to vector<2x8x8xf32>
    %406 = arith.divf %402, %405 : vector<2x8x8xf32>
    %407 = arith.truncf %406 : vector<2x8x8xf32> to vector<2x8x8xbf16>
    "tpu.trace_start"() <{level = 10 : i32, message = "nqk,nkd->nqd"}> : () -> ()
    %cst_149 = arith.constant dense<0.000000e+00> : vector<2x8x8xf32>
    %408 = tpu.matmul %407, %395, %cst_149 {dimension_numbers = #tpu.dot_dimension_numbers<[2], [1], [1], [2], [0, 0, 0, 1, 1, 2], [0], [0]>} : vector<2x8x8xbf16>, vector<2x8x8xbf16>, vector<2x8x8xf32> -> vector<2x8x8xf32>
    "tpu.trace_stop"() : () -> ()
    %409 = vector.shape_cast %408 : vector<2x8x8xf32> to vector<16x8xf32>
    %410 = arith.truncf %409 : vector<16x8xf32> to vector<16x8xbf16>
    %411 = vector.extract_strided_slice %361 {offsets = [8, 0], sizes = [8, 32], strides = [1, 1]} : vector<32x32xbf16> to vector<8x32xbf16>
    %cst_150 = arith.constant dense<0.000000e+00> : vector<16x32xf32>
    %412 = tpu.matmul %410, %411, %cst_150 {dimension_numbers = #tpu.dot_dimension_numbers<[1], [0], [0], [1], [0, 0, 1, 1], [], []>} : vector<16x8xbf16>, vector<8x32xbf16>, vector<16x32xf32> -> vector<16x32xf32>
    %413 = arith.addf %389, %412 : vector<16x32xf32>
    %414 = vector.extract_strided_slice %364 {offsets = [0, 0, 16], sizes = [2, 8, 8], strides = [1, 1, 1]} : vector<2x8x32xf32> to vector<2x8x8xf32>
    %415 = arith.truncf %414 : vector<2x8x8xf32> to vector<2x8x8xbf16>
    %416 = vector.extract_strided_slice %365 {offsets = [0, 0, 16], sizes = [2, 8, 8], strides = [1, 1, 1]} : vector<2x8x32xf32> to vector<2x8x8xf32>
    %417 = arith.truncf %416 : vector<2x8x8xf32> to vector<2x8x8xbf16>
    %418 = vector.extract_strided_slice %366 {offsets = [0, 0, 16], sizes = [2, 8, 8], strides = [1, 1, 1]} : vector<2x8x32xf32> to vector<2x8x8xf32>
    %419 = arith.truncf %418 : vector<2x8x8xf32> to vector<2x8x8xbf16>
    "tpu.trace_start"() <{level = 10 : i32, message = "nqd,nkd->nqk"}> : () -> ()
    %cst_151 = arith.constant dense<0.000000e+00> : vector<2x8x8xf32>
    %420 = tpu.matmul %415, %417, %cst_151 {dimension_numbers = #tpu.dot_dimension_numbers<[2], [2], [1], [1], [0, 0, 0, 1, 1, 1], [0], [0]>} : vector<2x8x8xbf16>, vector<2x8x8xbf16>, vector<2x8x8xf32> -> vector<2x8x8xf32>
    "tpu.trace_stop"() : () -> ()
    %421 = arith.addf %420, %19 : vector<2x8x8xf32>
    %cst_152 = arith.constant dense<0xFF800000> : vector<2x8xf32>
    %422 = vector.multi_reduction <maximumf>, %421, %cst_152 [2] : vector<2x8x8xf32> to vector<2x8xf32>
    %423 = vector.shape_cast %422 : vector<2x8xf32> to vector<2x8x1xf32>
    %424 = vector.broadcast %423 : vector<2x8x1xf32> to vector<2x8x8xf32>
    %425 = arith.subf %421, %424 : vector<2x8x8xf32>
    %426 = math.exp %425 : vector<2x8x8xf32>
    %cst_153 = arith.constant dense<0.000000e+00> : vector<2x8xf32>
    %427 = vector.multi_reduction <add>, %426, %cst_153 [2] : vector<2x8x8xf32> to vector<2x8xf32>
    %428 = vector.shape_cast %427 : vector<2x8xf32> to vector<2x8x1xf32>
    %429 = vector.broadcast %428 : vector<2x8x1xf32> to vector<2x8x8xf32>
    %430 = arith.divf %426, %429 : vector<2x8x8xf32>
    %431 = arith.truncf %430 : vector<2x8x8xf32> to vector<2x8x8xbf16>
    "tpu.trace_start"() <{level = 10 : i32, message = "nqk,nkd->nqd"}> : () -> ()
    %cst_154 = arith.constant dense<0.000000e+00> : vector<2x8x8xf32>
    %432 = tpu.matmul %431, %419, %cst_154 {dimension_numbers = #tpu.dot_dimension_numbers<[2], [1], [1], [2], [0, 0, 0, 1, 1, 2], [0], [0]>} : vector<2x8x8xbf16>, vector<2x8x8xbf16>, vector<2x8x8xf32> -> vector<2x8x8xf32>
    "tpu.trace_stop"() : () -> ()
    %433 = vector.shape_cast %432 : vector<2x8x8xf32> to vector<16x8xf32>
    %434 = arith.truncf %433 : vector<16x8xf32> to vector<16x8xbf16>
    %435 = vector.extract_strided_slice %361 {offsets = [16, 0], sizes = [8, 32], strides = [1, 1]} : vector<32x32xbf16> to vector<8x32xbf16>
    %cst_155 = arith.constant dense<0.000000e+00> : vector<16x32xf32>
    %436 = tpu.matmul %434, %435, %cst_155 {dimension_numbers = #tpu.dot_dimension_numbers<[1], [0], [0], [1], [0, 0, 1, 1], [], []>} : vector<16x8xbf16>, vector<8x32xbf16>, vector<16x32xf32> -> vector<16x32xf32>
    %437 = arith.addf %413, %436 : vector<16x32xf32>
    %438 = vector.extract_strided_slice %364 {offsets = [0, 0, 24], sizes = [2, 8, 8], strides = [1, 1, 1]} : vector<2x8x32xf32> to vector<2x8x8xf32>
    %439 = arith.truncf %438 : vector<2x8x8xf32> to vector<2x8x8xbf16>
    %440 = vector.extract_strided_slice %365 {offsets = [0, 0, 24], sizes = [2, 8, 8], strides = [1, 1, 1]} : vector<2x8x32xf32> to vector<2x8x8xf32>
    %441 = arith.truncf %440 : vector<2x8x8xf32> to vector<2x8x8xbf16>
    %442 = vector.extract_strided_slice %366 {offsets = [0, 0, 24], sizes = [2, 8, 8], strides = [1, 1, 1]} : vector<2x8x32xf32> to vector<2x8x8xf32>
    %443 = arith.truncf %442 : vector<2x8x8xf32> to vector<2x8x8xbf16>
    "tpu.trace_start"() <{level = 10 : i32, message = "nqd,nkd->nqk"}> : () -> ()
    %cst_156 = arith.constant dense<0.000000e+00> : vector<2x8x8xf32>
    %444 = tpu.matmul %439, %441, %cst_156 {dimension_numbers = #tpu.dot_dimension_numbers<[2], [2], [1], [1], [0, 0, 0, 1, 1, 1], [0], [0]>} : vector<2x8x8xbf16>, vector<2x8x8xbf16>, vector<2x8x8xf32> -> vector<2x8x8xf32>
    "tpu.trace_stop"() : () -> ()
    %445 = arith.addf %444, %19 : vector<2x8x8xf32>
    %cst_157 = arith.constant dense<0xFF800000> : vector<2x8xf32>
    %446 = vector.multi_reduction <maximumf>, %445, %cst_157 [2] : vector<2x8x8xf32> to vector<2x8xf32>
    %447 = vector.shape_cast %446 : vector<2x8xf32> to vector<2x8x1xf32>
    %448 = vector.broadcast %447 : vector<2x8x1xf32> to vector<2x8x8xf32>
    %449 = arith.subf %445, %448 : vector<2x8x8xf32>
    %450 = math.exp %449 : vector<2x8x8xf32>
    %cst_158 = arith.constant dense<0.000000e+00> : vector<2x8xf32>
    %451 = vector.multi_reduction <add>, %450, %cst_158 [2] : vector<2x8x8xf32> to vector<2x8xf32>
    %452 = vector.shape_cast %451 : vector<2x8xf32> to vector<2x8x1xf32>
    %453 = vector.broadcast %452 : vector<2x8x1xf32> to vector<2x8x8xf32>
    %454 = arith.divf %450, %453 : vector<2x8x8xf32>
    %455 = arith.truncf %454 : vector<2x8x8xf32> to vector<2x8x8xbf16>
    "tpu.trace_start"() <{level = 10 : i32, message = "nqk,nkd->nqd"}> : () -> ()
    %cst_159 = arith.constant dense<0.000000e+00> : vector<2x8x8xf32>
    %456 = tpu.matmul %455, %443, %cst_159 {dimension_numbers = #tpu.dot_dimension_numbers<[2], [1], [1], [2], [0, 0, 0, 1, 1, 2], [0], [0]>} : vector<2x8x8xbf16>, vector<2x8x8xbf16>, vector<2x8x8xf32> -> vector<2x8x8xf32>
    "tpu.trace_stop"() : () -> ()
    %457 = vector.shape_cast %456 : vector<2x8x8xf32> to vector<16x8xf32>
    %458 = arith.truncf %457 : vector<16x8xf32> to vector<16x8xbf16>
    %459 = vector.extract_strided_slice %361 {offsets = [24, 0], sizes = [8, 32], strides = [1, 1]} : vector<32x32xbf16> to vector<8x32xbf16>
    %cst_160 = arith.constant dense<0.000000e+00> : vector<16x32xf32>
    %460 = tpu.matmul %458, %459, %cst_160 {dimension_numbers = #tpu.dot_dimension_numbers<[1], [0], [0], [1], [0, 0, 1, 1], [], []>} : vector<16x8xbf16>, vector<8x32xbf16>, vector<16x32xf32> -> vector<16x32xf32>
    %461 = arith.addf %437, %460 : vector<16x32xf32>
    %462 = vector.broadcast %363 : vector<1x32xf32> to vector<16x32xf32>
    %463 = arith.addf %461, %462 : vector<16x32xf32>
    %464 = arith.addf %463, %352 : vector<16x32xf32>
    %c1_161 = arith.constant 1 : index
    %c0_162 = arith.constant 0 : index
    %c0_163 = arith.constant 0 : index
    %465 = vector.load %arg9[%c1_161, %c0_162, %c0_163] : memref<2x1x32xf32, #tpu.memory_space<vmem>>, vector<1x1x32xf32>
    %466 = vector.shape_cast %465 : vector<1x1x32xf32> to vector<1x32xf32>
    %c1_164 = arith.constant 1 : index
    %c0_165 = arith.constant 0 : index
    %c0_166 = arith.constant 0 : index
    %467 = vector.load %arg10[%c1_164, %c0_165, %c0_166] : memref<2x1x32xf32, #tpu.memory_space<vmem>>, vector<1x1x32xf32>
    %468 = vector.shape_cast %467 : vector<1x1x32xf32> to vector<1x32xf32>
    %cst_167 = arith.constant dense<0.000000e+00> : vector<16xf32>
    %469 = vector.multi_reduction <add>, %464, %cst_167 [1] : vector<16x32xf32> to vector<16xf32>
    %470 = vector.shape_cast %469 : vector<16xf32> to vector<16x1xf32>
    %cst_168 = arith.constant 3.200000e+01 : f32
    %471 = vector.broadcast %cst_168 : f32 to vector<16x1xf32>
    %472 = arith.divf %470, %471 : vector<16x1xf32>
    %473 = vector.broadcast %472 : vector<16x1xf32> to vector<16x32xf32>
    %474 = arith.subf %464, %473 : vector<16x32xf32>
    %475 = arith.mulf %474, %474 : vector<16x32xf32>
    %cst_169 = arith.constant dense<0.000000e+00> : vector<16xf32>
    %476 = vector.multi_reduction <add>, %475, %cst_169 [1] : vector<16x32xf32> to vector<16xf32>
    %477 = vector.shape_cast %476 : vector<16xf32> to vector<16x1xf32>
    %cst_170 = arith.constant 3.200000e+01 : f32
    %478 = vector.broadcast %cst_170 : f32 to vector<16x1xf32>
    %479 = arith.divf %477, %478 : vector<16x1xf32>
    %480 = vector.broadcast %472 : vector<16x1xf32> to vector<16x32xf32>
    %481 = arith.subf %464, %480 : vector<16x32xf32>
    %cst_171 = arith.constant 9.99999974E-6 : f32
    %482 = vector.broadcast %cst_171 : f32 to vector<16x1xf32>
    %483 = arith.addf %479, %482 : vector<16x1xf32>
    %484 = math.rsqrt %483 : vector<16x1xf32>
    %485 = vector.broadcast %484 : vector<16x1xf32> to vector<16x32xf32>
    %486 = arith.mulf %481, %485 : vector<16x32xf32>
    %487 = vector.broadcast %466 : vector<1x32xf32> to vector<16x32xf32>
    %488 = arith.mulf %486, %487 : vector<16x32xf32>
    %489 = vector.broadcast %468 : vector<1x32xf32> to vector<16x32xf32>
    %490 = arith.addf %488, %489 : vector<16x32xf32>
    %491 = arith.truncf %490 : vector<16x32xf32> to vector<16x32xbf16>
    %c1_172 = arith.constant 1 : index
    %c0_173 = arith.constant 0 : index
    %c0_174 = arith.constant 0 : index
    %492 = vector.load %arg11[%c1_172, %c0_173, %c0_174] : memref<2x32x32xbf16, #tpu.memory_space<vmem>>, vector<1x32x32xbf16>
    %493 = vector.shape_cast %492 : vector<1x32x32xbf16> to vector<32x32xbf16>
    %cst_175 = arith.constant dense<0.000000e+00> : vector<16x32xf32>
    %494 = tpu.matmul %491, %493, %cst_175 {dimension_numbers = #tpu.dot_dimension_numbers<[1], [0], [0], [1], [0, 0, 1, 1], [], []>} : vector<16x32xbf16>, vector<32x32xbf16>, vector<16x32xf32> -> vector<16x32xf32>
    %c1_176 = arith.constant 1 : index
    %c0_177 = arith.constant 0 : index
    %c0_178 = arith.constant 0 : index
    %495 = vector.load %arg12[%c1_176, %c0_177, %c0_178] : memref<2x32x64xbf16, #tpu.memory_space<vmem>>, vector<1x32x64xbf16>
    %496 = vector.shape_cast %495 : vector<1x32x64xbf16> to vector<32x64xbf16>
    %cst_179 = arith.constant dense<0.000000e+00> : vector<16x64xf32>
    %497 = tpu.matmul %13, %496, %cst_179 {dimension_numbers = #tpu.dot_dimension_numbers<[1], [0], [0], [1], [0, 0, 1, 1], [], []>} : vector<16x32xbf16>, vector<32x64xbf16>, vector<16x64xf32> -> vector<16x64xf32>
    %498 = vector.extract_strided_slice %497 {offsets = [0, 0], sizes = [16, 32], strides = [1, 1]} : vector<16x64xf32> to vector<16x32xf32>
    %499 = vector.extract_strided_slice %497 {offsets = [0, 32], sizes = [16, 32], strides = [1, 1]} : vector<16x64xf32> to vector<16x32xf32>
    %c1_180 = arith.constant 1 : index
    %c0_181 = arith.constant 0 : index
    %c0_182 = arith.constant 0 : index
    %500 = vector.load %arg13[%c1_180, %c0_181, %c0_182] : memref<2x32x32xbf16, #tpu.memory_space<vmem>>, vector<1x32x32xbf16>
    %501 = vector.shape_cast %500 : vector<1x32x32xbf16> to vector<32x32xbf16>
    %c1_183 = arith.constant 1 : index
    %c0_184 = arith.constant 0 : index
    %c0_185 = arith.constant 0 : index
    %502 = vector.load %arg14[%c1_183, %c0_184, %c0_185] : memref<2x1x32xf32, #tpu.memory_space<vmem>>, vector<1x1x32xf32>
    %503 = vector.shape_cast %502 : vector<1x1x32xf32> to vector<1x32xf32>
    %504 = vector.shape_cast %494 : vector<16x32xf32> to vector<2x8x32xf32>
    %505 = vector.shape_cast %498 : vector<16x32xf32> to vector<2x8x32xf32>
    %506 = vector.shape_cast %499 : vector<16x32xf32> to vector<2x8x32xf32>
    %507 = vector.extract_strided_slice %504 {offsets = [0, 0, 0], sizes = [2, 8, 8], strides = [1, 1, 1]} : vector<2x8x32xf32> to vector<2x8x8xf32>
    %508 = arith.truncf %507 : vector<2x8x8xf32> to vector<2x8x8xbf16>
    %509 = vector.extract_strided_slice %505 {offsets = [0, 0, 0], sizes = [2, 8, 8], strides = [1, 1, 1]} : vector<2x8x32xf32> to vector<2x8x8xf32>
    %510 = arith.truncf %509 : vector<2x8x8xf32> to vector<2x8x8xbf16>
    %511 = vector.extract_strided_slice %506 {offsets = [0, 0, 0], sizes = [2, 8, 8], strides = [1, 1, 1]} : vector<2x8x32xf32> to vector<2x8x8xf32>
    %512 = arith.truncf %511 : vector<2x8x8xf32> to vector<2x8x8xbf16>
    "tpu.trace_start"() <{level = 10 : i32, message = "nqd,nkd->nqk"}> : () -> ()
    %cst_186 = arith.constant dense<0.000000e+00> : vector<2x8x8xf32>
    %513 = tpu.matmul %508, %510, %cst_186 {dimension_numbers = #tpu.dot_dimension_numbers<[2], [2], [1], [1], [0, 0, 0, 1, 1, 1], [0], [0]>} : vector<2x8x8xbf16>, vector<2x8x8xbf16>, vector<2x8x8xf32> -> vector<2x8x8xf32>
    "tpu.trace_stop"() : () -> ()
    %514 = vector.broadcast %25 : vector<2x1x8xf32> to vector<2x8x8xf32>
    %515 = arith.addf %513, %514 : vector<2x8x8xf32>
    %cst_187 = arith.constant dense<0xFF800000> : vector<2x8xf32>
    %516 = vector.multi_reduction <maximumf>, %515, %cst_187 [2] : vector<2x8x8xf32> to vector<2x8xf32>
    %517 = vector.shape_cast %516 : vector<2x8xf32> to vector<2x8x1xf32>
    %518 = vector.broadcast %517 : vector<2x8x1xf32> to vector<2x8x8xf32>
    %519 = arith.subf %515, %518 : vector<2x8x8xf32>
    %520 = math.exp %519 : vector<2x8x8xf32>
    %cst_188 = arith.constant dense<0.000000e+00> : vector<2x8xf32>
    %521 = vector.multi_reduction <add>, %520, %cst_188 [2] : vector<2x8x8xf32> to vector<2x8xf32>
    %522 = vector.shape_cast %521 : vector<2x8xf32> to vector<2x8x1xf32>
    %523 = vector.broadcast %522 : vector<2x8x1xf32> to vector<2x8x8xf32>
    %524 = arith.divf %520, %523 : vector<2x8x8xf32>
    %525 = arith.truncf %524 : vector<2x8x8xf32> to vector<2x8x8xbf16>
    "tpu.trace_start"() <{level = 10 : i32, message = "nqk,nkd->nqd"}> : () -> ()
    %cst_189 = arith.constant dense<0.000000e+00> : vector<2x8x8xf32>
    %526 = tpu.matmul %525, %512, %cst_189 {dimension_numbers = #tpu.dot_dimension_numbers<[2], [1], [1], [2], [0, 0, 0, 1, 1, 2], [0], [0]>} : vector<2x8x8xbf16>, vector<2x8x8xbf16>, vector<2x8x8xf32> -> vector<2x8x8xf32>
    "tpu.trace_stop"() : () -> ()
    %527 = vector.shape_cast %526 : vector<2x8x8xf32> to vector<16x8xf32>
    %528 = arith.truncf %527 : vector<16x8xf32> to vector<16x8xbf16>
    %529 = vector.extract_strided_slice %501 {offsets = [0, 0], sizes = [8, 32], strides = [1, 1]} : vector<32x32xbf16> to vector<8x32xbf16>
    %cst_190 = arith.constant dense<0.000000e+00> : vector<16x32xf32>
    %530 = tpu.matmul %528, %529, %cst_190 {dimension_numbers = #tpu.dot_dimension_numbers<[1], [0], [0], [1], [0, 0, 1, 1], [], []>} : vector<16x8xbf16>, vector<8x32xbf16>, vector<16x32xf32> -> vector<16x32xf32>
    %531 = vector.extract_strided_slice %504 {offsets = [0, 0, 8], sizes = [2, 8, 8], strides = [1, 1, 1]} : vector<2x8x32xf32> to vector<2x8x8xf32>
    %532 = arith.truncf %531 : vector<2x8x8xf32> to vector<2x8x8xbf16>
    %533 = vector.extract_strided_slice %505 {offsets = [0, 0, 8], sizes = [2, 8, 8], strides = [1, 1, 1]} : vector<2x8x32xf32> to vector<2x8x8xf32>
    %534 = arith.truncf %533 : vector<2x8x8xf32> to vector<2x8x8xbf16>
    %535 = vector.extract_strided_slice %506 {offsets = [0, 0, 8], sizes = [2, 8, 8], strides = [1, 1, 1]} : vector<2x8x32xf32> to vector<2x8x8xf32>
    %536 = arith.truncf %535 : vector<2x8x8xf32> to vector<2x8x8xbf16>
    "tpu.trace_start"() <{level = 10 : i32, message = "nqd,nkd->nqk"}> : () -> ()
    %cst_191 = arith.constant dense<0.000000e+00> : vector<2x8x8xf32>
    %537 = tpu.matmul %532, %534, %cst_191 {dimension_numbers = #tpu.dot_dimension_numbers<[2], [2], [1], [1], [0, 0, 0, 1, 1, 1], [0], [0]>} : vector<2x8x8xbf16>, vector<2x8x8xbf16>, vector<2x8x8xf32> -> vector<2x8x8xf32>
    "tpu.trace_stop"() : () -> ()
    %538 = vector.broadcast %25 : vector<2x1x8xf32> to vector<2x8x8xf32>
    %539 = arith.addf %537, %538 : vector<2x8x8xf32>
    %cst_192 = arith.constant dense<0xFF800000> : vector<2x8xf32>
    %540 = vector.multi_reduction <maximumf>, %539, %cst_192 [2] : vector<2x8x8xf32> to vector<2x8xf32>
    %541 = vector.shape_cast %540 : vector<2x8xf32> to vector<2x8x1xf32>
    %542 = vector.broadcast %541 : vector<2x8x1xf32> to vector<2x8x8xf32>
    %543 = arith.subf %539, %542 : vector<2x8x8xf32>
    %544 = math.exp %543 : vector<2x8x8xf32>
    %cst_193 = arith.constant dense<0.000000e+00> : vector<2x8xf32>
    %545 = vector.multi_reduction <add>, %544, %cst_193 [2] : vector<2x8x8xf32> to vector<2x8xf32>
    %546 = vector.shape_cast %545 : vector<2x8xf32> to vector<2x8x1xf32>
    %547 = vector.broadcast %546 : vector<2x8x1xf32> to vector<2x8x8xf32>
    %548 = arith.divf %544, %547 : vector<2x8x8xf32>
    %549 = arith.truncf %548 : vector<2x8x8xf32> to vector<2x8x8xbf16>
    "tpu.trace_start"() <{level = 10 : i32, message = "nqk,nkd->nqd"}> : () -> ()
    %cst_194 = arith.constant dense<0.000000e+00> : vector<2x8x8xf32>
    %550 = tpu.matmul %549, %536, %cst_194 {dimension_numbers = #tpu.dot_dimension_numbers<[2], [1], [1], [2], [0, 0, 0, 1, 1, 2], [0], [0]>} : vector<2x8x8xbf16>, vector<2x8x8xbf16>, vector<2x8x8xf32> -> vector<2x8x8xf32>
    "tpu.trace_stop"() : () -> ()
    %551 = vector.shape_cast %550 : vector<2x8x8xf32> to vector<16x8xf32>
    %552 = arith.truncf %551 : vector<16x8xf32> to vector<16x8xbf16>
    %553 = vector.extract_strided_slice %501 {offsets = [8, 0], sizes = [8, 32], strides = [1, 1]} : vector<32x32xbf16> to vector<8x32xbf16>
    %cst_195 = arith.constant dense<0.000000e+00> : vector<16x32xf32>
    %554 = tpu.matmul %552, %553, %cst_195 {dimension_numbers = #tpu.dot_dimension_numbers<[1], [0], [0], [1], [0, 0, 1, 1], [], []>} : vector<16x8xbf16>, vector<8x32xbf16>, vector<16x32xf32> -> vector<16x32xf32>
    %555 = arith.addf %530, %554 : vector<16x32xf32>
    %556 = vector.extract_strided_slice %504 {offsets = [0, 0, 16], sizes = [2, 8, 8], strides = [1, 1, 1]} : vector<2x8x32xf32> to vector<2x8x8xf32>
    %557 = arith.truncf %556 : vector<2x8x8xf32> to vector<2x8x8xbf16>
    %558 = vector.extract_strided_slice %505 {offsets = [0, 0, 16], sizes = [2, 8, 8], strides = [1, 1, 1]} : vector<2x8x32xf32> to vector<2x8x8xf32>
    %559 = arith.truncf %558 : vector<2x8x8xf32> to vector<2x8x8xbf16>
    %560 = vector.extract_strided_slice %506 {offsets = [0, 0, 16], sizes = [2, 8, 8], strides = [1, 1, 1]} : vector<2x8x32xf32> to vector<2x8x8xf32>
    %561 = arith.truncf %560 : vector<2x8x8xf32> to vector<2x8x8xbf16>
    "tpu.trace_start"() <{level = 10 : i32, message = "nqd,nkd->nqk"}> : () -> ()
    %cst_196 = arith.constant dense<0.000000e+00> : vector<2x8x8xf32>
    %562 = tpu.matmul %557, %559, %cst_196 {dimension_numbers = #tpu.dot_dimension_numbers<[2], [2], [1], [1], [0, 0, 0, 1, 1, 1], [0], [0]>} : vector<2x8x8xbf16>, vector<2x8x8xbf16>, vector<2x8x8xf32> -> vector<2x8x8xf32>
    "tpu.trace_stop"() : () -> ()
    %563 = vector.broadcast %25 : vector<2x1x8xf32> to vector<2x8x8xf32>
    %564 = arith.addf %562, %563 : vector<2x8x8xf32>
    %cst_197 = arith.constant dense<0xFF800000> : vector<2x8xf32>
    %565 = vector.multi_reduction <maximumf>, %564, %cst_197 [2] : vector<2x8x8xf32> to vector<2x8xf32>
    %566 = vector.shape_cast %565 : vector<2x8xf32> to vector<2x8x1xf32>
    %567 = vector.broadcast %566 : vector<2x8x1xf32> to vector<2x8x8xf32>
    %568 = arith.subf %564, %567 : vector<2x8x8xf32>
    %569 = math.exp %568 : vector<2x8x8xf32>
    %cst_198 = arith.constant dense<0.000000e+00> : vector<2x8xf32>
    %570 = vector.multi_reduction <add>, %569, %cst_198 [2] : vector<2x8x8xf32> to vector<2x8xf32>
    %571 = vector.shape_cast %570 : vector<2x8xf32> to vector<2x8x1xf32>
    %572 = vector.broadcast %571 : vector<2x8x1xf32> to vector<2x8x8xf32>
    %573 = arith.divf %569, %572 : vector<2x8x8xf32>
    %574 = arith.truncf %573 : vector<2x8x8xf32> to vector<2x8x8xbf16>
    "tpu.trace_start"() <{level = 10 : i32, message = "nqk,nkd->nqd"}> : () -> ()
    %cst_199 = arith.constant dense<0.000000e+00> : vector<2x8x8xf32>
    %575 = tpu.matmul %574, %561, %cst_199 {dimension_numbers = #tpu.dot_dimension_numbers<[2], [1], [1], [2], [0, 0, 0, 1, 1, 2], [0], [0]>} : vector<2x8x8xbf16>, vector<2x8x8xbf16>, vector<2x8x8xf32> -> vector<2x8x8xf32>
    "tpu.trace_stop"() : () -> ()
    %576 = vector.shape_cast %575 : vector<2x8x8xf32> to vector<16x8xf32>
    %577 = arith.truncf %576 : vector<16x8xf32> to vector<16x8xbf16>
    %578 = vector.extract_strided_slice %501 {offsets = [16, 0], sizes = [8, 32], strides = [1, 1]} : vector<32x32xbf16> to vector<8x32xbf16>
    %cst_200 = arith.constant dense<0.000000e+00> : vector<16x32xf32>
    %579 = tpu.matmul %577, %578, %cst_200 {dimension_numbers = #tpu.dot_dimension_numbers<[1], [0], [0], [1], [0, 0, 1, 1], [], []>} : vector<16x8xbf16>, vector<8x32xbf16>, vector<16x32xf32> -> vector<16x32xf32>
    %580 = arith.addf %555, %579 : vector<16x32xf32>
    %581 = vector.extract_strided_slice %504 {offsets = [0, 0, 24], sizes = [2, 8, 8], strides = [1, 1, 1]} : vector<2x8x32xf32> to vector<2x8x8xf32>
    %582 = arith.truncf %581 : vector<2x8x8xf32> to vector<2x8x8xbf16>
    %583 = vector.extract_strided_slice %505 {offsets = [0, 0, 24], sizes = [2, 8, 8], strides = [1, 1, 1]} : vector<2x8x32xf32> to vector<2x8x8xf32>
    %584 = arith.truncf %583 : vector<2x8x8xf32> to vector<2x8x8xbf16>
    %585 = vector.extract_strided_slice %506 {offsets = [0, 0, 24], sizes = [2, 8, 8], strides = [1, 1, 1]} : vector<2x8x32xf32> to vector<2x8x8xf32>
    %586 = arith.truncf %585 : vector<2x8x8xf32> to vector<2x8x8xbf16>
    "tpu.trace_start"() <{level = 10 : i32, message = "nqd,nkd->nqk"}> : () -> ()
    %cst_201 = arith.constant dense<0.000000e+00> : vector<2x8x8xf32>
    %587 = tpu.matmul %582, %584, %cst_201 {dimension_numbers = #tpu.dot_dimension_numbers<[2], [2], [1], [1], [0, 0, 0, 1, 1, 1], [0], [0]>} : vector<2x8x8xbf16>, vector<2x8x8xbf16>, vector<2x8x8xf32> -> vector<2x8x8xf32>
    "tpu.trace_stop"() : () -> ()
    %588 = vector.broadcast %25 : vector<2x1x8xf32> to vector<2x8x8xf32>
    %589 = arith.addf %587, %588 : vector<2x8x8xf32>
    %cst_202 = arith.constant dense<0xFF800000> : vector<2x8xf32>
    %590 = vector.multi_reduction <maximumf>, %589, %cst_202 [2] : vector<2x8x8xf32> to vector<2x8xf32>
    %591 = vector.shape_cast %590 : vector<2x8xf32> to vector<2x8x1xf32>
    %592 = vector.broadcast %591 : vector<2x8x1xf32> to vector<2x8x8xf32>
    %593 = arith.subf %589, %592 : vector<2x8x8xf32>
    %594 = math.exp %593 : vector<2x8x8xf32>
    %cst_203 = arith.constant dense<0.000000e+00> : vector<2x8xf32>
    %595 = vector.multi_reduction <add>, %594, %cst_203 [2] : vector<2x8x8xf32> to vector<2x8xf32>
    %596 = vector.shape_cast %595 : vector<2x8xf32> to vector<2x8x1xf32>
    %597 = vector.broadcast %596 : vector<2x8x1xf32> to vector<2x8x8xf32>
    %598 = arith.divf %594, %597 : vector<2x8x8xf32>
    %599 = arith.truncf %598 : vector<2x8x8xf32> to vector<2x8x8xbf16>
    "tpu.trace_start"() <{level = 10 : i32, message = "nqk,nkd->nqd"}> : () -> ()
    %cst_204 = arith.constant dense<0.000000e+00> : vector<2x8x8xf32>
    %600 = tpu.matmul %599, %586, %cst_204 {dimension_numbers = #tpu.dot_dimension_numbers<[2], [1], [1], [2], [0, 0, 0, 1, 1, 2], [0], [0]>} : vector<2x8x8xbf16>, vector<2x8x8xbf16>, vector<2x8x8xf32> -> vector<2x8x8xf32>
    "tpu.trace_stop"() : () -> ()
    %601 = vector.shape_cast %600 : vector<2x8x8xf32> to vector<16x8xf32>
    %602 = arith.truncf %601 : vector<16x8xf32> to vector<16x8xbf16>
    %603 = vector.extract_strided_slice %501 {offsets = [24, 0], sizes = [8, 32], strides = [1, 1]} : vector<32x32xbf16> to vector<8x32xbf16>
    %cst_205 = arith.constant dense<0.000000e+00> : vector<16x32xf32>
    %604 = tpu.matmul %602, %603, %cst_205 {dimension_numbers = #tpu.dot_dimension_numbers<[1], [0], [0], [1], [0, 0, 1, 1], [], []>} : vector<16x8xbf16>, vector<8x32xbf16>, vector<16x32xf32> -> vector<16x32xf32>
    %605 = arith.addf %580, %604 : vector<16x32xf32>
    %606 = vector.broadcast %503 : vector<1x32xf32> to vector<16x32xf32>
    %607 = arith.addf %605, %606 : vector<16x32xf32>
    %608 = arith.addf %607, %490 : vector<16x32xf32>
    %c1_206 = arith.constant 1 : index
    %c0_207 = arith.constant 0 : index
    %c0_208 = arith.constant 0 : index
    %609 = vector.load %arg15[%c1_206, %c0_207, %c0_208] : memref<2x1x32xf32, #tpu.memory_space<vmem>>, vector<1x1x32xf32>
    %610 = vector.shape_cast %609 : vector<1x1x32xf32> to vector<1x32xf32>
    %c1_209 = arith.constant 1 : index
    %c0_210 = arith.constant 0 : index
    %c0_211 = arith.constant 0 : index
    %611 = vector.load %arg16[%c1_209, %c0_210, %c0_211] : memref<2x1x32xf32, #tpu.memory_space<vmem>>, vector<1x1x32xf32>
    %612 = vector.shape_cast %611 : vector<1x1x32xf32> to vector<1x32xf32>
    %cst_212 = arith.constant dense<0.000000e+00> : vector<16xf32>
    %613 = vector.multi_reduction <add>, %608, %cst_212 [1] : vector<16x32xf32> to vector<16xf32>
    %614 = vector.shape_cast %613 : vector<16xf32> to vector<16x1xf32>
    %cst_213 = arith.constant 3.200000e+01 : f32
    %615 = vector.broadcast %cst_213 : f32 to vector<16x1xf32>
    %616 = arith.divf %614, %615 : vector<16x1xf32>
    %617 = vector.broadcast %616 : vector<16x1xf32> to vector<16x32xf32>
    %618 = arith.subf %608, %617 : vector<16x32xf32>
    %619 = arith.mulf %618, %618 : vector<16x32xf32>
    %cst_214 = arith.constant dense<0.000000e+00> : vector<16xf32>
    %620 = vector.multi_reduction <add>, %619, %cst_214 [1] : vector<16x32xf32> to vector<16xf32>
    %621 = vector.shape_cast %620 : vector<16xf32> to vector<16x1xf32>
    %cst_215 = arith.constant 3.200000e+01 : f32
    %622 = vector.broadcast %cst_215 : f32 to vector<16x1xf32>
    %623 = arith.divf %621, %622 : vector<16x1xf32>
    %624 = vector.broadcast %616 : vector<16x1xf32> to vector<16x32xf32>
    %625 = arith.subf %608, %624 : vector<16x32xf32>
    %cst_216 = arith.constant 9.99999974E-6 : f32
    %626 = vector.broadcast %cst_216 : f32 to vector<16x1xf32>
    %627 = arith.addf %623, %626 : vector<16x1xf32>
    %628 = math.rsqrt %627 : vector<16x1xf32>
    %629 = vector.broadcast %628 : vector<16x1xf32> to vector<16x32xf32>
    %630 = arith.mulf %625, %629 : vector<16x32xf32>
    %631 = vector.broadcast %610 : vector<1x32xf32> to vector<16x32xf32>
    %632 = arith.mulf %630, %631 : vector<16x32xf32>
    %633 = vector.broadcast %612 : vector<1x32xf32> to vector<16x32xf32>
    %634 = arith.addf %632, %633 : vector<16x32xf32>
    %635 = arith.truncf %634 : vector<16x32xf32> to vector<16x32xbf16>
    %c1_217 = arith.constant 1 : index
    %c0_218 = arith.constant 0 : index
    %c0_219 = arith.constant 0 : index
    %636 = vector.load %arg17[%c1_217, %c0_218, %c0_219] : memref<2x32x128xbf16, #tpu.memory_space<vmem>>, vector<1x32x128xbf16>
    %637 = vector.shape_cast %636 : vector<1x32x128xbf16> to vector<32x128xbf16>
    %cst_220 = arith.constant dense<0.000000e+00> : vector<16x128xf32>
    %638 = tpu.matmul %635, %637, %cst_220 {dimension_numbers = #tpu.dot_dimension_numbers<[1], [0], [0], [1], [0, 0, 1, 1], [], []>} : vector<16x32xbf16>, vector<32x128xbf16>, vector<16x128xf32> -> vector<16x128xf32>
    %c1_221 = arith.constant 1 : index
    %c0_222 = arith.constant 0 : index
    %c0_223 = arith.constant 0 : index
    %639 = vector.load %arg18[%c1_221, %c0_222, %c0_223] : memref<2x1x128xf32, #tpu.memory_space<vmem>>, vector<1x1x128xf32>
    %640 = vector.shape_cast %639 : vector<1x1x128xf32> to vector<1x128xf32>
    %641 = vector.broadcast %640 : vector<1x128xf32> to vector<16x128xf32>
    %642 = arith.addf %638, %641 : vector<16x128xf32>
    %cst_224 = arith.constant 0.000000e+00 : f32
    %643 = vector.broadcast %cst_224 : f32 to vector<16x128xf32>
    %644 = arith.maximumf %642, %643 : vector<16x128xf32>
    %645 = arith.truncf %644 : vector<16x128xf32> to vector<16x128xbf16>
    %c1_225 = arith.constant 1 : index
    %c0_226 = arith.constant 0 : index
    %c0_227 = arith.constant 0 : index
    %646 = vector.load %arg19[%c1_225, %c0_226, %c0_227] : memref<2x128x32xbf16, #tpu.memory_space<vmem>>, vector<1x128x32xbf16>
    %647 = vector.shape_cast %646 : vector<1x128x32xbf16> to vector<128x32xbf16>
    %cst_228 = arith.constant dense<0.000000e+00> : vector<16x32xf32>
    %648 = tpu.matmul %645, %647, %cst_228 {dimension_numbers = #tpu.dot_dimension_numbers<[1], [0], [0], [1], [0, 0, 1, 1], [], []>} : vector<16x128xbf16>, vector<128x32xbf16>, vector<16x32xf32> -> vector<16x32xf32>
    %c1_229 = arith.constant 1 : index
    %c0_230 = arith.constant 0 : index
    %c0_231 = arith.constant 0 : index
    %649 = vector.load %arg20[%c1_229, %c0_230, %c0_231] : memref<2x1x32xf32, #tpu.memory_space<vmem>>, vector<1x1x32xf32>
    %650 = vector.shape_cast %649 : vector<1x1x32xf32> to vector<1x32xf32>
    %651 = vector.broadcast %650 : vector<1x32xf32> to vector<16x32xf32>
    %652 = arith.addf %648, %651 : vector<16x32xf32>
    %653 = arith.addf %652, %634 : vector<16x32xf32>
    %c1_232 = arith.constant 1 : index
    %c0_233 = arith.constant 0 : index
    %c0_234 = arith.constant 0 : index
    %654 = vector.load %arg21[%c1_232, %c0_233, %c0_234] : memref<2x1x32xf32, #tpu.memory_space<vmem>>, vector<1x1x32xf32>
    %655 = vector.shape_cast %654 : vector<1x1x32xf32> to vector<1x32xf32>
    %c1_235 = arith.constant 1 : index
    %c0_236 = arith.constant 0 : index
    %c0_237 = arith.constant 0 : index
    %656 = vector.load %arg22[%c1_235, %c0_236, %c0_237] : memref<2x1x32xf32, #tpu.memory_space<vmem>>, vector<1x1x32xf32>
    %657 = vector.shape_cast %656 : vector<1x1x32xf32> to vector<1x32xf32>
    %cst_238 = arith.constant dense<0.000000e+00> : vector<16xf32>
    %658 = vector.multi_reduction <add>, %653, %cst_238 [1] : vector<16x32xf32> to vector<16xf32>
    %659 = vector.shape_cast %658 : vector<16xf32> to vector<16x1xf32>
    %cst_239 = arith.constant 3.200000e+01 : f32
    %660 = vector.broadcast %cst_239 : f32 to vector<16x1xf32>
    %661 = arith.divf %659, %660 : vector<16x1xf32>
    %662 = vector.broadcast %661 : vector<16x1xf32> to vector<16x32xf32>
    %663 = arith.subf %653, %662 : vector<16x32xf32>
    %664 = arith.mulf %663, %663 : vector<16x32xf32>
    %cst_240 = arith.constant dense<0.000000e+00> : vector<16xf32>
    %665 = vector.multi_reduction <add>, %664, %cst_240 [1] : vector<16x32xf32> to vector<16xf32>
    %666 = vector.shape_cast %665 : vector<16xf32> to vector<16x1xf32>
    %cst_241 = arith.constant 3.200000e+01 : f32
    %667 = vector.broadcast %cst_241 : f32 to vector<16x1xf32>
    %668 = arith.divf %666, %667 : vector<16x1xf32>
    %669 = vector.broadcast %661 : vector<16x1xf32> to vector<16x32xf32>
    %670 = arith.subf %653, %669 : vector<16x32xf32>
    %cst_242 = arith.constant 9.99999974E-6 : f32
    %671 = vector.broadcast %cst_242 : f32 to vector<16x1xf32>
    %672 = arith.addf %668, %671 : vector<16x1xf32>
    %673 = math.rsqrt %672 : vector<16x1xf32>
    %674 = vector.broadcast %673 : vector<16x1xf32> to vector<16x32xf32>
    %675 = arith.mulf %670, %674 : vector<16x32xf32>
    %676 = vector.broadcast %655 : vector<1x32xf32> to vector<16x32xf32>
    %677 = arith.mulf %675, %676 : vector<16x32xf32>
    %678 = vector.broadcast %657 : vector<1x32xf32> to vector<16x32xf32>
    %679 = arith.addf %677, %678 : vector<16x32xf32>
    %680 = arith.truncf %679 : vector<16x32xf32> to vector<16x32xbf16>
    %c0_243 = arith.constant 0 : index
    %c0_244 = arith.constant 0 : index
    %681 = vector.load %arg23[%c0_243, %c0_244] : memref<32x128xbf16, #tpu.memory_space<vmem>>, vector<32x128xbf16>
    %cst_245 = arith.constant dense<0.000000e+00> : vector<16x128xf32>
    %682 = tpu.matmul %680, %681, %cst_245 {dimension_numbers = #tpu.dot_dimension_numbers<[1], [0], [0], [1], [0, 0, 1, 1], [], []>} : vector<16x32xbf16>, vector<32x128xbf16>, vector<16x128xf32> -> vector<16x128xf32>
    %c0_246 = arith.constant 0 : index
    %c0_247 = arith.constant 0 : index
    %683 = vector.load %arg24[%c0_246, %c0_247] : memref<1x128xf32, #tpu.memory_space<vmem>>, vector<1x128xf32>
    %684 = vector.broadcast %683 : vector<1x128xf32> to vector<16x128xf32>
    %685 = arith.addf %682, %684 : vector<16x128xf32>
    %c0_248 = arith.constant 0 : index
    %c0_249 = arith.constant 0 : index
    %686 = vector.load %arg25[%c0_248, %c0_249] : memref<16x128xf32, #tpu.memory_space<vmem>>, vector<16x128xf32>
    tpu.vector_store %arg25[%c0_248, %c0_249], %685 {strides = array<i32>} : memref<16x128xf32, #tpu.memory_space<vmem>>, vector<16x128xf32>,
    return
  }
}

</mosaic_0001>

<bundles_post_ra>
// kernel: tpu_custom_call.1
= control target key start
LH: loop header
LB: loop body
LE: loop exit
PB: predicated region body
PF: predicated region fallthrough
CT: control target
= control target key end

     0   :  { %s8490_s0 = inlined_call_operand.vmem [shape: s32[16,1], index: 0, kind: input, shape index: {}]   ;;  %s8491_s1 = inlined_call_operand.hbm [shape: f32[16,32], index: 1, kind: input, shape index: {}]   ;;  %s8492_s2 = inlined_call_operand.hbm [shape: bf16[16,32], index: 2, kind: input, shape index: {}]   ;;  %s8493_s3 = inlined_call_operand.vmem [shape: f32[2,1,8], index: 3, kind: input, shape index: {}]   ;;  %s8494_s4 = inlined_call_operand.hbm [shape: f32[2,8,8], index: 4, kind: input, shape index: {}]   ;;  %s8495_s5 = inlined_call_operand.vmem [shape: bf16[64,32], index: 5, kind: input, shape index: {}]   ;;  %s8496_s6 = inlined_call_operand.vmem [shape: bf16[2,32,96], index: 6, kind: input, shape index: {}]   ;;  %s8497_s7 = inlined_call_operand.vmem [shape: bf16[2,32,32], index: 7, kind: input, shape index: {}]   ;;  %s8498_s8 = inlined_call_operand.hbm [shape: f32[2,1,32], index: 8, kind: input, shape index: {}]   ;;  %s8499_s9 = inlined_call_operand.hbm [shape: f32[2,1,32], index: 9, kind: input, shape index: {}]   ;;  %s8500_s10 = inlined_call_operand.hbm [shape: f32[2,1,32], index: 10, kind: input, shape index: {}]   ;;  %s8501_s11 = inlined_call_operand.vmem [shape: bf16[2,32,32], index: 11, kind: input, shape index: {}]   ;;  %s8502_s12 = inlined_call_operand.vmem [shape: bf16[2,32,64], index: 12, kind: input, shape index: {}]   ;;  %s8503_s13 = inlined_call_operand.vmem [shape: bf16[2,32,32], index: 13, kind: input, shape index: {}]   ;;  %s8504_s14 = inlined_call_operand.vmem [shape: f32[2,1,32], index: 14, kind: input, shape index: {}]   ;;  %s8505_s15 = inlined_call_operand.vmem [shape: f32[2,1,32], index: 15, kind: input, shape index: {}]   ;;  %s8506_s16 = inlined_call_operand.vmem [shape: f32[2,1,32], index: 16, kind: input, shape index: {}]   ;;  %s8507_s17 = inlined_call_operand.vmem [shape: bf16[2,32,128], index: 17, kind: input, shape index: {}]   ;;  %s8508_s18 = inlined_call_operand.vmem [shape: f32[2,1,128], index: 18, kind: input, shape index: {}]   ;;  %s8509_s19 = inlined_call_operand.vmem [shape: bf16[2,128,32], index: 19, kind: input, shape index: {}]   ;;  %s8510_s20 = inlined_call_operand.vmem [shape: f32[2,1,32], index: 20, kind: input, shape index: {}]   ;;  %s8511_s21 = inlined_call_operand.vmem [shape: f32[2,1,32], index: 21, kind: input, shape index: {}]   ;;  %s8512_s22 = inlined_call_operand.vmem [shape: f32[2,1,32], index: 22, kind: input, shape index: {}]   ;;  %s8513_s23 = inlined_call_operand.vmem [shape: bf16[32,128], index: 23, kind: input, shape index: {}]   ;;  %s8514_s24 = inlined_call_operand.vmem [shape: f32[1,128], index: 24, kind: input, shape index: {}]   ;;  %s8515_s25 = inlined_call_operand.hbm [shape: f32[16,128], index: 25, kind: output, shape index: {}]  }
   0x1   :  { %8537 = sst [smem:[#allocation19_spill]] %s8490_s0 }
   0x2   :  { %8538 = sst [smem:[#allocation20_spill]] %s8491_s1 }
   0x3   :  { %8539 = sst [smem:[#allocation21_spill]] %s8492_s2 }
   0x4   :  { %8540 = sst [smem:[#allocation22_spill]] %s8493_s3 }
   0x5   :  { %8541 = sst [smem:[#allocation23_spill]] %s8494_s4 }
   0x6   :  { %8542 = sst [smem:[#allocation24_spill]] %s8495_s5 }
   0x7   :  { %8543 = sst [smem:[#allocation25_spill]] %s8496_s6 }
   0x8   :  { %8544 = sst [smem:[#allocation26_spill]] %s8497_s7 }
   0x9   :  { %8545 = sst [smem:[#allocation27_spill]] %s8498_s8 }
   0xa   :  { %8546 = sst [smem:[#allocation28_spill]] %s8499_s9 }
   0xb   :  { %30 = vsyncpa [#allocation3], 0 }
   0xc   :  { %31 = vsyncpa [#allocation6], 0 }
   0xd   :  { %32 = vsyncpa [#allocation9], 0 }
   0xe   :  { %33 = vsyncpa [#allocation12], 0 }
   0xf   :  { %34 = vsyncpa [#allocation4], 0  ;;  %s7147_s29 = smov [#allocation5]  }
  0x10   :  { %s54_s2 = sshll.u32 %s7147_s29, 4  ;;  %s55_s2 = int_to_ptr.vmem [resolvable:$true] %s54_s2 }
  0x11   :  { %s7005_s6 = scalar_lea.vmem %s55_s2, 128  ;;  %p7010_p1 = scmp.lt.s32.totalorder %s55_s2, %s55_s2 }
  0x12   :  { %p7006_p0 = scmp.ne.s32.totalorder %s55_s2, %s7005_s6  ;;  %p7011_p2 = scmp.lt.s32.totalorder %s7005_s6, %s7005_s6 }
  0x14   :  { %p7012_p3 = por %p7011_p2, %p7010_p1 }
  0x16   :  { %p7013_p4 = pnand %p7012_p3, %p7006_p0 }
  0x18   :  { %7016 = shalt.err (!%p7013_p4)
}
  0x19   :  { %s8521_s30 = smov 64   ;;  %s7149_s7 = smov 4  }
  0x1a   :  { %s8547_s1 = sld [smem:[#allocation21_spill]]  ;;  %s7150_s8 = smov [#allocation8]  }
  0x1b   :  { %s86_s27 = sshll.u32 %s7150_s8, 4  ;;  %s87_s27 = int_to_ptr.vmem [resolvable:$true] %s86_s27 }
  0x1c   :  { %s7025_s4 = scalar_lea.vmem %s87_s27, 32  ;;  %p7030_p6 = scmp.lt.s32.totalorder %s87_s27, %s87_s27 }
  0x1d   :  { %p7026_p5 = scmp.ne.s32.totalorder %s87_s27, %s7025_s4  ;;  %p7031_p7 = scmp.lt.s32.totalorder %s7025_s4, %s7025_s4 }
  0x1f   :  { %p7032_p8 = por %p7031_p7, %p7030_p6 }
  0x20   :  { %60 = dma.hbm_to_vmem [thread:$0]  %s8547_s1, 128, %s55_s2, [#allocation6], %s8521_s30, %s8521_s30, %s7149_s7  }
  0x21   :  { %p7033_p9 = pnand %p7032_p8, %p7026_p5 }
  0x23   :  { %7036 = shalt.err (!%p7033_p9)
}
  0x24   :  { %s8523_s28 = smov 16   ;;  %s7152_s9 = smov 1  }
  0x25   :  { %s8548_s29 = sld [smem:[#allocation27_spill]]  ;;  %s7153_s2 = smov [#allocation2]  }
  0x26   :  { %s42_s6 = sshll.u32 %s7153_s2, 4  ;;  %s43_s6 = int_to_ptr.vmem [resolvable:$true] %s42_s6 }
  0x27   :  { %s7045_s7 = scalar_lea.vmem %s43_s6, 256  ;;  %p7050_p11 = scmp.lt.s32.totalorder %s43_s6, %s43_s6 }
  0x28   :  { %p7046_p10 = scmp.ne.s32.totalorder %s43_s6, %s7045_s7  ;;  %p7051_p12 = scmp.lt.s32.totalorder %s7045_s7, %s7045_s7 }
  0x2a   :  { %p7052_p13 = por %p7051_p12, %p7050_p11 }
  0x2b   :  { %92 = dma.hbm_to_vmem [thread:$0]  %s8548_s29, 32, %s87_s27, [#allocation9], %s8523_s28, %s8523_s28, %s7152_s9  }
  0x2c   :  { %p7053_p0 = pnand %p7052_p13, %p7046_p10 }
  0x2e   :  { %7056 = shalt.err (!%p7053_p0)
}
  0x2f   :  { %s8525_s3 = smov 128   ;;  %s8526_s26 = smov 8  }
  0x30   :  { %s8549_s4 = sld [smem:[#allocation20_spill]]  ;;  %s7156_s27 = smov [#allocation7]  }
  0x31   :  { %s68_s5 = sshll.u32 %s7156_s27, 4  ;;  %s7157_s0 = smov [#allocation10]   ;;  %s69_s5 = int_to_ptr.vmem [resolvable:$true] %s68_s5 }
  0x32   :  { %s98_s29 = sshll.u32 %s7157_s0, 4  ;;  %s7065_s2 = scalar_lea.vmem %s69_s5, 256  ;;  %s99_s29 = int_to_ptr.vmem [resolvable:$true] %s98_s29 }
  0x33   :  { %p7066_p1 = scmp.ne.s32.totalorder %s69_s5, %s7065_s2  ;;  %p7070_p2 = scmp.lt.s32.totalorder %s69_s5, %s69_s5 }
  0x34   :  { %p7071_p3 = scmp.lt.s32.totalorder %s7065_s2, %s7065_s2 }
  0x36   :  { %48 = dma.hbm_to_vmem [thread:$0]  %s8549_s4, 256, %s43_s6, [#allocation3], %s8525_s3, %s8525_s3, %s8526_s26  }
  0x37   :  { %p7072_p4 = por %p7071_p3, %p7070_p2 }
  0x39   :  { %p7073_p5 = pnand %p7072_p4, %p7066_p1 }
  0x3b   :  { %7076 = shalt.err (!%p7073_p5)
}
  0x3c   :  { %s8550_s28 = sld [smem:[#allocation23_spill]]  ;;  %s7085_s6 = scalar_lea.vmem %s99_s29, 32 }
  0x3d   :  { %p7086_p6 = scmp.ne.s32.totalorder %s99_s29, %s7085_s6  ;;  %p7090_p7 = scmp.lt.s32.totalorder %s99_s29, %s99_s29 }
  0x3e   :  { %p7091_p8 = scmp.lt.s32.totalorder %s7085_s6, %s7085_s6 }
  0x40   :  { %p7092_p9 = por %p7091_p8, %p7090_p7 }
  0x42   :  { %74 = dma.hbm_to_vmem [thread:$0]  %s8550_s28, 256, %s69_s5, [#allocation6], %s8525_s3, %s8525_s3, %s8526_s26  }
  0x43   :  { %p7093_p10 = pnand %p7092_p9, %p7086_p6 }
  0x45   :  { %7096 = shalt.err (!%p7093_p10)
}
  0x46   :  { %s8551_s1 = smov 16   ;;  %s8552_s27 = sld [smem:[#allocation28_spill]] }
  0x47   :  { %s7158_s0 = smov [#allocation11]  }
  0x48   :  { %s110_s2 = sshll.u32 %s7158_s0, 4  ;;  %s111_s2 = int_to_ptr.vmem [resolvable:$true] %s110_s2 }
  0x49   :  { %s7105_s30 = scalar_lea.vmem %s111_s2, 32  ;;  %p7110_p12 = scmp.lt.s32.totalorder %s111_s2, %s111_s2 }
  0x4a   :  { %p7106_p11 = scmp.ne.s32.totalorder %s111_s2, %s7105_s30  ;;  %p7111_p13 = scmp.lt.s32.totalorder %s7105_s30, %s7105_s30 }
  0x4c   :  { %104 = dma.hbm_to_vmem [thread:$0]  %s8552_s27, 32, %s99_s29, [#allocation9], %s8551_s1, %s8551_s1, %s7152_s9  }
  0x4d   :  { %p7112_p0 = por %p7111_p13, %p7110_p12 }
  0x4f   :  { %p7113_p1 = pnand %p7112_p0, %p7106_p11 }
  0x51   :  { %7116 = shalt.err (!%p7113_p1)
}
  0x52   :  { %116 = dma.hbm_to_vmem [thread:$0]  %s8500_s10, 32, %s111_s2, [#allocation12], %s8551_s1, %s8551_s1, %s7152_s9  }
  0x53   :  { %7137 = dma.done.wait [#allocation3], 256  }
  0x54   :  { %7138 = vsyncadd [#allocation3], 4294967040 }
  0x55   :  { %7139 = dma.done.wait [#allocation6], 384  }
  0x56   :  { %7140 = vsyncadd [#allocation6], 4294966912 }
  0x57   :  { %7141 = dma.done.wait [#allocation9], 64  }
  0x58   :  { %7142 = vsyncadd [#allocation9], 4294967232 }
  0x59   :  { %7143 = dma.done.wait [#allocation12], 32  }
  0x5a   :  { %7144 = vsyncadd [#allocation12], 4294967264  ;;  %v7159_v0 = vmov 0   ;;  %v7160_v1 = vmov 0.0   ;;  %s8553_s6 = sld [smem:[#allocation19_spill]]  ;;  %vm7161_vm0 = vmmov 0   ;;  %v166_v8 = vlaneseq }
  0x5b   :  { %6804 = vset.pattern.permute.xlu0 %v7159_v0  ;;  %6174 = vmatprep.subr.bf16.mxu1 %v7160_v1  ;;  %s8554_s1 = sld [smem:[#allocation24_spill]]  ;;  %vm213_vm3 = vcmask 523264   ;;  %v260_v20 = vld [vmem:[#allocation2] sm:$0xff]  ;;  %v261_v22 = vld [vmem:[#allocation2 + $0x8] sm:$0xff]  ;;  %vm295_vm4 = vcmask 261120   ;;  %vm350_vm5 = vcmask 64512  }
  0x5c   :  { %6200 = vmatprep.subr.bf16.mxu0 %v7160_v1  ;;  %6182 = vmatprep.mubr.msk.bf16.mxu1 %vm7161_vm0, %v7160_v1  ;;  %v167_v9 = vand.u32 127, %v166_v8  ;;  %v266_v38 = vld [vmem:[#allocation7] sm:$0xff]  ;;  %v267_v39 = vld [vmem:[#allocation7 + $0x8] sm:$0xff]  ;;  %s8556_s8 = smov 64   ;;  %s7163_s4 = smov 88   ;;  %vm475_vm8 = vcmask 1043456  }
  0x5d   :  { %6202 = vmatprep.mubr.msk.bf16.mxu0 %vm7161_vm0, %v7160_v1  ;;  %vm268_vm6 = vcmp.eq.f32.partialorder %v266_v38, 0.0  ;;  %vm269_vm7 = vcmp.eq.f32.partialorder %v267_v39, 0.0  ;;  %s7164_s27 = smov 120   ;;  %s8531_s0 = smov 56  }
  0x5e   :  { %v7409_v40 = vsel %vm268_vm6, -1e+20, %v7160_v1  ;;  %v7413_v44 = vsel %vm269_vm7, -1e+20, %v7160_v1  ;;  %s7166_s2 = smov 80   ;;  %s7167_s30 = smov 112  }
  0x5f   :  { %s8557_s29 = sld [smem:[#allocation26_spill]]  ;;  %s8529_s9 = smov 48  }
  0x60   :  { %v164_v2 = vld [vmem:[%s8553_s6] sm:$0xff]  ;;  %v165_v4 = vld [vmem:[%s8553_s6 + $0x8] sm:$0xff]  ;;  %s8555_s6 = sld [smem:[#allocation25_spill]]  ;;  %s8535_s28 = smov 72  }
  0x61   :  { %169 = vperm.xlu0 %6804, %v164_v2   ;;  %v6805_v3 = vld [vmem:[%s8554_s1 + $0x18] sm:$0xff]   ;;  %v6806_v5 = vld [vmem:[%s8554_s1 + $0x10] sm:$0xff]   ;;  %v6807_v6 = vld [vmem:[%s8554_s1 + $0x8] sm:$0xff]   ;;  %s8533_s5 = smov 104   ;;  %s8527_s7 = smov 40  }
  0x62   :  { %6175 = vmatpush3.bf16.msra.mxu1 %v6805_v3  ;;  %v6808_v7 = vld [vmem:[%s8554_s1] sm:$0xff]   ;;  %s7162_s1 = smov 96   ;;  %s8562_s3 = smov 104  }
  0x63   :  { %6176 = vmatprep.subr.bf16.mxu1 %v7160_v1 }
  0x65   :  { %172 = vperm.xlu0 %6804, %v165_v4  }
  0x66   :  { %6177 = vmatpush3.bf16.msra.mxu1 %v6806_v5  ;;  %v6809_v15 = vld [vmem:[%s8555_s6 + $0x8] sm:$0xff]   ;;  %v6810_v16 = vld [vmem:[%s8555_s6] sm:$0xff]  }
  0x67   :  { %6178 = vmatprep.subr.bf16.mxu1 %v7160_v1 }
  0x6a   :  { %6179 = vmatpush3.bf16.msra.mxu1 %v6807_v6 }
  0x6b   :  { %6180 = vmatprep.subr.bf16.mxu1 %v7160_v1 }
  0x6e   :  { %6181 = vmatpush3.bf16.msra.mxu1 %v6808_v7 }
  0x6f   :  { %6186 = vmatprep.subr.bf16.mxu1 %v7160_v1 }
  0xdc   :  { %v170_v10 = vpop.permute.xlu0 %169 }
  0xdd   :  { %vm174_vm1 = vcmp.eq.s32.totalorder %v167_v9, %v170_v10 }
  0xde   :  { %v5765_v12 = vsel %vm174_vm1, 1.0, %v7160_v1 }
  0xe0   :  { %v173_v11 = vpop.permute.xlu0 %172 }
  0xe1   :  { %vm175_vm2 = vcmp.eq.s32.totalorder %v167_v9, %v173_v11 }
  0xe2   :  { %v5766_v13 = vsel %vm175_vm2, 1.0, %v7160_v1 }
  0xe3   :  { %v180_v14 = vpack.c.bf16 %v5766_v13, %v5765_v12 }
  0xe5   :  { %6183 = vmatmul.mubr.msk.bf16.vlgmr.msra.gmra.mxu1 %vm213_vm3, %v180_v14 }
  0xe6   :  { %6190 = vmatprep.mubr.msk.bf16.mxu1 %vm7161_vm0, %v7160_v1  ;;  %6187 = vmatpush3.bf16.msra.mxu1 %v6809_v15 }
  0xe7   :  { %6188 = vmatprep.subr.bf16.mxu1 %v7160_v1 }
  0xea   :  { %6189 = vmatpush3.bf16.msra.mxu1 %v6810_v16 }
  0xeb   :  { %6194 = vmatprep.subr.bf16.mxu1 %v7160_v1 }
 0x1a5   :  { %v251_v17 = vpop.f32.mrf.mxu1 }
 0x1a6   :  { %v258_v19 = vmul.f32 5.656854, %v251_v17 }
 0x1a7   :  { %v6184_v18 = vpop.f32.mrf.mxu1 }
 0x1a8   :  { %v7379_v25 = vadd.f32 %v260_v20, %v258_v19 }
 0x1a9   :  { %v254_v21 = vpop.f32.mrf.mxu1 }
 0x1aa   :  { %v259_v23 = vmul.f32 5.656854, %v254_v21 }
 0x1ab   :  { %v6185_v24 = vpop.f32.mrf.mxu1 }
 0x1ac   :  { %v7381_v26 = vadd.f32 %v261_v22, %v259_v23 }
 0x1ae   :  { %v278_v27 = vpack.c.bf16 %v7381_v26, %v7379_v25 }
 0x1b0   :  { %6191 = vmatmul.mubr.msk.bf16.vlgmr.msra.gmra.mxu1 %vm295_vm4, %v278_v27 }
 0x1b1   :  { %6196 = vmatprep.mubr.msk.bf16.mxu1 %vm7161_vm0, %v7160_v1 }
 0x270   :  { %v333_v28 = vpop.f32.mrf.mxu1 }
 0x271   :  { %v7388_v29 = vpack.c.bf16 %v333_v28, %v333_v28 }
 0x272   :  { %v6192_v30 = vpop.f32.mrf.mxu1 }
 0x273   :  { %348 = vrot.lane.b32.xlu1 %v7388_v29, %s7162_s1 }
 0x274   :  { %v336_v31 = vpop.f32.mrf.mxu1 }
 0x275   :  { %v7392_v32 = vpack.c.bf16 %v336_v31, %v336_v31 }
 0x276   :  { %v6193_v33 = vpop.f32.mrf.mxu1 }
 0x277   :  { %398 = vrot.lane.b32.xlu1 %v7392_v32, %s7162_s1 }
 0x2e5   :  { %v349_v34 = vpop.permute.xlu1 %348 }
 0x2e6   :  { %v355_v35 = vsel %vm350_vm5, %v349_v34, 0 }
 0x2e7   :  { %6195 = vmatpush3.bf16.xpose.msra.mxu1 %v355_v35 }
 0x2e8   :  { %6206 = vmatprep.subr.bf16.mxu1 %v7160_v1 }
 0x2e9   :  { %v399_v36 = vpop.permute.xlu1 %398 }
 0x2ea   :  { %v404_v37 = vsel %vm350_vm5, %v399_v36, 0 }
 0x2eb   :  { %6201 = vmatpush3.bf16.xpose.msra.mxu0 %v404_v37 }
 0x2ec   :  { %6212 = vmatprep.subr.bf16.mxu0 %v7160_v1 }
 0x2ee   :  { %6197 = vmatmul.mubr.msk.bf16.vlgmr.msra.gmra.mxu1 %vm350_vm5, %v7388_v29 }
 0x2ef   :  { %6208 = vmatprep.mubr.msk.bf16.mxu1 %vm7161_vm0, %v7160_v1 }
 0x2f2   :  { %6203 = vmatmul.mubr.msk.bf16.vlgmr.msra.gmra.mxu0 %vm350_vm5, %v7392_v32 }
 0x2f3   :  { %6214 = vmatprep.mubr.msk.bf16.mxu0 %vm7161_vm0, %v7160_v1 }
 0x3ae   :  { %v391_v41 = vpop.f32.mrf.mxu1 }
 0x3af   :  { %v392_v42 = vadd.f32 %v391_v41, %v7409_v40 }
 0x3b0   :  { %v6198_v43 = vpop.f32.mrf.mxu1 }
 0x3b1   :  { %v446_v45 = vsel %vm350_vm5, %v392_v42, -inf }
 0x3b2   :  { %v440_v46 = vpop.f32.mrf.mxu0  ;;  %447 = vmax.xlane.f32.xlu0 %v446_v45  ;;  %v394_v47 = vpop.f32.mrf.mxu1 }
 0x3b3   :  { %v441_v48 = vadd.f32 %v440_v46, %v7413_v44 }
 0x3b4   :  { %v6199_v49 = vpop.f32.mrf.mxu1  ;;  %v6204_v50 = vpop.f32.mrf.mxu0 }
 0x3b5   :  { %v449_v51 = vsel %vm350_vm5, %v441_v48, -inf }
 0x3b6   :  { %450 = vmax.xlane.f32.xlu1 %v449_v51  ;;  %v443_v52 = vpop.f32.mrf.mxu0 }
 0x3b8   :  { %v6205_v53 = vpop.f32.mrf.mxu0 }
 0x3c7   :  { %470 = vrot.lane.b32.xlu1 %v7388_v29, %s8556_s8 }
 0x3cb   :  { %570 = vrot.lane.b32.xlu1 %v7388_v29, %s7163_s4 }
 0x3cf   :  { %620 = vrot.lane.b32.xlu1 %v7392_v32, %s7163_s4 }
 0x3d3   :  { %618 = vrot.lane.b32.xlu1 %v7392_v32, %s7164_s27 }
 0x43b   :  { %v448_v54 = vpop.xlane.xlu0 %447 }
 0x43c   :  { %v452_v55 = vsub.f32 %v392_v42, %v448_v54 }
 0x43e   :  { %v454_v56 = vmul.f32 1.442695, %v452_v55 }
 0x43f   :  { %v451_v57 = vpop.xlane.xlu1 %450 }
 0x440   :  { %6844 = vpow2.f32 %v454_v56  ;;  %v453_v58 = vsub.f32 %v441_v48, %v451_v57 }
 0x442   :  { %v456_v59 = vmul.f32 1.442695, %v453_v58 }
 0x443   :  { %v471_v60 = vpop.permute.xlu1 %470 }
 0x444   :  { %6846 = vpow2.f32 %v456_v59  ;;  %v477_v61 = vsel %vm475_vm8, %v471_v60, 0 }
 0x445   :  { %6207 = vmatpush3.bf16.msra.mxu1 %v477_v61 }
 0x446   :  { %6218 = vmatprep.subr.bf16.mxu1 %v7160_v1 }
 0x447   :  { %v571_v9 = vpop.permute.xlu1 %570 }
 0x448   :  { %v576_v13 = vsel %vm350_vm5, %v571_v9, 0 }
 0x44b   :  { %v621_v15 = vpop.permute.xlu1 %620 }
 0x44c   :  { %v626_v17 = vsel %vm350_vm5, %v621_v15, 0 }
 0x44d   :  { %v6845_v62 = vpop.eup %6844 }
 0x44e   :  { %v458_v63 = vsel %vm350_vm5, %v6845_v62, 0.0 }
 0x44f   :  { %459 = vadd.xlane.f32.xlu0 %v458_v63  ;;  %v619_v19 = vpop.permute.xlu1 %618 }
 0x451   :  { %v6847_v0 = vpop.eup %6846 }
 0x452   :  { %v461_v2 = vsel %vm350_vm5, %v6847_v0, 0.0 }
 0x453   :  { %462 = vadd.xlane.f32.xlu0 %v461_v2 }
 0x469   :  { %519 = vrot.lane.b32.xlu0 %v7392_v32, %s8556_s8 }
 0x46d   :  { %568 = vrot.lane.b32.xlu0 %v7388_v29, %s7164_s27 }
 0x4d8   :  { %v460_v3 = vpop.xlane.xlu0 %459 }
 0x4d9   :  { %6848 = vrcp.f32 %v460_v3 }
 0x4dc   :  { %v463_v4 = vpop.xlane.xlu0 %462 }
 0x4dd   :  { %6850 = vrcp.f32 %v463_v4  ;;  %v340_v4 = vld [vmem:[%s8557_s29] sm:$0xf] }
 0x4e0   :  { %v520_v5 = vpop.permute.xlu0 %519 }
 0x4e1   :  { %v525_v6 = vsel %vm475_vm8, %v520_v5, 0 }
 0x4e2   :  { %6213 = vmatpush3.bf16.msra.mxu0 %v525_v6 }
 0x4e3   :  { %6224 = vmatprep.subr.bf16.mxu0 %v7160_v1 }
 0x4e4   :  { %v569_v18 = vpop.permute.xlu0 %568 }
 0x4e6   :  { %v6849_v7 = vpop.eup %6848 }
 0x4e7   :  { %v465_v10 = vmul.f32 %v6849_v7, %v6845_v62  ;;  %v840_v7 = vsel %vm475_vm8, %v340_v4, 0 }
 0x4e9   :  { %v468_v11 = vpack.c.bf16 %v465_v10, %v465_v10 }
 0x4ea   :  { %v6851_v12 = vpop.eup %6850 }
 0x4eb   :  { %6209 = vmatmul.mubr.msk.bf16.vlgmr.msra.gmra.mxu1 %vm350_vm5, %v468_v11  ;;  %v467_v14 = vmul.f32 %v6851_v12, %v6847_v0 }
 0x4ec   :  { %6219 = vmatpush3.bf16.xpose.msra.mxu1 %v576_v13  ;;  %6220 = vmatprep.mubr.msk.bf16.mxu1 %vm7161_vm0, %v7160_v1  ;;  %v341_v13 = vld [vmem:[%s8557_s29 + $0x4] sm:$0xf] }
 0x4ed   :  { %v469_v16 = vpack.c.bf16 %v467_v14, %v467_v14  ;;  %6230 = vmatprep.subr.bf16.mxu1 %v7160_v1  ;;  %v793_v14 = vsel %vm475_vm8, %v341_v13, 0 }
 0x4ef   :  { %6215 = vmatmul.mubr.msk.bf16.vlgmr.msra.gmra.mxu0 %vm350_vm5, %v469_v16 }
 0x4f0   :  { %6225 = vmatpush3.bf16.xpose.msra.mxu0 %v626_v17  ;;  %6226 = vmatprep.mubr.msk.bf16.mxu0 %vm7161_vm0, %v7160_v1 }
 0x4f1   :  { %6236 = vmatprep.subr.bf16.mxu0 %v7160_v1 }
 0x4f3   :  { %6221 = vmatmul.mubr.msk.bf16.vlgmr.msra.gmra.mxu1 %vm350_vm5, %v569_v18 }
 0x4f4   :  { %6232 = vmatprep.mubr.msk.bf16.mxu1 %vm7161_vm0, %v7160_v1 }
 0x4f7   :  { %6227 = vmatmul.mubr.msk.bf16.vlgmr.msra.gmra.mxu0 %vm350_vm5, %v619_v19 }
 0x4f8   :  { %6238 = vmatprep.mubr.msk.bf16.mxu0 %vm7161_vm0, %v7160_v1 }
 0x5ab   :  { %v7452_v20 = vpop.f32.mrf.mxu1 }
 0x5ad   :  { %v6210_v21 = vpop.f32.mrf.mxu1 }
 0x5af   :  { %v516_v22 = vpop.f32.mrf.mxu1  ;;  %v7454_v23 = vpop.f32.mrf.mxu0 }
 0x5b0   :  { %v567_v24 = vpack.c.bf16 %v7454_v23, %v7452_v20 }
 0x5b1   :  { %v6211_v27 = vpop.f32.mrf.mxu1  ;;  %v6216_v28 = vpop.f32.mrf.mxu0 }
 0x5b3   :  { %v564_v30 = vpop.f32.mrf.mxu0  ;;  %v612_v31 = vpop.f32.mrf.mxu1 }
 0x5b4   :  { %v613_v33 = vadd.f32 %v612_v31, %v7409_v40 }
 0x5b5   :  { %v6217_v34 = vpop.f32.mrf.mxu0  ;;  %v6222_v35 = vpop.f32.mrf.mxu1 }
 0x5b6   :  { %v668_v36 = vsel %vm350_vm5, %v613_v33, -inf }
 0x5b7   :  { %v662_v37 = vpop.f32.mrf.mxu0  ;;  %669 = vmax.xlane.f32.xlu0 %v668_v36  ;;  %v615_v38 = vpop.f32.mrf.mxu1 }
 0x5b8   :  { %v663_v39 = vadd.f32 %v662_v37, %v7413_v44 }
 0x5b9   :  { %v6223_v41 = vpop.f32.mrf.mxu1  ;;  %v6228_v42 = vpop.f32.mrf.mxu0 }
 0x5ba   :  { %v671_v43 = vsel %vm350_vm5, %v663_v39, -inf }
 0x5bb   :  { %672 = vmax.xlane.f32.xlu1 %v671_v43  ;;  %v665_v45 = vpop.f32.mrf.mxu0 }
 0x5bd   :  { %v6229_v46 = vpop.f32.mrf.mxu0 }
 0x5cc   :  { %692 = vrot.lane.b32.xlu1 %v7388_v29, %s8531_s0 }
 0x5d0   :  { %885 = vrot.lane.b32.xlu1 %v7388_v29, %s7166_s2 }
 0x5d4   :  { %935 = vrot.lane.b32.xlu1 %v7392_v32, %s7166_s2 }
 0x5d8   :  { %933 = vrot.lane.b32.xlu1 %v7392_v32, %s7167_s30 }
 0x640   :  { %v670_v47 = vpop.xlane.xlu0 %669 }
 0x641   :  { %v674_v48 = vsub.f32 %v613_v33, %v670_v47 }
 0x643   :  { %v676_v49 = vmul.f32 1.442695, %v674_v48 }
 0x644   :  { %v673_v50 = vpop.xlane.xlu1 %672 }
 0x645   :  { %6852 = vpow2.f32 %v676_v49  ;;  %v675_v51 = vsub.f32 %v663_v39, %v673_v50 }
 0x647   :  { %v678_v52 = vmul.f32 1.442695, %v675_v51 }
 0x648   :  { %v693_v53 = vpop.permute.xlu1 %692 }
 0x649   :  { %6854 = vpow2.f32 %v678_v52  ;;  %v698_v54 = vsel %vm475_vm8, %v693_v53, 0 }
 0x64a   :  { %6231 = vmatpush3.bf16.msra.mxu1 %v698_v54 }
 0x64b   :  { %6242 = vmatprep.subr.bf16.mxu1 %v7160_v1 }
 0x64c   :  { %v886_v9 = vpop.permute.xlu1 %885 }
 0x64d   :  { %v891_v22 = vsel %vm350_vm5, %v886_v9, 0 }
 0x650   :  { %v936_v10 = vpop.permute.xlu1 %935 }
 0x651   :  { %v941_v11 = vsel %vm350_vm5, %v936_v10, 0 }
 0x652   :  { %v6853_v55 = vpop.eup %6852 }
 0x653   :  { %v680_v56 = vsel %vm350_vm5, %v6853_v55, 0.0 }
 0x654   :  { %681 = vadd.xlane.f32.xlu0 %v680_v56  ;;  %v934_v12 = vpop.permute.xlu1 %933 }
 0x656   :  { %v6855_v57 = vpop.eup %6854 }
 0x657   :  { %v683_v58 = vsel %vm350_vm5, %v6855_v57, 0.0 }
 0x658   :  { %684 = vadd.xlane.f32.xlu0 %v683_v58 }
 0x66e   :  { %740 = vrot.lane.b32.xlu0 %v7392_v32, %s8531_s0 }
 0x672   :  { %883 = vrot.lane.b32.xlu0 %v7388_v29, %s7167_s30 }
 0x6dd   :  { %v682_v59 = vpop.xlane.xlu0 %681 }
 0x6de   :  { %6856 = vrcp.f32 %v682_v59 }
 0x6e1   :  { %v685_v60 = vpop.xlane.xlu0 %684 }
 0x6e2   :  { %6858 = vrcp.f32 %v685_v60 }
 0x6e5   :  { %v741_v61 = vpop.permute.xlu0 %740 }
 0x6e6   :  { %v746_v62 = vsel %vm475_vm8, %v741_v61, 0 }
 0x6e7   :  { %6237 = vmatpush3.bf16.msra.mxu0 %v746_v62 }
 0x6e8   :  { %6248 = vmatprep.subr.bf16.mxu0 %v7160_v1 }
 0x6e9   :  { %v884_v28 = vpop.permute.xlu0 %883 }
 0x6eb   :  { %v6857_v63 = vpop.eup %6856 }
 0x6ec   :  { %v687_v0 = vmul.f32 %v6857_v63, %v6853_v55 }
 0x6ee   :  { %v690_v2 = vpack.c.bf16 %v687_v0, %v687_v0 }
 0x6ef   :  { %v6859_v3 = vpop.eup %6858 }
 0x6f0   :  { %6233 = vmatmul.mubr.msk.bf16.vlgmr.msra.gmra.mxu1 %vm350_vm5, %v690_v2  ;;  %v689_v5 = vmul.f32 %v6859_v3, %v6855_v57 }
 0x6f1   :  { %6244 = vmatprep.mubr.msk.bf16.mxu1 %vm7161_vm0, %v7160_v1  ;;  %6243 = vmatpush3.bf16.msra.mxu1 %v793_v14 }
 0x6f2   :  { %v691_v6 = vpack.c.bf16 %v689_v5, %v689_v5  ;;  %6254 = vmatprep.subr.bf16.mxu1 %v7160_v1 }
 0x6f4   :  { %6239 = vmatmul.mubr.msk.bf16.vlgmr.msra.gmra.mxu0 %vm350_vm5, %v691_v6 }
 0x6f5   :  { %6249 = vmatpush3.bf16.msra.mxu0 %v840_v7  ;;  %6250 = vmatprep.mubr.msk.bf16.mxu0 %vm7161_vm0, %v7160_v1 }
 0x6f6   :  { %6260 = vmatprep.subr.bf16.mxu0 %v7160_v1 }
 0x6fc   :  { %6251 = vmatmul.mubr.msk.bf16.vlgmr.msra.gmra.mxu0 %vm350_vm5, %v567_v24 }
 0x6fd   :  { %6261 = vmatpush3.bf16.xpose.msra.mxu0 %v941_v11  ;;  %6262 = vmatprep.mubr.msk.bf16.mxu0 %vm7161_vm0, %v7160_v1 }
 0x6fe   :  { %6272 = vmatprep.subr.bf16.mxu0 %v7160_v1 }
 0x704   :  { %6263 = vmatmul.mubr.msk.bf16.vlgmr.msra.gmra.mxu0 %vm350_vm5, %v934_v12 }
 0x705   :  { %6274 = vmatprep.mubr.msk.bf16.mxu0 %vm7161_vm0, %v7160_v1 }
 0x7b0   :  { %v734_v15 = vpop.f32.mrf.mxu1 }
 0x7b2   :  { %v6234_v16 = vpop.f32.mrf.mxu1 }
 0x7b4   :  { %v737_v17 = vpop.f32.mrf.mxu1  ;;  %v782_v18 = vpop.f32.mrf.mxu0 }
 0x7b5   :  { %v788_v19 = vpack.c.bf16 %v782_v18, %v734_v15  ;;  %v342_v15 = vld [vmem:[%s8557_s29 + $0x8] sm:$0xf] }
 0x7b6   :  { %v6235_v20 = vpop.f32.mrf.mxu1  ;;  %v6240_v21 = vpop.f32.mrf.mxu0  ;;  %v1108_v16 = vsel %vm475_vm8, %v342_v15, 0 }
 0x7b7   :  { %6245 = vmatmul.mubr.msk.bf16.vlgmr.msra.gmra.mxu1 %vm350_vm5, %v788_v19 }
 0x7b8   :  { %6255 = vmatpush3.bf16.xpose.msra.mxu1 %v891_v22  ;;  %v785_v23 = vpop.f32.mrf.mxu0  ;;  %6256 = vmatprep.mubr.msk.bf16.mxu1 %vm7161_vm0, %v7160_v1 }
 0x7b9   :  { %6266 = vmatprep.subr.bf16.mxu1 %v7160_v1 }
 0x7ba   :  { %v6241_v24 = vpop.f32.mrf.mxu0 }
 0x7bc   :  { %v7512_v27 = vpop.f32.mrf.mxu0 }
 0x7be   :  { %v6252_v30 = vpop.f32.mrf.mxu0 }
 0x7bf   :  { %6257 = vmatmul.mubr.msk.bf16.vlgmr.msra.gmra.mxu1 %vm350_vm5, %v884_v28 }
 0x7c0   :  { %v7515_v31 = vpop.f32.mrf.mxu0  ;;  %6268 = vmatprep.mubr.msk.bf16.mxu1 %vm7161_vm0, %v7160_v1 }
 0x7c2   :  { %v6253_v33 = vpop.f32.mrf.mxu0 }
 0x7c4   :  { %v977_v34 = vpop.f32.mrf.mxu0 }
 0x7c5   :  { %v978_v35 = vadd.f32 %v977_v34, %v7413_v44 }
 0x7c6   :  { %v6264_v36 = vpop.f32.mrf.mxu0 }
 0x7c7   :  { %v986_v37 = vsel %vm350_vm5, %v978_v35, -inf }
 0x7c8   :  { %987 = vmax.xlane.f32.xlu1 %v986_v37  ;;  %v980_v38 = vpop.f32.mrf.mxu0 }
 0x7ca   :  { %v6265_v39 = vpop.f32.mrf.mxu0 }
 0x7d9   :  { %1007 = vrot.lane.b32.xlu1 %v7388_v29, %s8529_s9 }
 0x7dd   :  { %1155 = vrot.lane.b32.xlu1 %v7388_v29, %s8535_s28 }
 0x7e1   :  { %1205 = vrot.lane.b32.xlu1 %v7392_v32, %s8535_s28 }
 0x7e5   :  { %1203 = vrot.lane.b32.xlu1 %v7392_v32, %s8533_s5 }
 0x851   :  { %v988_v41 = vpop.xlane.xlu1 %987 }
 0x852   :  { %v990_v45 = vsub.f32 %v978_v35, %v988_v41 }
 0x854   :  { %v993_v46 = vmul.f32 1.442695, %v990_v45 }
 0x855   :  { %v1008_v42 = vpop.permute.xlu1 %1007 }
 0x856   :  { %v1013_v43 = vsel %vm475_vm8, %v1008_v42, 0  ;;  %6860 = vpow2.f32 %v993_v46 }
 0x857   :  { %6267 = vmatpush3.bf16.msra.mxu1 %v1013_v43 }
 0x858   :  { %6278 = vmatprep.subr.bf16.mxu1 %v7160_v1 }
 0x859   :  { %v1156_v7 = vpop.permute.xlu1 %1155 }
 0x85a   :  { %v1161_v10 = vsel %vm350_vm5, %v1156_v7, 0  ;;  %v343_v7 = vld [vmem:[%s8557_s29 + $0xc] sm:$0xf] }
 0x85d   :  { %v1206_v22 = vpop.permute.xlu1 %1205 }
 0x85e   :  { %v1211_v36 = vsel %vm350_vm5, %v1206_v22, 0 }
 0x861   :  { %v1204_v41 = vpop.permute.xlu1 %1203 }
 0x863   :  { %v6861_v55 = vpop.eup %6860 }
 0x864   :  { %v998_v58 = vsel %vm350_vm5, %v6861_v55, 0.0 }
 0x877   :  { %v7531_v47 = vpop.f32.mrf.mxu1 }
 0x879   :  { %v6246_v48 = vpop.f32.mrf.mxu1 }
 0x87b   :  { %v7533_v49 = vpop.f32.mrf.mxu1 }
 0x87d   :  { %v6247_v50 = vpop.f32.mrf.mxu1 }
 0x87e   :  { %v877_v50 = vadd.f32 %v7512_v27, %v7531_v47 }
 0x87f   :  { %v927_v51 = vpop.f32.mrf.mxu1 }
 0x880   :  { %v928_v52 = vadd.f32 %v927_v51, %v7409_v40 }
 0x881   :  { %v6258_v53 = vpop.f32.mrf.mxu1 }
 0x882   :  { %v983_v54 = vsel %vm350_vm5, %v928_v52, -inf }
 0x883   :  { %984 = vmax.xlane.f32.xlu0 %v983_v54  ;;  %v930_v56 = vpop.f32.mrf.mxu1  ;;  %v880_v54 = vadd.f32 %v7515_v31, %v7533_v49 }
 0x885   :  { %v6259_v57 = vpop.f32.mrf.mxu1 }
 0x887   :  { %999 = vadd.xlane.f32.xlu0 %v998_v58 }
 0x90c   :  { %v985_v59 = vpop.xlane.xlu0 %984 }
 0x90d   :  { %v989_v60 = vsub.f32 %v928_v52, %v985_v59 }
 0x90f   :  { %v991_v61 = vmul.f32 1.442695, %v989_v60 }
 0x910   :  { %v1000_v0 = vpop.xlane.xlu0 %999 }
 0x911   :  { %6862 = vpow2.f32 %v991_v61 }
 0x912   :  { %6864 = vrcp.f32 %v1000_v0 }
 0x91e   :  { %v6863_v62 = vpop.eup %6862 }
 0x91f   :  { %v995_v63 = vsel %vm350_vm5, %v6863_v62, 0.0  ;;  %v6865_v2 = vpop.eup %6864 }
 0x920   :  { %996 = vadd.xlane.f32.xlu0 %v995_v63  ;;  %v1004_v4 = vmul.f32 %v6865_v2, %v6861_v55 }
 0x922   :  { %v1006_v9 = vpack.c.bf16 %v1004_v4, %v1004_v4 }
 0x936   :  { %1055 = vrot.lane.b32.xlu0 %v7392_v32, %s8529_s9  ;;  %s8558_s9 = sld [smem:[#allocation22_spill]] }
 0x93a   :  { %1153 = vrot.lane.b32.xlu0 %v7388_v29, %s8533_s5 }
 0x9a9   :  { %v997_v3 = vpop.xlane.xlu0 %996 }
 0x9aa   :  { %6866 = vrcp.f32 %v997_v3 }
 0x9ad   :  { %v1056_v5 = vpop.permute.xlu0 %1055 }
 0x9ae   :  { %v1061_v6 = vsel %vm475_vm8, %v1056_v5, 0 }
 0x9af   :  { %6273 = vmatpush3.bf16.msra.mxu0 %v1061_v6 }
 0x9b0   :  { %6284 = vmatprep.subr.bf16.mxu0 %v7160_v1 }
 0x9b1   :  { %v1154_v13 = vpop.permute.xlu0 %1153 }
 0x9b2   :  { %6275 = vmatmul.mubr.msk.bf16.vlgmr.msra.gmra.mxu0 %vm350_vm5, %v1006_v9  ;;  %v1378_v9 = vsel %vm475_vm8, %v343_v7, 0 }
 0x9b3   :  { %6285 = vmatpush3.bf16.xpose.msra.mxu0 %v1161_v10  ;;  %6286 = vmatprep.mubr.msk.bf16.mxu0 %vm7161_vm0, %v7160_v1 }
 0x9b4   :  { %6296 = vmatprep.subr.bf16.mxu0 %v7160_v1 }
 0x9b7   :  { %v6867_v11 = vpop.eup %6866 }
 0x9b8   :  { %v1002_v12 = vmul.f32 %v6867_v11, %v6863_v62 }
 0x9ba   :  { %6287 = vmatmul.mubr.msk.bf16.vlgmr.msra.gmra.mxu0 %vm350_vm5, %v1154_v13  ;;  %v1005_v14 = vpack.c.bf16 %v1002_v12, %v1002_v12 }
 0x9bb   :  { %6298 = vmatprep.mubr.msk.bf16.mxu0 %vm7161_vm0, %v7160_v1 }
 0x9bc   :  { %6269 = vmatmul.mubr.msk.bf16.vlgmr.msra.gmra.mxu1 %vm350_vm5, %v1005_v14 }
 0x9bd   :  { %6280 = vmatprep.mubr.msk.bf16.mxu1 %vm7161_vm0, %v7160_v1  ;;  %6279 = vmatpush3.bf16.msra.mxu1 %v1108_v16 }
 0x9be   :  { %6290 = vmatprep.subr.bf16.mxu1 %v7160_v1 }
 0xa72   :  { %v1097_v17 = vpop.f32.mrf.mxu0 }
 0xa74   :  { %v6276_v18 = vpop.f32.mrf.mxu0 }
 0xa76   :  { %v1100_v19 = vpop.f32.mrf.mxu0 }
 0xa78   :  { %v6277_v20 = vpop.f32.mrf.mxu0 }
 0xa7a   :  { %v1197_v21 = vpop.f32.mrf.mxu0 }
 0xa7b   :  { %v1198_v23 = vadd.f32 %v1197_v21, %v7409_v40 }
 0xa7c   :  { %v1049_v24 = vpop.f32.mrf.mxu1  ;;  %v6288_v28 = vpop.f32.mrf.mxu0 }
 0xa7d   :  { %v1103_v30 = vpack.c.bf16 %v1097_v17, %v1049_v24  ;;  %v1253_v33 = vsel %vm350_vm5, %v1198_v23, -inf  ;;  %v5795_v24 = vld [vmem:[#allocation8] ss:$0 sm:$0xff] }
 0xa7e   :  { %1254 = vmax.xlane.f32.xlu0 %v1253_v33  ;;  %v6270_v34 = vpop.f32.mrf.mxu1  ;;  %v1200_v35 = vpop.f32.mrf.mxu0 }
 0xa7f   :  { %6281 = vmatmul.mubr.msk.bf16.vlgmr.msra.gmra.mxu1 %vm350_vm5, %v1103_v30 }
 0xa80   :  { %6291 = vmatpush3.bf16.xpose.msra.mxu1 %v1211_v36  ;;  %v1052_v37 = vpop.f32.mrf.mxu1  ;;  %v6289_v38 = vpop.f32.mrf.mxu0  ;;  %6292 = vmatprep.mubr.msk.bf16.mxu1 %vm7161_vm0, %v7160_v1 }
 0xa81   :  { %6302 = vmatprep.subr.bf16.mxu1 %v7160_v1 }
 0xa82   :  { %v6271_v39 = vpop.f32.mrf.mxu1 }
 0xa87   :  { %6293 = vmatmul.mubr.msk.bf16.vlgmr.msra.gmra.mxu1 %vm350_vm5, %v1204_v41 }
 0xa88   :  { %6304 = vmatprep.mubr.msk.bf16.mxu1 %vm7161_vm0, %v7160_v1 }
 0xb07   :  { %v1255_v42 = vpop.xlane.xlu0 %1254 }
 0xb08   :  { %v1259_v43 = vsub.f32 %v1198_v23, %v1255_v42 }
 0xb0a   :  { %v1261_v45 = vmul.f32 1.442695, %v1259_v43 }
 0xb0c   :  { %6868 = vpow2.f32 %v1261_v45 }
 0xb19   :  { %v6869_v46 = vpop.eup %6868 }
 0xb1a   :  { %v1265_v48 = vsel %vm350_vm5, %v6869_v46, 0.0 }
 0xb1b   :  { %1266 = vadd.xlane.f32.xlu0 %v1265_v48 }
 0xb3f   :  { %v1144_v51 = vpop.f32.mrf.mxu1 }
 0xb40   :  { %v1151_v52 = vadd.f32 %v1144_v51, %v877_v50 }
 0xb41   :  { %v6282_v53 = vpop.f32.mrf.mxu1 }
 0xb43   :  { %v1147_v55 = vpop.f32.mrf.mxu1 }
 0xb44   :  { %v1152_v56 = vadd.f32 %v1147_v55, %v880_v54 }
 0xb45   :  { %v6283_v57 = vpop.f32.mrf.mxu1 }
 0xb46   :  { %v6813_v57 = vld [vmem:[#allocation5] sm:$0xff]  }
 0xb47   :  { %v1247_v58 = vpop.f32.mrf.mxu1 }
 0xb48   :  { %v1248_v59 = vadd.f32 %v1247_v58, %v7413_v44  ;;  %v6814_v58 = vld [vmem:[%s8501_s11 + $0x8] sm:$0xff]  }
 0xb49   :  { %v6294_v60 = vpop.f32.mrf.mxu1 }
 0xb4a   :  { %v1256_v61 = vsel %vm350_vm5, %v1248_v59, -inf }
 0xb4b   :  { %1257 = vmax.xlane.f32.xlu1 %v1256_v61  ;;  %v1250_v62 = vpop.f32.mrf.mxu1 }
 0xb4d   :  { %v6295_v63 = vpop.f32.mrf.mxu1 }
 0xb5c   :  { %1277 = vrot.lane.b32.xlu1 %v7388_v29, %s8527_s7 }
 0xba4   :  { %v1267_v27 = vpop.xlane.xlu0 %1266 }
 0xba5   :  { %6870 = vrcp.f32 %v1267_v27 }
 0xbb2   :  { %v6871_v47 = vpop.eup %6870 }
 0xbb3   :  { %v1272_v2 = vmul.f32 %v6871_v47, %v6869_v46 }
 0xbb5   :  { %v1275_v5 = vpack.c.bf16 %v1272_v2, %v1272_v2 }
 0xbd4   :  { %v1258_v31 = vpop.xlane.xlu1 %1257 }
 0xbd5   :  { %v1260_v49 = vsub.f32 %v1248_v59, %v1258_v31  ;;  %v6815_v59 = vld [vmem:[%s8501_s11] sm:$0xff]  }
 0xbd7   :  { %v1263_v0 = vmul.f32 1.442695, %v1260_v49 }
 0xbd8   :  { %v1278_v3 = vpop.permute.xlu1 %1277 }
 0xbd9   :  { %6872 = vpow2.f32 %v1263_v0  ;;  %v1283_v4 = vsel %vm475_vm8, %v1278_v3, 0  ;;  %v5796_v0 = vld [vmem:[#allocation10] ss:$0 sm:$0xff] }
 0xbda   :  { %6297 = vmatpush3.bf16.msra.mxu0 %v1283_v4 }
 0xbdb   :  { %6308 = vmatprep.subr.bf16.mxu0 %v7160_v1 }
 0xbdd   :  { %6299 = vmatmul.mubr.msk.bf16.vlgmr.msra.gmra.mxu0 %vm350_vm5, %v1275_v5  ;;  %v5797_v5 = vld [vmem:[#allocation11] ss:$0 sm:$0xff] }
 0xbde   :  { %6310 = vmatprep.mubr.msk.bf16.mxu0 %vm7161_vm0, %v7160_v1  ;;  %6309 = vmatpush3.bf16.msra.mxu0 %v1378_v9 }
 0xbdf   :  { %6322 = vmatprep.subr.bf16.mxu0 %v7160_v1 }
 0xbe6   :  { %v6873_v29 = vpop.eup %6872 }
 0xbe7   :  { %v1268_v6 = vsel %vm350_vm5, %v6873_v29, 0.0 }
 0xbe8   :  { %1269 = vadd.xlane.f32.xlu0 %v1268_v6 }
 0xbfe   :  { %1325 = vrot.lane.b32.xlu0 %v7392_v32, %s8527_s7  ;;  %s8561_s7 = smov 72  }
 0xc71   :  { %v1270_v10 = vpop.xlane.xlu0 %1269 }
 0xc72   :  { %6874 = vrcp.f32 %v1270_v10 }
 0xc75   :  { %v1326_v11 = vpop.permute.xlu0 %1325 }
 0xc76   :  { %v1331_v12 = vsel %vm475_vm8, %v1326_v11, 0 }
 0xc77   :  { %6303 = vmatpush3.bf16.msra.mxu1 %v1331_v12 }
 0xc78   :  { %6314 = vmatprep.subr.bf16.mxu1 %v7160_v1 }
 0xc7f   :  { %v6875_v13 = vpop.eup %6874 }
 0xc80   :  { %v1274_v14 = vmul.f32 %v6875_v13, %v6873_v29 }
 0xc82   :  { %v1276_v32 = vpack.c.bf16 %v1274_v14, %v1274_v14 }
 0xc84   :  { %6305 = vmatmul.mubr.msk.bf16.vlgmr.msra.gmra.mxu1 %vm350_vm5, %v1276_v32 }
 0xc85   :  { %6318 = vmatprep.mubr.msk.bf16.mxu1 %vm7161_vm0, %v7160_v1  ;;  %6315 = vmatpush3.bf16.msra.mxu1 %v6814_v58 }
 0xc86   :  { %6316 = vmatprep.subr.bf16.mxu1 %v7160_v1 }
 0xc89   :  { %6317 = vmatpush3.bf16.msra.mxu1 %v6815_v59 }
 0xc8a   :  { %6330 = vmatprep.subr.bf16.mxu1 %v7160_v1 }
 0xc9d   :  { %v1319_v15 = vpop.f32.mrf.mxu0 }
 0xc9f   :  { %v6300_v16 = vpop.f32.mrf.mxu0 }
 0xca1   :  { %v1322_v17 = vpop.f32.mrf.mxu0 }
 0xca3   :  { %v6301_v18 = vpop.f32.mrf.mxu0 }
 0xd44   :  { %v1367_v19 = vpop.f32.mrf.mxu1 }
 0xd45   :  { %v1373_v20 = vpack.c.bf16 %v1367_v19, %v1319_v15 }
 0xd46   :  { %v6306_v21 = vpop.f32.mrf.mxu1 }
 0xd47   :  { %6311 = vmatmul.mubr.msk.bf16.vlgmr.msra.gmra.mxu0 %vm350_vm5, %v1373_v20 }
 0xd48   :  { %v1370_v22 = vpop.f32.mrf.mxu1  ;;  %6326 = vmatprep.mubr.msk.bf16.mxu0 %vm7161_vm0, %v7160_v1 }
 0xd4a   :  { %v6307_v23 = vpop.f32.mrf.mxu1 }
 0xd4b   :  { %v272_v23 = vld [vmem:[%s8558_s9] sm:$0x1] }
 0xd4c   :  { %vm274_vm9 = vcmp.eq.f32.partialorder %v272_v23, 0.0 }
 0xe07   :  { %v1414_v28 = vpop.f32.mrf.mxu0 }
 0xe08   :  { %v1421_v30 = vadd.f32 %v1414_v28, %v1151_v52  ;;  %v273_v28 = vld [vmem:[%s8558_s9 + $0x1] sm:$0x1]  ;;  %s8560_s9 = smov 48  }
 0xe09   :  { %v6312_v33 = vpop.f32.mrf.mxu0  ;;  %vm275_vm10 = vcmp.eq.f32.partialorder %v273_v28, 0.0 }
 0xe0a   :  { %v1429_v34 = vadd.f32 %v5795_v24, %v1421_v30  ;;  %v276_v33 = vsel %vm274_vm9, -1e+20, %v7160_v1 }
 0xe0b   :  { %v1417_v35 = vpop.f32.mrf.mxu0 }
 0xe0c   :  { %v1422_v36 = vadd.f32 %v1417_v35, %v1152_v56  ;;  %v1431_v37 = vadd.f32 %v1429_v34, %v7379_v25  ;;  %v6812_v56 = vld [vmem:[%s8502_s12] sm:$0xff]   ;;  %v277_v35 = vsel %vm275_vm10, -1e+20, %v7160_v1 }
 0xe0d   :  { %v6313_v38 = vpop.f32.mrf.mxu0 }
 0xe0e   :  { %v1430_v39 = vadd.f32 %v5795_v24, %v1422_v36  ;;  %v1435_v41 = vsel %vm295_vm4, %v1431_v37, 0.0  ;;  %v1616_v24 = vshrl.u32 %v166_v8, 7 }
 0xe0f   :  { %1436 = vadd.xlane.f32.xlu1 %v1435_v41 }
 0xe10   :  { %v1432_v42 = vadd.f32 %v1430_v39, %v7381_v26  ;;  %v6811_v26 = vld [vmem:[%s8502_s12 + $0x8] sm:$0xff]   ;;  %v1617_v30 = vsub.s32 0, %v1616_v24 }
 0xe11   :  { %6323 = vmatpush3.bf16.msra.mxu0 %v6811_v26 }
 0xe12   :  { %v1438_v43 = vsel %vm295_vm4, %v1432_v42, 0.0  ;;  %6324 = vmatprep.subr.bf16.mxu0 %v7160_v1  ;;  %v7665_v34 = vrot.slane %v276_v33, %v1617_v30 }
 0xe13   :  { %1439 = vadd.xlane.f32.xlu0 %v1438_v43 }
 0xe15   :  { %6325 = vmatpush3.bf16.msra.mxu0 %v6812_v56 }
 0xe16   :  { %6336 = vmatprep.subr.bf16.mxu0 %v7160_v1 }
 0xe18   :  { %6327 = vmatmul.mubr.msk.bf16.vlgmr.msra.gmra.mxu0 %vm295_vm4, %v6813_v57 }
 0xe19   :  { %6338 = vmatprep.mubr.msk.bf16.mxu0 %vm7161_vm0, %v7160_v1 }
 0xe98   :  { %v1437_v45 = vpop.xlane.xlu1 %1436 }
 0xe99   :  { %v1442_v46 = vmul.f32 0.03125, %v1437_v45 }
 0xe9b   :  { %v1444_v48 = vsub.f32 %v1431_v37, %v1442_v46  ;;  %v7668_v37 = vrot.slane %v277_v35, %v1617_v30 }
 0xe9c   :  { %v1440_v50 = vpop.xlane.xlu0 %1439 }
 0xe9d   :  { %v1443_v51 = vmul.f32 0.03125, %v1440_v50  ;;  %v1446_v52 = vmul.f32 %v1444_v48, %v1444_v48 }
 0xe9f   :  { %v1445_v53 = vsub.f32 %v1432_v42, %v1443_v51  ;;  %v1448_v54 = vsel %vm295_vm4, %v1446_v52, 0.0 }
 0xea0   :  { %1449 = vadd.xlane.f32.xlu1 %v1448_v54 }
 0xea1   :  { %v1447_v25 = vmul.f32 %v1445_v53, %v1445_v53 }
 0xea3   :  { %v1451_v55 = vsel %vm295_vm4, %v1447_v25, 0.0 }
 0xea4   :  { %1452 = vadd.xlane.f32.xlu0 %v1451_v55 }
 0xed8   :  { %v1597_v10 = vpop.f32.mrf.mxu0 }
 0xed9   :  { %v7635_v11 = vpack.c.bf16 %v1597_v10, %v1597_v10 }
 0xeda   :  { %v6328_v12 = vpop.f32.mrf.mxu0 }
 0xedb   :  { %v1629_v13 = vsel %vm350_vm5, %v7635_v11, 0 }
 0xedc   :  { %v1600_v14 = vpop.f32.mrf.mxu0 }
 0xedd   :  { %v7639_v32 = vpack.c.bf16 %v1600_v14, %v1600_v14 }
 0xede   :  { %v6329_v15 = vpop.f32.mrf.mxu0 }
 0xedf   :  { %v1675_v16 = vsel %vm350_vm5, %v7639_v32, 0 }
 0xee0   :  { %6337 = vmatpush3.bf16.xpose.msra.mxu0 %v1675_v16 }
 0xee1   :  { %6348 = vmatprep.subr.bf16.mxu0 %v7160_v1 }
 0xf29   :  { %v1450_v60 = vpop.xlane.xlu1 %1449 }
 0xf2a   :  { %v1454_v61 = vmul.f32 0.03125, %v1450_v60 }
 0xf2c   :  { %v1456_v62 = vadd.f32 1e-05, %v1454_v61 }
 0xf2d   :  { %v1453_v63 = vpop.xlane.xlu0 %1452 }
 0xf2e   :  { %6876 = vrsqrt.f32 %v1456_v62  ;;  %v1455_v27 = vmul.f32 0.03125, %v1453_v63 }
 0xf30   :  { %v1457_v47 = vadd.f32 1e-05, %v1455_v27 }
 0xf32   :  { %6878 = vrsqrt.f32 %v1457_v47 }
 0xf3b   :  { %v6877_v31 = vpop.eup %6876 }
 0xf3c   :  { %v1460_v49 = vmul.f32 %v6877_v31, %v1444_v48 }
 0xf3e   :  { %v1468_v4 = vmul.f32 %v5796_v0, %v1460_v49 }
 0xf3f   :  { %v6879_v2 = vpop.eup %6878 }
 0xf40   :  { %v1461_v3 = vmul.f32 %v6879_v2, %v1445_v53  ;;  %v7626_v6 = vadd.f32 %v5797_v5, %v1468_v4 }
 0xf42   :  { %v1469_v29 = vmul.f32 %v5796_v0, %v1461_v3 }
 0xf44   :  { %v7628_v7 = vadd.f32 %v5797_v5, %v1469_v29 }
 0xf46   :  { %v1478_v9 = vpack.c.bf16 %v7628_v7, %v7626_v6 }
 0xf48   :  { %6319 = vmatmul.mubr.msk.bf16.vlgmr.msra.gmra.mxu1 %vm295_vm4, %v1478_v9 }
 0xf49   :  { %6332 = vmatprep.mubr.msk.bf16.mxu1 %vm7161_vm0, %v7160_v1  ;;  %6331 = vmatpush3.bf16.xpose.msra.mxu1 %v1629_v13 }
 0xf4a   :  { %6342 = vmatprep.subr.bf16.mxu1 %v7160_v1 }
0x1008   :  { %v1532_v17 = vpop.f32.mrf.mxu1 }
0x1009   :  { %v7645_v18 = vpack.c.bf16 %v1532_v17, %v1532_v17 }
0x100a   :  { %v6320_v19 = vpop.f32.mrf.mxu1 }
0x100b   :  { %6333 = vmatmul.mubr.msk.bf16.vlgmr.msra.gmra.mxu1 %vm350_vm5, %v7645_v18 }
0x100c   :  { %v1535_v20 = vpop.f32.mrf.mxu1  ;;  %6344 = vmatprep.mubr.msk.bf16.mxu1 %vm7161_vm0, %v7160_v1 }
0x100d   :  { %v7651_v21 = vpack.c.bf16 %v1535_v20, %v1535_v20 }
0x100e   :  { %v6321_v22 = vpop.f32.mrf.mxu1 }
0x100f   :  { %6339 = vmatmul.mubr.msk.bf16.vlgmr.msra.gmra.mxu0 %vm350_vm5, %v7651_v21 }
0x1010   :  { %6350 = vmatprep.mubr.msk.bf16.mxu0 %vm7161_vm0, %v7160_v1 }
0x10cb   :  { %v1665_v36 = vpop.f32.mrf.mxu1 }
0x10cc   :  { %v1666_v38 = vadd.f32 %v1665_v36, %v7665_v34 }
0x10cd   :  { %v6334_v39 = vpop.f32.mrf.mxu1 }
0x10ce   :  { %v1717_v8 = vsel %vm350_vm5, %v1666_v38, -inf }
0x10cf   :  { %v1711_v41 = vpop.f32.mrf.mxu0  ;;  %1718 = vmax.xlane.f32.xlu1 %v1717_v8  ;;  %v1668_v42 = vpop.f32.mrf.mxu1 }
0x10d0   :  { %v1712_v43 = vadd.f32 %v1711_v41, %v7668_v37 }
0x10d1   :  { %v6335_v45 = vpop.f32.mrf.mxu1  ;;  %v6340_v46 = vpop.f32.mrf.mxu0 }
0x10d2   :  { %v1720_v48 = vsel %vm350_vm5, %v1712_v43, -inf }
0x10d3   :  { %1721 = vmax.xlane.f32.xlu0 %v1720_v48  ;;  %v1714_v50 = vpop.f32.mrf.mxu0 }
0x10d5   :  { %v6341_v51 = vpop.f32.mrf.mxu0 }
0x10e0   :  { %1742 = vrot.lane.b32.xlu1 %v7635_v11, %s7162_s1 }
0x1158   :  { %v1719_v52 = vpop.xlane.xlu1 %1718 }
0x1159   :  { %v1723_v53 = vsub.f32 %v1666_v38, %v1719_v52 }
0x115b   :  { %v1725_v54 = vmul.f32 1.442695, %v1723_v53 }
0x115c   :  { %v1722_v25 = vpop.xlane.xlu0 %1721  ;;  %v1743_v55 = vpop.permute.xlu1 %1742 }
0x115d   :  { %6880 = vpow2.f32 %v1725_v54  ;;  %v1724_v26 = vsub.f32 %v1712_v43, %v1722_v25  ;;  %v1748_v56 = vsel %vm475_vm8, %v1743_v55, 0 }
0x115e   :  { %6343 = vmatpush3.bf16.msra.mxu1 %v1748_v56 }
0x115f   :  { %v1727_v57 = vmul.f32 1.442695, %v1724_v26  ;;  %6354 = vmatprep.subr.bf16.mxu1 %v7160_v1 }
0x1161   :  { %6882 = vpow2.f32 %v1727_v57 }
0x116a   :  { %v6881_v58 = vpop.eup %6880 }
0x116b   :  { %v1729_v59 = vsel %vm350_vm5, %v6881_v58, 0.0 }
0x116c   :  { %1730 = vadd.xlane.f32.xlu1 %v1729_v59 }
0x116e   :  { %v6883_v60 = vpop.eup %6882 }
0x116f   :  { %v1732_v61 = vsel %vm350_vm5, %v6883_v60, 0.0 }
0x1170   :  { %1733 = vadd.xlane.f32.xlu0 %v1732_v61 }
0x117d   :  { %1843 = vrot.lane.b32.xlu1 %v7635_v11, %s7164_s27 }
0x1181   :  { %1894 = vrot.lane.b32.xlu1 %v7639_v32, %s7164_s27 }
0x1185   :  { %1892 = vrot.lane.b32.xlu1 %v7651_v21, %s7164_s27 }
0x1186   :  { %1791 = vrot.lane.b32.xlu0 %v7639_v32, %s7162_s1 }
0x118a   :  { %1841 = vrot.lane.b32.xlu0 %v7645_v18, %s7164_s27 }
0x11f5   :  { %v1731_v62 = vpop.xlane.xlu1 %1730 }
0x11f6   :  { %6884 = vrcp.f32 %v1731_v62 }
0x11f9   :  { %v1734_v63 = vpop.xlane.xlu0 %1733  ;;  %v1844_v49 = vpop.permute.xlu1 %1843 }
0x11fa   :  { %6886 = vrcp.f32 %v1734_v63  ;;  %v1849_v4 = vsel %vm350_vm5, %v1844_v49, 0 }
0x11fd   :  { %v1792_v27 = vpop.permute.xlu0 %1791  ;;  %v1895_v29 = vpop.permute.xlu1 %1894 }
0x11fe   :  { %v1797_v47 = vsel %vm475_vm8, %v1792_v27, 0  ;;  %v1900_v10 = vsel %vm350_vm5, %v1895_v29, 0 }
0x11ff   :  { %6349 = vmatpush3.bf16.msra.mxu0 %v1797_v47 }
0x1200   :  { %6360 = vmatprep.subr.bf16.mxu0 %v7160_v1 }
0x1201   :  { %v1842_v12 = vpop.permute.xlu0 %1841  ;;  %v1893_v13 = vpop.permute.xlu1 %1892 }
0x1203   :  { %v6885_v31 = vpop.eup %6884 }
0x1204   :  { %v1736_v0 = vmul.f32 %v6885_v31, %v6881_v58  ;;  %v1604_v31 = vld [vmem:[%s8503_s13] sm:$0xf] }
0x1206   :  { %v1739_v2 = vpack.c.bf16 %v1736_v0, %v1736_v0 }
0x1207   :  { %v6887_v3 = vpop.eup %6886 }
0x1208   :  { %6345 = vmatmul.mubr.msk.bf16.vlgmr.msra.gmra.mxu1 %vm350_vm5, %v1739_v2  ;;  %v1738_v5 = vmul.f32 %v6887_v3, %v6883_v60  ;;  %v2114_v2 = vsel %vm475_vm8, %v1604_v31, 0 }
0x1209   :  { %6355 = vmatpush3.bf16.xpose.msra.mxu1 %v1849_v4  ;;  %6356 = vmatprep.mubr.msk.bf16.mxu1 %vm7161_vm0, %v7160_v1 }
0x120a   :  { %v1740_v9 = vpack.c.bf16 %v1738_v5, %v1738_v5  ;;  %6366 = vmatprep.subr.bf16.mxu1 %v7160_v1 }
0x120c   :  { %6351 = vmatmul.mubr.msk.bf16.vlgmr.msra.gmra.mxu0 %vm350_vm5, %v1740_v9  ;;  %v1605_v9 = vld [vmem:[%s8503_s13 + $0x4] sm:$0xf] }
0x120d   :  { %6361 = vmatpush3.bf16.xpose.msra.mxu0 %v1900_v10  ;;  %6362 = vmatprep.mubr.msk.bf16.mxu0 %vm7161_vm0, %v7160_v1  ;;  %v2067_v10 = vsel %vm475_vm8, %v1605_v9, 0 }
0x120e   :  { %6372 = vmatprep.subr.bf16.mxu0 %v7160_v1 }
0x1210   :  { %6357 = vmatmul.mubr.msk.bf16.vlgmr.msra.gmra.mxu1 %vm350_vm5, %v1842_v12 }
0x1211   :  { %6368 = vmatprep.mubr.msk.bf16.mxu1 %vm7161_vm0, %v7160_v1 }
0x1214   :  { %6363 = vmatmul.mubr.msk.bf16.vlgmr.msra.gmra.mxu0 %vm350_vm5, %v1893_v13 }
0x1215   :  { %6374 = vmatprep.mubr.msk.bf16.mxu0 %vm7161_vm0, %v7160_v1 }
0x12c8   :  { %v7708_v14 = vpop.f32.mrf.mxu1 }
0x12ca   :  { %v6346_v15 = vpop.f32.mrf.mxu1 }
0x12cc   :  { %v1787_v16 = vpop.f32.mrf.mxu1  ;;  %v7710_v17 = vpop.f32.mrf.mxu0 }
0x12cd   :  { %v1839_v19 = vpack.c.bf16 %v7710_v17, %v7708_v14 }
0x12ce   :  { %v6347_v20 = vpop.f32.mrf.mxu1  ;;  %v6352_v22 = vpop.f32.mrf.mxu0 }
0x12d0   :  { %v1836_v23 = vpop.f32.mrf.mxu0  ;;  %v1885_v24 = vpop.f32.mrf.mxu1 }
0x12d1   :  { %v1886_v28 = vadd.f32 %v1885_v24, %v7665_v34 }
0x12d2   :  { %v6353_v30 = vpop.f32.mrf.mxu0  ;;  %v6358_v33 = vpop.f32.mrf.mxu1 }
0x12d3   :  { %v1942_v35 = vsel %vm350_vm5, %v1886_v28, -inf }
0x12d4   :  { %v1936_v36 = vpop.f32.mrf.mxu0  ;;  %1943 = vmax.xlane.f32.xlu0 %v1942_v35  ;;  %v1888_v38 = vpop.f32.mrf.mxu1 }
0x12d5   :  { %v1937_v39 = vadd.f32 %v1936_v36, %v7668_v37 }
0x12d6   :  { %v6359_v8 = vpop.f32.mrf.mxu1  ;;  %v6364_v41 = vpop.f32.mrf.mxu0 }
0x12d7   :  { %v1945_v42 = vsel %vm350_vm5, %v1937_v39, -inf }
0x12d8   :  { %1946 = vmax.xlane.f32.xlu1 %v1945_v42  ;;  %v1939_v43 = vpop.f32.mrf.mxu0 }
0x12da   :  { %v6365_v45 = vpop.f32.mrf.mxu0 }
0x12e9   :  { %1966 = vrot.lane.b32.xlu1 %v7635_v11, %s7163_s4 }
0x12ed   :  { %2159 = vrot.lane.b32.xlu1 %v7635_v11, %s7167_s30 }
0x12f1   :  { %2209 = vrot.lane.b32.xlu1 %v7639_v32, %s7167_s30 }
0x12f5   :  { %2207 = vrot.lane.b32.xlu1 %v7651_v21, %s7167_s30 }
0x135d   :  { %v1944_v46 = vpop.xlane.xlu0 %1943 }
0x135e   :  { %v1948_v48 = vsub.f32 %v1886_v28, %v1944_v46 }
0x1360   :  { %v1950_v50 = vmul.f32 1.442695, %v1948_v48 }
0x1361   :  { %v1947_v51 = vpop.xlane.xlu1 %1946 }
0x1362   :  { %6888 = vpow2.f32 %v1950_v50  ;;  %v1949_v52 = vsub.f32 %v1937_v39, %v1947_v51 }
0x1364   :  { %v1952_v53 = vmul.f32 1.442695, %v1949_v52 }
0x1365   :  { %v1967_v54 = vpop.permute.xlu1 %1966 }
0x1366   :  { %6890 = vpow2.f32 %v1952_v53  ;;  %v1972_v25 = vsel %vm475_vm8, %v1967_v54, 0 }
0x1367   :  { %6367 = vmatpush3.bf16.msra.mxu1 %v1972_v25 }
0x1368   :  { %6378 = vmatprep.subr.bf16.mxu1 %v7160_v1 }
0x1369   :  { %v2160_v3 = vpop.permute.xlu1 %2159 }
0x136a   :  { %v2165_v20 = vsel %vm350_vm5, %v2160_v3, 0 }
0x136d   :  { %v2210_v4 = vpop.permute.xlu1 %2209 }
0x136e   :  { %v2215_v5 = vsel %vm350_vm5, %v2210_v4, 0 }
0x136f   :  { %v6889_v55 = vpop.eup %6888 }
0x1370   :  { %v1954_v26 = vsel %vm350_vm5, %v6889_v55, 0.0 }
0x1371   :  { %1955 = vadd.xlane.f32.xlu0 %v1954_v26  ;;  %v2208_v29 = vpop.permute.xlu1 %2207 }
0x1373   :  { %v6891_v56 = vpop.eup %6890 }
0x1374   :  { %v1957_v57 = vsel %vm350_vm5, %v6891_v56, 0.0 }
0x1375   :  { %1958 = vadd.xlane.f32.xlu0 %v1957_v57 }
0x138b   :  { %2014 = vrot.lane.b32.xlu0 %v7639_v32, %s7163_s4 }
0x138f   :  { %2157 = vrot.lane.b32.xlu0 %v7645_v18, %s7167_s30 }
0x13fa   :  { %v1956_v58 = vpop.xlane.xlu0 %1955 }
0x13fb   :  { %6892 = vrcp.f32 %v1956_v58 }
0x13fe   :  { %v1959_v59 = vpop.xlane.xlu0 %1958 }
0x13ff   :  { %6894 = vrcp.f32 %v1959_v59 }
0x1402   :  { %v2015_v60 = vpop.permute.xlu0 %2014 }
0x1403   :  { %v2020_v61 = vsel %vm475_vm8, %v2015_v60, 0 }
0x1404   :  { %6373 = vmatpush3.bf16.msra.mxu0 %v2020_v61 }
0x1405   :  { %6384 = vmatprep.subr.bf16.mxu0 %v7160_v1 }
0x1406   :  { %v2158_v28 = vpop.permute.xlu0 %2157 }
0x1408   :  { %v6893_v62 = vpop.eup %6892 }
0x1409   :  { %v1961_v63 = vmul.f32 %v6893_v62, %v6889_v55 }
0x140b   :  { %v1964_v27 = vpack.c.bf16 %v1961_v63, %v1961_v63 }
0x140c   :  { %v6895_v47 = vpop.eup %6894 }
0x140d   :  { %6369 = vmatmul.mubr.msk.bf16.vlgmr.msra.gmra.mxu1 %vm350_vm5, %v1964_v27  ;;  %v1963_v49 = vmul.f32 %v6895_v47, %v6891_v56 }
0x140e   :  { %6380 = vmatprep.mubr.msk.bf16.mxu1 %vm7161_vm0, %v7160_v1  ;;  %6379 = vmatpush3.bf16.msra.mxu1 %v2067_v10 }
0x140f   :  { %v1965_v0 = vpack.c.bf16 %v1963_v49, %v1963_v49  ;;  %6390 = vmatprep.subr.bf16.mxu1 %v7160_v1 }
0x1411   :  { %6375 = vmatmul.mubr.msk.bf16.vlgmr.msra.gmra.mxu0 %vm350_vm5, %v1965_v0 }
0x1412   :  { %6385 = vmatpush3.bf16.msra.mxu0 %v2114_v2  ;;  %6386 = vmatprep.mubr.msk.bf16.mxu0 %vm7161_vm0, %v7160_v1 }
0x1413   :  { %6396 = vmatprep.subr.bf16.mxu0 %v7160_v1 }
0x1419   :  { %6387 = vmatmul.mubr.msk.bf16.vlgmr.msra.gmra.mxu0 %vm350_vm5, %v1839_v19 }
0x141a   :  { %6397 = vmatpush3.bf16.xpose.msra.mxu0 %v2215_v5  ;;  %6398 = vmatprep.mubr.msk.bf16.mxu0 %vm7161_vm0, %v7160_v1 }
0x141b   :  { %6408 = vmatprep.subr.bf16.mxu0 %v7160_v1 }
0x1421   :  { %6399 = vmatmul.mubr.msk.bf16.vlgmr.msra.gmra.mxu0 %vm350_vm5, %v2208_v29 }
0x1422   :  { %6410 = vmatprep.mubr.msk.bf16.mxu0 %vm7161_vm0, %v7160_v1 }
0x14cd   :  { %v2008_v12 = vpop.f32.mrf.mxu1 }
0x14cf   :  { %v6370_v13 = vpop.f32.mrf.mxu1 }
0x14d0   :  { %v1606_v13 = vld [vmem:[%s8503_s13 + $0x8] sm:$0xf] }
0x14d1   :  { %v2011_v14 = vpop.f32.mrf.mxu1  ;;  %v2056_v15 = vpop.f32.mrf.mxu0 }
0x14d2   :  { %v2062_v16 = vpack.c.bf16 %v2056_v15, %v2008_v12  ;;  %v2382_v14 = vsel %vm475_vm8, %v1606_v13, 0 }
0x14d3   :  { %v6371_v17 = vpop.f32.mrf.mxu1  ;;  %v6376_v19 = vpop.f32.mrf.mxu0 }
0x14d4   :  { %6381 = vmatmul.mubr.msk.bf16.vlgmr.msra.gmra.mxu1 %vm350_vm5, %v2062_v16 }
0x14d5   :  { %6391 = vmatpush3.bf16.xpose.msra.mxu1 %v2165_v20  ;;  %v2059_v22 = vpop.f32.mrf.mxu0  ;;  %6392 = vmatprep.mubr.msk.bf16.mxu1 %vm7161_vm0, %v7160_v1 }
0x14d6   :  { %6402 = vmatprep.subr.bf16.mxu1 %v7160_v1 }
0x14d7   :  { %v6377_v23 = vpop.f32.mrf.mxu0 }
0x14d9   :  { %v7768_v24 = vpop.f32.mrf.mxu0 }
0x14db   :  { %v6388_v30 = vpop.f32.mrf.mxu0 }
0x14dc   :  { %6393 = vmatmul.mubr.msk.bf16.vlgmr.msra.gmra.mxu1 %vm350_vm5, %v2158_v28 }
0x14dd   :  { %v7771_v33 = vpop.f32.mrf.mxu0  ;;  %6404 = vmatprep.mubr.msk.bf16.mxu1 %vm7161_vm0, %v7160_v1 }
0x14df   :  { %v6389_v35 = vpop.f32.mrf.mxu0 }
0x14e1   :  { %v2251_v36 = vpop.f32.mrf.mxu0 }
0x14e2   :  { %v2252_v38 = vadd.f32 %v2251_v36, %v7668_v37 }
0x14e3   :  { %v6400_v39 = vpop.f32.mrf.mxu0 }
0x14e4   :  { %v2260_v8 = vsel %vm350_vm5, %v2252_v38, -inf }
0x14e5   :  { %2261 = vmax.xlane.f32.xlu1 %v2260_v8  ;;  %v2254_v41 = vpop.f32.mrf.mxu0 }
0x14e7   :  { %v6401_v42 = vpop.f32.mrf.mxu0 }
0x14f6   :  { %2281 = vrot.lane.b32.xlu1 %v7635_v11, %s7166_s2 }
0x14fa   :  { %2429 = vrot.lane.b32.xlu1 %v7635_v11, %s8533_s5 }
0x14fe   :  { %2479 = vrot.lane.b32.xlu1 %v7639_v32, %s8533_s5 }
0x1502   :  { %2477 = vrot.lane.b32.xlu1 %v7651_v21, %s8533_s5 }
0x156e   :  { %v2262_v43 = vpop.xlane.xlu1 %2261 }
0x156f   :  { %v2264_v48 = vsub.f32 %v2252_v38, %v2262_v43 }
0x1571   :  { %v2267_v50 = vmul.f32 1.442695, %v2264_v48 }
0x1572   :  { %v2282_v45 = vpop.permute.xlu1 %2281 }
0x1573   :  { %v2287_v46 = vsel %vm475_vm8, %v2282_v45, 0  ;;  %6896 = vpow2.f32 %v2267_v50 }
0x1574   :  { %6403 = vmatpush3.bf16.msra.mxu1 %v2287_v46 }
0x1575   :  { %6414 = vmatprep.subr.bf16.mxu1 %v7160_v1 }
0x1576   :  { %v2430_v4 = vpop.permute.xlu1 %2429 }
0x1577   :  { %v2435_v29 = vsel %vm350_vm5, %v2430_v4, 0 }
0x157a   :  { %v2480_v22 = vpop.permute.xlu1 %2479 }
0x157b   :  { %v2485_v8 = vsel %vm350_vm5, %v2480_v22, 0 }
0x157e   :  { %v2478_v45 = vpop.permute.xlu1 %2477 }
0x1580   :  { %v6897_v56 = vpop.eup %6896 }
0x1581   :  { %v2272_v59 = vsel %vm350_vm5, %v6897_v56, 0.0 }
0x1594   :  { %v7787_v51 = vpop.f32.mrf.mxu1 }
0x1596   :  { %v6382_v52 = vpop.f32.mrf.mxu1 }
0x1598   :  { %v7789_v53 = vpop.f32.mrf.mxu1 }
0x159a   :  { %v6383_v54 = vpop.f32.mrf.mxu1 }
0x159c   :  { %v2201_v25 = vpop.f32.mrf.mxu1 }
0x159d   :  { %v2202_v55 = vadd.f32 %v2201_v25, %v7665_v34  ;;  %v2151_v25 = vadd.f32 %v7768_v24, %v7787_v51 }
0x159e   :  { %v6394_v21 = vpop.f32.mrf.mxu1 }
0x159f   :  { %v2257_v26 = vsel %vm350_vm5, %v2202_v55, -inf }
0x15a0   :  { %2258 = vmax.xlane.f32.xlu0 %v2257_v26  ;;  %v2204_v57 = vpop.f32.mrf.mxu1 }
0x15a2   :  { %v6395_v58 = vpop.f32.mrf.mxu1 }
0x15a4   :  { %2273 = vadd.xlane.f32.xlu0 %v2272_v59 }
0x1629   :  { %v2259_v60 = vpop.xlane.xlu0 %2258 }
0x162a   :  { %v2263_v61 = vsub.f32 %v2202_v55, %v2259_v60 }
0x162c   :  { %v2265_v62 = vmul.f32 1.442695, %v2263_v61 }
0x162d   :  { %v2274_v47 = vpop.xlane.xlu0 %2273 }
0x162e   :  { %6898 = vpow2.f32 %v2265_v62 }
0x162f   :  { %6900 = vrcp.f32 %v2274_v47 }
0x163b   :  { %v6899_v63 = vpop.eup %6898 }
0x163c   :  { %v2269_v27 = vsel %vm350_vm5, %v6899_v63, 0.0  ;;  %v6901_v31 = vpop.eup %6900 }
0x163d   :  { %2270 = vadd.xlane.f32.xlu0 %v2269_v27  ;;  %v2278_v0 = vmul.f32 %v6901_v31, %v6897_v56  ;;  %v2154_v56 = vadd.f32 %v7771_v33, %v7789_v53 }
0x163f   :  { %v2280_v5 = vpack.c.bf16 %v2278_v0, %v2278_v0 }
0x1653   :  { %2329 = vrot.lane.b32.xlu0 %v7639_v32, %s7166_s2 }
0x1657   :  { %2427 = vrot.lane.b32.xlu0 %v7645_v18, %s8533_s5 }
0x16c6   :  { %v2271_v49 = vpop.xlane.xlu0 %2270 }
0x16c7   :  { %6902 = vrcp.f32 %v2271_v49 }
0x16ca   :  { %v2330_v2 = vpop.permute.xlu0 %2329 }
0x16cb   :  { %v2335_v3 = vsel %vm475_vm8, %v2330_v2, 0 }
0x16cc   :  { %6409 = vmatpush3.bf16.msra.mxu0 %v2335_v3 }
0x16cd   :  { %6420 = vmatprep.subr.bf16.mxu0 %v7160_v1 }
0x16ce   :  { %v2428_v10 = vpop.permute.xlu0 %2427 }
0x16cf   :  { %6411 = vmatmul.mubr.msk.bf16.vlgmr.msra.gmra.mxu0 %vm350_vm5, %v2280_v5  ;;  %v1607_v5 = vld [vmem:[%s8503_s13 + $0xc] sm:$0xf] }
0x16d0   :  { %6421 = vmatpush3.bf16.xpose.msra.mxu0 %v2435_v29  ;;  %6422 = vmatprep.mubr.msk.bf16.mxu0 %vm7161_vm0, %v7160_v1  ;;  %v2652_v29 = vsel %vm475_vm8, %v1607_v5, 0  ;;  %v5827_v5 = vld [vmem:[%s8506_s16] ss:$0 sm:$0xff] }
0x16d1   :  { %6432 = vmatprep.subr.bf16.mxu0 %v7160_v1 }
0x16d4   :  { %v6903_v18 = vpop.eup %6902 }
0x16d5   :  { %v2276_v9 = vmul.f32 %v6903_v18, %v6899_v63 }
0x16d7   :  { %6423 = vmatmul.mubr.msk.bf16.vlgmr.msra.gmra.mxu0 %vm350_vm5, %v2428_v10  ;;  %v2279_v12 = vpack.c.bf16 %v2276_v9, %v2276_v9 }
0x16d8   :  { %6434 = vmatprep.mubr.msk.bf16.mxu0 %vm7161_vm0, %v7160_v1 }
0x16d9   :  { %6405 = vmatmul.mubr.msk.bf16.vlgmr.msra.gmra.mxu1 %vm350_vm5, %v2279_v12 }
0x16da   :  { %6416 = vmatprep.mubr.msk.bf16.mxu1 %vm7161_vm0, %v7160_v1  ;;  %6415 = vmatpush3.bf16.msra.mxu1 %v2382_v14 }
0x16db   :  { %6426 = vmatprep.subr.bf16.mxu1 %v7160_v1 }
0x178f   :  { %v2371_v15 = vpop.f32.mrf.mxu0 }
0x1791   :  { %v6412_v16 = vpop.f32.mrf.mxu0 }
0x1793   :  { %v2374_v17 = vpop.f32.mrf.mxu0 }
0x1795   :  { %v6413_v19 = vpop.f32.mrf.mxu0 }
0x1797   :  { %v2471_v20 = vpop.f32.mrf.mxu0 }
0x1798   :  { %v2472_v23 = vadd.f32 %v2471_v20, %v7665_v34 }
0x1799   :  { %v2323_v28 = vpop.f32.mrf.mxu1  ;;  %v6424_v30 = vpop.f32.mrf.mxu0 }
0x179a   :  { %v2377_v35 = vpack.c.bf16 %v2371_v15, %v2323_v28  ;;  %v2527_v36 = vsel %vm350_vm5, %v2472_v23, -inf  ;;  %v5825_v30 = vld [vmem:[%s8504_s14] ss:$0 sm:$0xff] }
0x179b   :  { %2528 = vmax.xlane.f32.xlu0 %v2527_v36  ;;  %v6406_v38 = vpop.f32.mrf.mxu1  ;;  %v2474_v39 = vpop.f32.mrf.mxu0 }
0x179c   :  { %6417 = vmatmul.mubr.msk.bf16.vlgmr.msra.gmra.mxu1 %vm350_vm5, %v2377_v35 }
0x179d   :  { %6427 = vmatpush3.bf16.xpose.msra.mxu1 %v2485_v8  ;;  %v2326_v41 = vpop.f32.mrf.mxu1  ;;  %v6425_v42 = vpop.f32.mrf.mxu0  ;;  %6428 = vmatprep.mubr.msk.bf16.mxu1 %vm7161_vm0, %v7160_v1 }
0x179e   :  { %6438 = vmatprep.subr.bf16.mxu1 %v7160_v1 }
0x179f   :  { %v6407_v43 = vpop.f32.mrf.mxu1 }
0x17a4   :  { %6429 = vmatmul.mubr.msk.bf16.vlgmr.msra.gmra.mxu1 %vm350_vm5, %v2478_v45 }
0x17a5   :  { %6440 = vmatprep.mubr.msk.bf16.mxu1 %vm7161_vm0, %v7160_v1 }
0x1824   :  { %v2529_v46 = vpop.xlane.xlu0 %2528 }
0x1825   :  { %v2533_v48 = vsub.f32 %v2472_v23, %v2529_v46 }
0x1827   :  { %v2535_v50 = vmul.f32 1.442695, %v2533_v48 }
0x1829   :  { %6904 = vpow2.f32 %v2535_v50 }
0x1836   :  { %v6905_v52 = vpop.eup %6904 }
0x1837   :  { %v2539_v54 = vsel %vm350_vm5, %v6905_v52, 0.0 }
0x1838   :  { %2540 = vadd.xlane.f32.xlu0 %v2539_v54 }
0x185c   :  { %v2418_v55 = vpop.f32.mrf.mxu1 }
0x185d   :  { %v2425_v21 = vadd.f32 %v2418_v55, %v2151_v25 }
0x185e   :  { %v6418_v26 = vpop.f32.mrf.mxu1 }
0x1860   :  { %v2421_v57 = vpop.f32.mrf.mxu1 }
0x1861   :  { %v2426_v58 = vadd.f32 %v2421_v57, %v2154_v56 }
0x1862   :  { %v6419_v59 = vpop.f32.mrf.mxu1 }
0x1863   :  { %v6817_v59 = vld [vmem:[%s8507_s17] sm:$0xff]  }
0x1864   :  { %v2521_v60 = vpop.f32.mrf.mxu1 }
0x1865   :  { %v2522_v61 = vadd.f32 %v2521_v60, %v7668_v37  ;;  %v6818_v60 = vld [vmem:[%s8509_s19 + $0x38] sm:$0xff]  }
0x1866   :  { %v6430_v62 = vpop.f32.mrf.mxu1 }
0x1867   :  { %v2530_v63 = vsel %vm350_vm5, %v2522_v61, -inf  ;;  %v6820_v62 = vld [vmem:[%s8509_s19 + $0x28] sm:$0xff]  }
0x1868   :  { %2531 = vmax.xlane.f32.xlu1 %v2530_v63  ;;  %v2524_v27 = vpop.f32.mrf.mxu1  ;;  %v6821_v63 = vld [vmem:[%s8509_s19 + $0x20] sm:$0xff]  }
0x1869   :  { %v6822_v27 = vld [vmem:[%s8509_s19 + $0x18] sm:$0xff]  }
0x186a   :  { %v6431_v47 = vpop.f32.mrf.mxu1 }
0x1879   :  { %2551 = vrot.lane.b32.xlu1 %v7635_v11, %s8535_s28 }
0x18c1   :  { %v2541_v24 = vpop.xlane.xlu0 %2540 }
0x18c2   :  { %6906 = vrcp.f32 %v2541_v24 }
0x18cf   :  { %v6907_v51 = vpop.eup %6906 }
0x18d0   :  { %v2546_v49 = vmul.f32 %v6907_v51, %v6905_v52 }
0x18d2   :  { %v2549_v3 = vpack.c.bf16 %v2546_v49, %v2546_v49 }
0x18f1   :  { %v2532_v31 = vpop.xlane.xlu1 %2531 }
0x18f2   :  { %v2534_v33 = vsub.f32 %v2522_v61, %v2532_v31  ;;  %v6819_v61 = vld [vmem:[%s8509_s19 + $0x30] sm:$0xff]  }
0x18f4   :  { %v2537_v53 = vmul.f32 1.442695, %v2534_v33 }
0x18f5   :  { %v2552_v0 = vpop.permute.xlu1 %2551 }
0x18f6   :  { %6908 = vpow2.f32 %v2537_v53  ;;  %v2557_v2 = vsel %vm475_vm8, %v2552_v0, 0 }
0x18f7   :  { %6433 = vmatpush3.bf16.msra.mxu0 %v2557_v2  ;;  %v5826_v2 = vld [vmem:[%s8505_s15] ss:$0 sm:$0xff] }
0x18f8   :  { %6444 = vmatprep.subr.bf16.mxu0 %v7160_v1 }
0x18fa   :  { %6435 = vmatmul.mubr.msk.bf16.vlgmr.msra.gmra.mxu0 %vm350_vm5, %v2549_v3 }
0x18fb   :  { %6446 = vmatprep.mubr.msk.bf16.mxu0 %vm7161_vm0, %v7160_v1  ;;  %6445 = vmatpush3.bf16.msra.mxu0 %v2652_v29 }
0x18fc   :  { %6458 = vmatprep.subr.bf16.mxu0 %v7160_v1 }
0x1903   :  { %v6909_v11 = vpop.eup %6908 }
0x1904   :  { %v2542_v4 = vsel %vm350_vm5, %v6909_v11, 0.0 }
0x1905   :  { %2543 = vadd.xlane.f32.xlu0 %v2542_v4 }
0x191b   :  { %2599 = vrot.lane.b32.xlu0 %v7639_v32, %s8535_s28 }
0x198e   :  { %v2544_v18 = vpop.xlane.xlu0 %2543 }
0x198f   :  { %6910 = vrcp.f32 %v2544_v18 }
0x1992   :  { %v2600_v9 = vpop.permute.xlu0 %2599 }
0x1993   :  { %v2605_v10 = vsel %vm475_vm8, %v2600_v9, 0 }
0x1994   :  { %6439 = vmatpush3.bf16.msra.mxu1 %v2605_v10 }
0x1995   :  { %6450 = vmatprep.subr.bf16.mxu1 %v7160_v1 }
0x199c   :  { %v6911_v12 = vpop.eup %6910 }
0x199d   :  { %v2548_v13 = vmul.f32 %v6911_v12, %v6909_v11  ;;  %v6823_v12 = vld [vmem:[%s8509_s19 + $0x10] sm:$0xff]  }
0x199f   :  { %v2550_v32 = vpack.c.bf16 %v2548_v13, %v2548_v13  ;;  %v6824_v13 = vld [vmem:[%s8509_s19 + $0x8] sm:$0xff]  }
0x19a1   :  { %6441 = vmatmul.mubr.msk.bf16.vlgmr.msra.gmra.mxu1 %vm350_vm5, %v2550_v32  ;;  %v6825_v32 = vld [vmem:[%s8509_s19] sm:$0xff]  }
0x19a2   :  { %6454 = vmatprep.mubr.msk.bf16.mxu1 %vm7161_vm0, %v7160_v1 }
0x19ba   :  { %v2593_v14 = vpop.f32.mrf.mxu0 }
0x19bc   :  { %v6436_v15 = vpop.f32.mrf.mxu0 }
0x19be   :  { %v2596_v16 = vpop.f32.mrf.mxu0 }
0x19c0   :  { %v6437_v17 = vpop.f32.mrf.mxu0 }
0x1a61   :  { %v2641_v19 = vpop.f32.mrf.mxu1 }
0x1a62   :  { %v2647_v20 = vpack.c.bf16 %v2641_v19, %v2593_v14  ;;  %v5828_v14 = vld [vmem:[%s8508_s18] ss:$0 sm:$0xff] }
0x1a63   :  { %v6442_v22 = vpop.f32.mrf.mxu1 }
0x1a64   :  { %6447 = vmatmul.mubr.msk.bf16.vlgmr.msra.gmra.mxu0 %vm350_vm5, %v2647_v20 }
0x1a65   :  { %v2644_v23 = vpop.f32.mrf.mxu1  ;;  %6474 = vmatprep.mubr.msk.bf16.mxu0 %vm7161_vm0, %v7160_v1  ;;  %6459 = vmatpush3.bf16.msra.mxu0 %v6818_v60 }
0x1a66   :  { %6460 = vmatprep.subr.bf16.mxu0 %v7160_v1 }
0x1a67   :  { %v6443_v28 = vpop.f32.mrf.mxu1 }
0x1a69   :  { %6461 = vmatpush3.bf16.msra.mxu0 %v6819_v61 }
0x1a6a   :  { %6462 = vmatprep.subr.bf16.mxu0 %v7160_v1 }
0x1a6d   :  { %6463 = vmatpush3.bf16.msra.mxu0 %v6820_v62 }
0x1a6e   :  { %6464 = vmatprep.subr.bf16.mxu0 %v7160_v1 }
0x1a71   :  { %6465 = vmatpush3.bf16.msra.mxu0 %v6821_v63 }
0x1a72   :  { %6466 = vmatprep.subr.bf16.mxu0 %v7160_v1 }
0x1a75   :  { %6467 = vmatpush3.bf16.msra.mxu0 %v6822_v27 }
0x1a76   :  { %6468 = vmatprep.subr.bf16.mxu0 %v7160_v1 }
0x1a79   :  { %6469 = vmatpush3.bf16.msra.mxu0 %v6823_v12 }
0x1a7a   :  { %6470 = vmatprep.subr.bf16.mxu0 %v7160_v1 }
0x1a7d   :  { %6471 = vmatpush3.bf16.msra.mxu0 %v6824_v13 }
0x1a7e   :  { %6472 = vmatprep.subr.bf16.mxu0 %v7160_v1 }
0x1a81   :  { %6473 = vmatpush3.bf16.msra.mxu0 %v6825_v32 }
0x1a82   :  { %6504 = vmatprep.subr.bf16.mxu0 %v7160_v1 }
0x1b24   :  { %v2688_v35 = vpop.f32.mrf.mxu0 }
0x1b25   :  { %v2695_v36 = vadd.f32 %v2688_v35, %v2425_v21  ;;  %v5832_v35 = vld [vmem:[%s8510_s20] ss:$0 sm:$0xff] }
0x1b26   :  { %v6448_v38 = vpop.f32.mrf.mxu0 }
0x1b27   :  { %v2703_v39 = vadd.f32 %v5825_v30, %v2695_v36 }
0x1b28   :  { %v2691_v8 = vpop.f32.mrf.mxu0 }
0x1b29   :  { %v2696_v41 = vadd.f32 %v2691_v8, %v2426_v58  ;;  %v2705_v42 = vadd.f32 %v2703_v39, %v7626_v6 }
0x1b2a   :  { %v6449_v43 = vpop.f32.mrf.mxu0 }
0x1b2b   :  { %v2704_v45 = vadd.f32 %v5825_v30, %v2696_v41  ;;  %v2709_v46 = vsel %vm295_vm4, %v2705_v42, 0.0 }
0x1b2c   :  { %2710 = vadd.xlane.f32.xlu1 %v2709_v46 }
0x1b2d   :  { %v2706_v48 = vadd.f32 %v2704_v45, %v7628_v7  ;;  %v6816_v7 = vld [vmem:[%s8507_s17 + $0x8] sm:$0xff]  }
0x1b2e   :  { %6451 = vmatpush3.bf16.msra.mxu1 %v6816_v7  ;;  %v6827_v7 = vld [vmem:[%s8555_s6 + $0x10] sm:$0xff]  }
0x1b2f   :  { %v2712_v50 = vsel %vm295_vm4, %v2706_v48, 0.0  ;;  %6452 = vmatprep.subr.bf16.mxu1 %v7160_v1 }
0x1b30   :  { %2713 = vadd.xlane.f32.xlu0 %v2712_v50 }
0x1b32   :  { %6453 = vmatpush3.bf16.msra.mxu1 %v6817_v59 }
0x1b33   :  { %6478 = vmatprep.subr.bf16.mxu1 %v7160_v1 }
0x1bb5   :  { %v2711_v52 = vpop.xlane.xlu1 %2710 }
0x1bb6   :  { %v2715_v54 = vmul.f32 0.03125, %v2711_v52 }
0x1bb8   :  { %v2717_v25 = vsub.f32 %v2705_v42, %v2715_v54 }
0x1bb9   :  { %v2714_v55 = vpop.xlane.xlu0 %2713 }
0x1bba   :  { %v2716_v21 = vmul.f32 0.03125, %v2714_v55  ;;  %v2719_v26 = vmul.f32 %v2717_v25, %v2717_v25 }
0x1bbc   :  { %v2718_v56 = vsub.f32 %v2706_v48, %v2716_v21  ;;  %v2721_v57 = vsel %vm295_vm4, %v2719_v26, 0.0 }
0x1bbd   :  { %2722 = vadd.xlane.f32.xlu1 %v2721_v57 }
0x1bbe   :  { %v2720_v6 = vmul.f32 %v2718_v56, %v2718_v56 }
0x1bc0   :  { %v2724_v58 = vsel %vm295_vm4, %v2720_v6, 0.0 }
0x1bc1   :  { %2725 = vadd.xlane.f32.xlu0 %v2724_v58  ;;  %v6826_v58 = vld [vmem:[%s8555_s6 + $0x18] sm:$0xff]  }
0x1c46   :  { %v2723_v47 = vpop.xlane.xlu1 %2722 }
0x1c47   :  { %v2727_v24 = vmul.f32 0.03125, %v2723_v47 }
0x1c49   :  { %v2729_v51 = vadd.f32 1e-05, %v2727_v24 }
0x1c4a   :  { %v2726_v31 = vpop.xlane.xlu0 %2725 }
0x1c4b   :  { %6912 = vrsqrt.f32 %v2729_v51  ;;  %v2728_v33 = vmul.f32 0.03125, %v2726_v31  ;;  %v5841_v51 = vld [vmem:[%s8511_s21] ss:$0 sm:$0xff] }
0x1c4d   :  { %v2730_v53 = vadd.f32 1e-05, %v2728_v33 }
0x1c4f   :  { %6914 = vrsqrt.f32 %v2730_v53 }
0x1c58   :  { %v6913_v49 = vpop.eup %6912 }
0x1c59   :  { %v2733_v0 = vmul.f32 %v6913_v49, %v2717_v25  ;;  %v5842_v49 = vld [vmem:[%s8512_s22] ss:$0 sm:$0xff] }
0x1c5b   :  { %v2741_v4 = vmul.f32 %v5826_v2, %v2733_v0 }
0x1c5c   :  { %v6915_v3 = vpop.eup %6914 }
0x1c5d   :  { %v2734_v11 = vmul.f32 %v6915_v3, %v2718_v56  ;;  %v2749_v18 = vadd.f32 %v5827_v5, %v2741_v4 }
0x1c5f   :  { %v2742_v29 = vmul.f32 %v5826_v2, %v2734_v11 }
0x1c61   :  { %v2750_v9 = vadd.f32 %v5827_v5, %v2742_v29 }
0x1c63   :  { %v2751_v10 = vpack.c.bf16 %v2750_v9, %v2749_v18 }
0x1c65   :  { %6455 = vmatmul.mubr.msk.bf16.vlgmr.msra.gmra.mxu1 %vm295_vm4, %v2751_v10 }
0x1c66   :  { %6482 = vmatprep.mubr.msk.bf16.mxu1 %vm7161_vm0, %v7160_v1  ;;  %6479 = vmatpush3.bf16.msra.mxu1 %v6826_v58 }
0x1c67   :  { %6480 = vmatprep.subr.bf16.mxu1 %v7160_v1 }
0x1c6a   :  { %6481 = vmatpush3.bf16.msra.mxu1 %v6827_v7 }
0x1c6b   :  { %6486 = vmatprep.subr.bf16.mxu1 %v7160_v1 }
0x1d25   :  { %v2812_v15 = vpop.f32.mrf.mxu1 }
0x1d26   :  { %v2813_v17 = vadd.f32 %v5828_v14, %v2812_v15 }
0x1d27   :  { %v6456_v16 = vpop.f32.mrf.mxu1 }
0x1d28   :  { %v2819_v23 = vmax.f32 %v2813_v17, 0.0 }
0x1d29   :  { %v2815_v19 = vpop.f32.mrf.mxu1 }
0x1d2a   :  { %v2816_v20 = vadd.f32 %v5828_v14, %v2815_v19 }
0x1d2b   :  { %v6457_v22 = vpop.f32.mrf.mxu1 }
0x1d2c   :  { %v2820_v28 = vmax.f32 %v2816_v20, 0.0 }
0x1d2e   :  { %v2821_v30 = vpack.c.bf16 %v2820_v28, %v2819_v23 }
0x1d30   :  { %6475 = vmatmul.mubr.bf16.vlgmr.msra.gmra.mxu0 %v2821_v30 }
0x1d31   :  { %6506 = vmatprep.mubr.msk.bf16.mxu0 %vm7161_vm0, %v7160_v1 }
0x1df0   :  { %v2927_v36 = vpop.f32.mrf.mxu0 }
0x1df1   :  { %v2928_v38 = vadd.f32 %v5832_v35, %v2927_v36 }
0x1df2   :  { %v6476_v39 = vpop.f32.mrf.mxu0 }
0x1df3   :  { %v2934_v8 = vadd.f32 %v2928_v38, %v2749_v18 }
0x1df4   :  { %v2930_v41 = vpop.f32.mrf.mxu0 }
0x1df5   :  { %v2931_v42 = vadd.f32 %v5832_v35, %v2930_v41  ;;  %v2938_v43 = vsel %vm295_vm4, %v2934_v8, 0.0 }
0x1df6   :  { %2939 = vadd.xlane.f32.xlu1 %v2938_v43  ;;  %v6477_v45 = vpop.f32.mrf.mxu0 }
0x1df7   :  { %v2935_v46 = vadd.f32 %v2931_v42, %v2750_v9 }
0x1df9   :  { %v2941_v48 = vsel %vm295_vm4, %v2935_v46, 0.0 }
0x1dfa   :  { %2942 = vadd.xlane.f32.xlu0 %v2941_v48 }
0x1e7f   :  { %v2940_v50 = vpop.xlane.xlu1 %2939 }
0x1e80   :  { %v2944_v52 = vmul.f32 0.03125, %v2940_v50 }
0x1e82   :  { %v2946_v54 = vsub.f32 %v2934_v8, %v2944_v52 }
0x1e83   :  { %v2943_v25 = vpop.xlane.xlu0 %2942 }
0x1e84   :  { %v2945_v55 = vmul.f32 0.03125, %v2943_v25  ;;  %v2948_v21 = vmul.f32 %v2946_v54, %v2946_v54 }
0x1e86   :  { %v2947_v26 = vsub.f32 %v2935_v46, %v2945_v55  ;;  %v2950_v56 = vsel %vm295_vm4, %v2948_v21, 0.0 }
0x1e87   :  { %2951 = vadd.xlane.f32.xlu1 %v2950_v56 }
0x1e88   :  { %v2949_v57 = vmul.f32 %v2947_v26, %v2947_v26 }
0x1e8a   :  { %v2953_v6 = vsel %vm295_vm4, %v2949_v57, 0.0 }
0x1e8b   :  { %2954 = vadd.xlane.f32.xlu0 %v2953_v6 }
0x1f10   :  { %v2952_v59 = vpop.xlane.xlu1 %2951 }
0x1f11   :  { %v2956_v60 = vmul.f32 0.03125, %v2952_v59 }
0x1f13   :  { %v2958_v61 = vadd.f32 1e-05, %v2956_v60 }
0x1f14   :  { %v2955_v62 = vpop.xlane.xlu0 %2954 }
0x1f15   :  { %6916 = vrsqrt.f32 %v2958_v61  ;;  %v2957_v63 = vmul.f32 0.03125, %v2955_v62 }
0x1f17   :  { %v2959_v27 = vadd.f32 1e-05, %v2957_v63 }
0x1f19   :  { %6918 = vrsqrt.f32 %v2959_v27 }
0x1f22   :  { %v6917_v47 = vpop.eup %6916 }
0x1f23   :  { %v2962_v24 = vmul.f32 %v6917_v47, %v2946_v54 }
0x1f25   :  { %v2970_v53 = vmul.f32 %v5841_v51, %v2962_v24 }
0x1f26   :  { %v6919_v31 = vpop.eup %6918 }
0x1f27   :  { %v2963_v33 = vmul.f32 %v6919_v31, %v2947_v26  ;;  %v7941_v2 = vadd.f32 %v5842_v49, %v2970_v53 }
0x1f29   :  { %v2971_v0 = vmul.f32 %v5841_v51, %v2963_v33 }
0x1f2b   :  { %v7943_v3 = vadd.f32 %v5842_v49, %v2971_v0 }
0x1f2d   :  { %v2980_v11 = vpack.c.bf16 %v7943_v3, %v7941_v2 }
0x1f2f   :  { %6483 = vmatmul.mubr.msk.bf16.vlgmr.msra.gmra.mxu1 %vm295_vm4, %v2980_v11 }
0x1f30   :  { %6488 = vmatprep.mubr.msk.bf16.mxu1 %vm7161_vm0, %v7160_v1 }
0x1fef   :  { %v3035_v4 = vpop.f32.mrf.mxu1 }
0x1ff0   :  { %v7950_v5 = vpack.c.bf16 %v3035_v4, %v3035_v4 }
0x1ff1   :  { %v6484_v29 = vpop.f32.mrf.mxu1 }
0x1ff2   :  { %3052 = vrot.lane.b32.xlu1 %v7950_v5, %s7162_s1 }
0x1ff3   :  { %v3038_v18 = vpop.f32.mrf.mxu1 }
0x1ff4   :  { %v7954_v9 = vpack.c.bf16 %v3038_v18, %v3038_v18 }
0x1ff5   :  { %v6485_v10 = vpop.f32.mrf.mxu1 }
0x1ff6   :  { %3101 = vrot.lane.b32.xlu0 %v7954_v9, %s7162_s1 }
0x2064   :  { %v3053_v12 = vpop.permute.xlu1 %3052 }
0x2065   :  { %v3058_v13 = vsel %vm350_vm5, %v3053_v12, 0 }
0x2066   :  { %6487 = vmatpush3.bf16.xpose.msra.mxu1 %v3058_v13 }
0x2067   :  { %6492 = vmatprep.subr.bf16.mxu1 %v7160_v1 }
0x2068   :  { %v3102_v32 = vpop.permute.xlu0 %3101 }
0x2069   :  { %v3107_v14 = vsel %vm350_vm5, %v3102_v32, 0 }
0x206d   :  { %6489 = vmatmul.mubr.msk.bf16.vlgmr.msra.gmra.mxu1 %vm350_vm5, %v7950_v5 }
0x206e   :  { %6493 = vmatpush3.bf16.xpose.msra.mxu1 %v3107_v14  ;;  %6494 = vmatprep.mubr.msk.bf16.mxu1 %vm7161_vm0, %v7160_v1 }
0x206f   :  { %6498 = vmatprep.subr.bf16.mxu1 %v7160_v1 }
0x2075   :  { %6495 = vmatmul.mubr.msk.bf16.vlgmr.msra.gmra.mxu1 %vm350_vm5, %v7954_v9 }
0x2076   :  { %6500 = vmatprep.mubr.msk.bf16.mxu1 %vm7161_vm0, %v7160_v1 }
0x212d   :  { %v3094_v15 = vpop.f32.mrf.mxu1 }
0x212e   :  { %v3095_v16 = vadd.f32 %v3094_v15, %v7409_v40 }
0x212f   :  { %v6490_v17 = vpop.f32.mrf.mxu1 }
0x2130   :  { %v3149_v19 = vsel %vm350_vm5, %v3095_v16, -inf }
0x2131   :  { %3150 = vmax.xlane.f32.xlu1 %v3149_v19  ;;  %v3097_v20 = vpop.f32.mrf.mxu1 }
0x2133   :  { %v6491_v22 = vpop.f32.mrf.mxu1 }
0x2135   :  { %v3143_v23 = vpop.f32.mrf.mxu1 }
0x2136   :  { %v3144_v28 = vadd.f32 %v3143_v23, %v7413_v44 }
0x2137   :  { %v6496_v30 = vpop.f32.mrf.mxu1 }
0x2138   :  { %v3152_v35 = vsel %vm350_vm5, %v3144_v28, -inf }
0x2139   :  { %3153 = vmax.xlane.f32.xlu0 %v3152_v35  ;;  %v3146_v36 = vpop.f32.mrf.mxu1 }
0x213b   :  { %v6497_v38 = vpop.f32.mrf.mxu1 }
0x2142   :  { %3173 = vrot.lane.b32.xlu1 %v7950_v5, %s8556_s8 }
0x21ba   :  { %v3151_v39 = vpop.xlane.xlu1 %3150 }
0x21bb   :  { %v3155_v8 = vsub.f32 %v3095_v16, %v3151_v39 }
0x21bd   :  { %v3157_v41 = vmul.f32 1.442695, %v3155_v8 }
0x21be   :  { %v3174_v42 = vpop.permute.xlu1 %3173 }
0x21bf   :  { %6920 = vpow2.f32 %v3157_v41  ;;  %v3179_v43 = vsel %vm475_vm8, %v3174_v42, 0 }
0x21c0   :  { %6499 = vmatpush3.bf16.msra.mxu1 %v3179_v43 }
0x21c1   :  { %6510 = vmatprep.subr.bf16.mxu1 %v7160_v1 }
0x21c2   :  { %v3154_v45 = vpop.xlane.xlu0 %3153 }
0x21c3   :  { %v3156_v46 = vsub.f32 %v3144_v28, %v3154_v45 }
0x21c5   :  { %v3159_v48 = vmul.f32 1.442695, %v3156_v46 }
0x21c7   :  { %6922 = vpow2.f32 %v3159_v48 }
0x21cc   :  { %v6921_v50 = vpop.eup %6920 }
0x21cd   :  { %v3161_v52 = vsel %vm350_vm5, %v6921_v50, 0.0 }
0x21ce   :  { %3162 = vadd.xlane.f32.xlu1 %v3161_v52 }
0x21d4   :  { %v6923_v54 = vpop.eup %6922 }
0x21d5   :  { %v3164_v25 = vsel %vm350_vm5, %v6923_v54, 0.0 }
0x21d6   :  { %3165 = vadd.xlane.f32.xlu0 %v3164_v25 }
0x21df   :  { %3272 = vrot.lane.b32.xlu1 %v7950_v5, %s7163_s4 }
0x21e3   :  { %3322 = vrot.lane.b32.xlu1 %v7954_v9, %s7163_s4 }
0x21e7   :  { %3320 = vrot.lane.b32.xlu1 %v7954_v9, %s7164_s27 }
0x21ec   :  { %3221 = vrot.lane.b32.xlu0 %v7954_v9, %s8556_s8  ;;  %s8559_s8 = smov 56  }
0x21f0   :  { %3270 = vrot.lane.b32.xlu0 %v7950_v5, %s7164_s27 }
0x2257   :  { %v3163_v55 = vpop.xlane.xlu1 %3162 }
0x2258   :  { %6924 = vrcp.f32 %v3163_v55 }
0x225b   :  { %v3273_v58 = vpop.permute.xlu1 %3272 }
0x225c   :  { %v3278_v59 = vsel %vm350_vm5, %v3273_v58, 0 }
0x225f   :  { %v3166_v21 = vpop.xlane.xlu0 %3165  ;;  %v3323_v62 = vpop.permute.xlu1 %3322 }
0x2260   :  { %6926 = vrcp.f32 %v3166_v21  ;;  %v3328_v47 = vsel %vm350_vm5, %v3323_v62, 0 }
0x2263   :  { %v3222_v26 = vpop.permute.xlu0 %3221  ;;  %v3321_v24 = vpop.permute.xlu1 %3320 }
0x2264   :  { %v3227_v56 = vsel %vm475_vm8, %v3222_v26, 0  ;;  %v5850_v26 = vld [vmem:[%s8557_s29 + $0x10] sm:$0xf] }
0x2265   :  { %v6925_v57 = vpop.eup %6924  ;;  %6505 = vmatpush3.bf16.msra.mxu0 %v3227_v56 }
0x2266   :  { %v3168_v6 = vmul.f32 %v6925_v57, %v6921_v50  ;;  %6516 = vmatprep.subr.bf16.mxu0 %v7160_v1 }
0x2267   :  { %v3271_v27 = vpop.permute.xlu0 %3270 }
0x2268   :  { %v3171_v7 = vpack.c.bf16 %v3168_v6, %v3168_v6  ;;  %v3542_v6 = vsel %vm475_vm8, %v5850_v26, 0 }
0x226a   :  { %6501 = vmatmul.mubr.msk.bf16.vlgmr.msra.gmra.mxu1 %vm350_vm5, %v3171_v7 }
0x226b   :  { %6511 = vmatpush3.bf16.xpose.msra.mxu1 %v3278_v59  ;;  %6512 = vmatprep.mubr.msk.bf16.mxu1 %vm7161_vm0, %v7160_v1 }
0x226c   :  { %6522 = vmatprep.subr.bf16.mxu1 %v7160_v1 }
0x226d   :  { %v6927_v60 = vpop.eup %6926 }
0x226e   :  { %v3170_v61 = vmul.f32 %v6927_v60, %v6923_v54 }
0x2270   :  { %v3172_v63 = vpack.c.bf16 %v3170_v61, %v3170_v61  ;;  %v5851_v61 = vld [vmem:[%s8557_s29 + $0x14] sm:$0xf] }
0x2271   :  { %v3495_v62 = vsel %vm475_vm8, %v5851_v61, 0 }
0x2272   :  { %6507 = vmatmul.mubr.msk.bf16.vlgmr.msra.gmra.mxu0 %vm350_vm5, %v3172_v63  ;;  %6513 = vmatmul.mubr.msk.bf16.vlgmr.msra.gmra.mxu1 %vm350_vm5, %v3271_v27 }
0x2273   :  { %6517 = vmatpush3.bf16.xpose.msra.mxu0 %v3328_v47  ;;  %6518 = vmatprep.mubr.msk.bf16.mxu0 %vm7161_vm0, %v7160_v1 }
0x2274   :  { %6528 = vmatprep.subr.bf16.mxu0 %v7160_v1  ;;  %6524 = vmatprep.mubr.msk.bf16.mxu1 %vm7161_vm0, %v7160_v1 }
0x227a   :  { %6519 = vmatmul.mubr.msk.bf16.vlgmr.msra.gmra.mxu0 %vm350_vm5, %v3321_v24 }
0x227b   :  { %6530 = vmatprep.mubr.msk.bf16.mxu0 %vm7161_vm0, %v7160_v1 }
0x232a   :  { %v8008_v51 = vpop.f32.mrf.mxu1 }
0x232c   :  { %v6502_v31 = vpop.f32.mrf.mxu1 }
0x232e   :  { %v3218_v33 = vpop.f32.mrf.mxu1 }
0x2330   :  { %v6503_v53 = vpop.f32.mrf.mxu1 }
0x2332   :  { %v8010_v49 = vpop.f32.mrf.mxu0  ;;  %v3314_v0 = vpop.f32.mrf.mxu1 }
0x2333   :  { %v3269_v11 = vpack.c.bf16 %v8010_v49, %v8008_v51  ;;  %v3315_v4 = vadd.f32 %v3314_v0, %v7409_v40 }
0x2334   :  { %v6508_v29 = vpop.f32.mrf.mxu0  ;;  %v6514_v18 = vpop.f32.mrf.mxu1 }
0x2335   :  { %v3370_v10 = vsel %vm350_vm5, %v3315_v4, -inf }
0x2336   :  { %v3266_v12 = vpop.f32.mrf.mxu0  ;;  %3371 = vmax.xlane.f32.xlu0 %v3370_v10  ;;  %v3317_v13 = vpop.f32.mrf.mxu1 }
0x2338   :  { %v6509_v32 = vpop.f32.mrf.mxu0  ;;  %v6515_v14 = vpop.f32.mrf.mxu1 }
0x233a   :  { %v3364_v15 = vpop.f32.mrf.mxu0 }
0x233b   :  { %v3365_v16 = vadd.f32 %v3364_v15, %v7413_v44 }
0x233c   :  { %v6520_v17 = vpop.f32.mrf.mxu0 }
0x233d   :  { %v3373_v19 = vsel %vm350_vm5, %v3365_v16, -inf }
0x233e   :  { %3374 = vmax.xlane.f32.xlu1 %v3373_v19  ;;  %v3367_v20 = vpop.f32.mrf.mxu0 }
0x2340   :  { %v6521_v22 = vpop.f32.mrf.mxu0 }
0x234f   :  { %3394 = vrot.lane.b32.xlu1 %v7950_v5, %s8559_s8 }
0x2353   :  { %3587 = vrot.lane.b32.xlu1 %v7950_v5, %s7166_s2 }
0x2357   :  { %3637 = vrot.lane.b32.xlu1 %v7954_v9, %s7166_s2 }
0x235b   :  { %3635 = vrot.lane.b32.xlu1 %v7954_v9, %s7167_s30 }
0x23bf   :  { %v3372_v23 = vpop.xlane.xlu0 %3371 }
0x23c0   :  { %v3376_v28 = vsub.f32 %v3315_v4, %v3372_v23 }
0x23c2   :  { %v3378_v30 = vmul.f32 1.442695, %v3376_v28 }
0x23c4   :  { %6928 = vpow2.f32 %v3378_v30 }
0x23c7   :  { %v3375_v35 = vpop.xlane.xlu1 %3374 }
0x23c8   :  { %v3377_v36 = vsub.f32 %v3365_v16, %v3375_v35 }
0x23ca   :  { %v3380_v38 = vmul.f32 1.442695, %v3377_v36 }
0x23cb   :  { %v3395_v39 = vpop.permute.xlu1 %3394 }
0x23cc   :  { %6930 = vpow2.f32 %v3380_v38  ;;  %v3400_v8 = vsel %vm475_vm8, %v3395_v39, 0 }
0x23cd   :  { %6523 = vmatpush3.bf16.msra.mxu1 %v3400_v8 }
0x23ce   :  { %6534 = vmatprep.subr.bf16.mxu1 %v7160_v1 }
0x23cf   :  { %v3588_v58 = vpop.permute.xlu1 %3587 }
0x23d0   :  { %v3593_v53 = vsel %vm350_vm5, %v3588_v58, 0 }
0x23d1   :  { %v6929_v41 = vpop.eup %6928 }
0x23d2   :  { %v3382_v42 = vsel %vm350_vm5, %v6929_v41, 0.0 }
0x23d3   :  { %3383 = vadd.xlane.f32.xlu0 %v3382_v42  ;;  %v3638_v7 = vpop.permute.xlu1 %3637 }
0x23d4   :  { %v3643_v59 = vsel %vm350_vm5, %v3638_v7, 0 }
0x23d7   :  { %v3636_v60 = vpop.permute.xlu1 %3635 }
0x23d9   :  { %v6931_v43 = vpop.eup %6930 }
0x23da   :  { %v3385_v45 = vsel %vm350_vm5, %v6931_v43, 0.0 }
0x23db   :  { %3386 = vadd.xlane.f32.xlu0 %v3385_v45 }
0x23f1   :  { %3442 = vrot.lane.b32.xlu0 %v7954_v9, %s8559_s8  ;;  %s8563_s8 = smov 40  }
0x23f5   :  { %3585 = vrot.lane.b32.xlu0 %v7950_v5, %s7167_s30 }
0x245c   :  { %v3384_v46 = vpop.xlane.xlu0 %3383 }
0x245d   :  { %6932 = vrcp.f32 %v3384_v46 }
0x2464   :  { %v3387_v48 = vpop.xlane.xlu0 %3386 }
0x2465   :  { %6934 = vrcp.f32 %v3387_v48 }
0x2468   :  { %v3443_v50 = vpop.permute.xlu0 %3442 }
0x2469   :  { %v3448_v52 = vsel %vm475_vm8, %v3443_v50, 0 }
0x246a   :  { %v6933_v54 = vpop.eup %6932  ;;  %6529 = vmatpush3.bf16.msra.mxu0 %v3448_v52 }
0x246b   :  { %v3389_v25 = vmul.f32 %v6933_v54, %v6929_v41  ;;  %6540 = vmatprep.subr.bf16.mxu0 %v7160_v1 }
0x246c   :  { %v3586_v4 = vpop.permute.xlu0 %3585 }
0x246d   :  { %v3392_v55 = vpack.c.bf16 %v3389_v25, %v3389_v25 }
0x246f   :  { %6525 = vmatmul.mubr.msk.bf16.vlgmr.msra.gmra.mxu1 %vm350_vm5, %v3392_v55 }
0x2470   :  { %6536 = vmatprep.mubr.msk.bf16.mxu1 %vm7161_vm0, %v7160_v1  ;;  %6535 = vmatpush3.bf16.msra.mxu1 %v3495_v62 }
0x2471   :  { %6546 = vmatprep.subr.bf16.mxu1 %v7160_v1 }
0x2472   :  { %v6935_v21 = vpop.eup %6934 }
0x2473   :  { %v3391_v56 = vmul.f32 %v6935_v21, %v6931_v43 }
0x2475   :  { %v3393_v57 = vpack.c.bf16 %v3391_v56, %v3391_v56 }
0x2477   :  { %6531 = vmatmul.mubr.msk.bf16.vlgmr.msra.gmra.mxu0 %vm350_vm5, %v3393_v57 }
0x2478   :  { %6541 = vmatpush3.bf16.msra.mxu0 %v3542_v6  ;;  %6542 = vmatprep.mubr.msk.bf16.mxu0 %vm7161_vm0, %v7160_v1 }
0x2479   :  { %6552 = vmatprep.subr.bf16.mxu0 %v7160_v1 }
0x247f   :  { %6543 = vmatmul.mubr.msk.bf16.vlgmr.msra.gmra.mxu0 %vm350_vm5, %v3269_v11 }
0x2480   :  { %6553 = vmatpush3.bf16.xpose.msra.mxu0 %v3643_v59  ;;  %6554 = vmatprep.mubr.msk.bf16.mxu0 %vm7161_vm0, %v7160_v1 }
0x2481   :  { %6564 = vmatprep.subr.bf16.mxu0 %v7160_v1 }
0x2487   :  { %6555 = vmatmul.mubr.msk.bf16.vlgmr.msra.gmra.mxu0 %vm350_vm5, %v3636_v60 }
0x2488   :  { %6566 = vmatprep.mubr.msk.bf16.mxu0 %vm7161_vm0, %v7160_v1 }
0x252f   :  { %v3436_v63 = vpop.f32.mrf.mxu1 }
0x2531   :  { %v6526_v27 = vpop.f32.mrf.mxu1 }
0x2532   :  { %v5852_v27 = vld [vmem:[%s8557_s29 + $0x18] sm:$0xf] }
0x2533   :  { %v3439_v47 = vpop.f32.mrf.mxu1 }
0x2534   :  { %v3810_v47 = vsel %vm475_vm8, %v5852_v27, 0 }
0x2535   :  { %v6527_v24 = vpop.f32.mrf.mxu1 }
0x2537   :  { %v3484_v51 = vpop.f32.mrf.mxu0 }
0x2538   :  { %v3490_v31 = vpack.c.bf16 %v3484_v51, %v3436_v63 }
0x2539   :  { %v6532_v33 = vpop.f32.mrf.mxu0 }
0x253a   :  { %6537 = vmatmul.mubr.msk.bf16.vlgmr.msra.gmra.mxu1 %vm350_vm5, %v3490_v31 }
0x253b   :  { %6547 = vmatpush3.bf16.xpose.msra.mxu1 %v3593_v53  ;;  %v3487_v49 = vpop.f32.mrf.mxu0  ;;  %6548 = vmatprep.mubr.msk.bf16.mxu1 %vm7161_vm0, %v7160_v1 }
0x253c   :  { %6558 = vmatprep.subr.bf16.mxu1 %v7160_v1 }
0x253d   :  { %v6533_v0 = vpop.f32.mrf.mxu0 }
0x253f   :  { %v8068_v11 = vpop.f32.mrf.mxu0 }
0x2541   :  { %v6544_v29 = vpop.f32.mrf.mxu0 }
0x2542   :  { %6549 = vmatmul.mubr.msk.bf16.vlgmr.msra.gmra.mxu1 %vm350_vm5, %v3586_v4 }
0x2543   :  { %v8071_v18 = vpop.f32.mrf.mxu0  ;;  %6560 = vmatprep.mubr.msk.bf16.mxu1 %vm7161_vm0, %v7160_v1 }
0x2545   :  { %v6545_v10 = vpop.f32.mrf.mxu0 }
0x2547   :  { %v3679_v12 = vpop.f32.mrf.mxu0 }
0x2548   :  { %v3680_v13 = vadd.f32 %v3679_v12, %v7413_v44 }
0x2549   :  { %v6556_v32 = vpop.f32.mrf.mxu0 }
0x254a   :  { %v3688_v14 = vsel %vm350_vm5, %v3680_v13, -inf }
0x254b   :  { %3689 = vmax.xlane.f32.xlu1 %v3688_v14  ;;  %v3682_v15 = vpop.f32.mrf.mxu0 }
0x254d   :  { %v6557_v16 = vpop.f32.mrf.mxu0 }
0x255c   :  { %3709 = vrot.lane.b32.xlu1 %v7950_v5, %s8560_s9 }
0x2560   :  { %3857 = vrot.lane.b32.xlu1 %v7950_v5, %s8561_s7 }
0x2564   :  { %3907 = vrot.lane.b32.xlu1 %v7954_v9, %s8561_s7 }
0x2568   :  { %3905 = vrot.lane.b32.xlu1 %v7954_v9, %s8562_s3 }
0x25d4   :  { %v3690_v17 = vpop.xlane.xlu1 %3689 }
0x25d5   :  { %v3692_v22 = vsub.f32 %v3680_v13, %v3690_v17 }
0x25d7   :  { %v3695_v23 = vmul.f32 1.442695, %v3692_v22 }
0x25d8   :  { %v3710_v19 = vpop.permute.xlu1 %3709 }
0x25d9   :  { %v3715_v20 = vsel %vm475_vm8, %v3710_v19, 0  ;;  %6936 = vpow2.f32 %v3695_v23 }
0x25da   :  { %6559 = vmatpush3.bf16.msra.mxu1 %v3715_v20 }
0x25db   :  { %6570 = vmatprep.subr.bf16.mxu1 %v7160_v1 }
0x25dc   :  { %v3858_v58 = vpop.permute.xlu1 %3857 }
0x25dd   :  { %v3863_v59 = vsel %vm350_vm5, %v3858_v58, 0 }
0x25e0   :  { %v3908_v49 = vpop.permute.xlu1 %3907 }
0x25e1   :  { %v3913_v14 = vsel %vm350_vm5, %v3908_v49, 0 }
0x25e4   :  { %v3906_v17 = vpop.permute.xlu1 %3905 }
0x25e6   :  { %v6937_v42 = vpop.eup %6936 }
0x25e7   :  { %v3700_v46 = vsel %vm350_vm5, %v6937_v42, 0.0 }
0x25fa   :  { %v8087_v28 = vpop.f32.mrf.mxu1 }
0x25fc   :  { %v6538_v30 = vpop.f32.mrf.mxu1 }
0x25fe   :  { %v8089_v35 = vpop.f32.mrf.mxu1 }
0x2600   :  { %v6539_v36 = vpop.f32.mrf.mxu1 }
0x2601   :  { %v3579_v36 = vadd.f32 %v8068_v11, %v8087_v28 }
0x2602   :  { %v3629_v38 = vpop.f32.mrf.mxu1 }
0x2603   :  { %v3630_v39 = vadd.f32 %v3629_v38, %v7409_v40 }
0x2604   :  { %v6550_v8 = vpop.f32.mrf.mxu1 }
0x2605   :  { %v3685_v41 = vsel %vm350_vm5, %v3630_v39, -inf }
0x2606   :  { %3686 = vmax.xlane.f32.xlu0 %v3685_v41  ;;  %v3632_v43 = vpop.f32.mrf.mxu1  ;;  %v3582_v41 = vadd.f32 %v8071_v18, %v8089_v35 }
0x2608   :  { %v6551_v45 = vpop.f32.mrf.mxu1 }
0x260a   :  { %3701 = vadd.xlane.f32.xlu0 %v3700_v46 }
0x268f   :  { %v3687_v48 = vpop.xlane.xlu0 %3686 }
0x2690   :  { %v3691_v50 = vsub.f32 %v3630_v39, %v3687_v48 }
0x2692   :  { %v3693_v52 = vmul.f32 1.442695, %v3691_v50 }
0x2693   :  { %v3702_v55 = vpop.xlane.xlu0 %3701 }
0x2694   :  { %6938 = vpow2.f32 %v3693_v52 }
0x2695   :  { %6940 = vrcp.f32 %v3702_v55 }
0x26a1   :  { %v6939_v54 = vpop.eup %6938 }
0x26a2   :  { %v3697_v25 = vsel %vm350_vm5, %v6939_v54, 0.0  ;;  %v6941_v21 = vpop.eup %6940 }
0x26a3   :  { %3698 = vadd.xlane.f32.xlu0 %v3697_v25  ;;  %v3706_v56 = vmul.f32 %v6941_v21, %v6937_v42 }
0x26a5   :  { %v3708_v7 = vpack.c.bf16 %v3706_v56, %v3706_v56 }
0x26b9   :  { %3757 = vrot.lane.b32.xlu0 %v7954_v9, %s8560_s9 }
0x26bd   :  { %3855 = vrot.lane.b32.xlu0 %v7950_v5, %s8562_s3 }
0x272c   :  { %v3699_v26 = vpop.xlane.xlu0 %3698 }
0x272d   :  { %6942 = vrcp.f32 %v3699_v26 }
0x2730   :  { %v3758_v57 = vpop.permute.xlu0 %3757 }
0x2731   :  { %v3763_v6 = vsel %vm475_vm8, %v3758_v57, 0 }
0x2732   :  { %6565 = vmatpush3.bf16.msra.mxu0 %v3763_v6  ;;  %v5853_v6 = vld [vmem:[%s8557_s29 + $0x1c] sm:$0xf] }
0x2733   :  { %6576 = vmatprep.subr.bf16.mxu0 %v7160_v1  ;;  %v4080_v58 = vsel %vm475_vm8, %v5853_v6, 0 }
0x2734   :  { %v3856_v62 = vpop.permute.xlu0 %3855 }
0x2735   :  { %6567 = vmatmul.mubr.msk.bf16.vlgmr.msra.gmra.mxu0 %vm350_vm5, %v3708_v7 }
0x2736   :  { %6577 = vmatpush3.bf16.xpose.msra.mxu0 %v3863_v59  ;;  %6578 = vmatprep.mubr.msk.bf16.mxu0 %vm7161_vm0, %v7160_v1 }
0x2737   :  { %6588 = vmatprep.subr.bf16.mxu0 %v7160_v1 }
0x273a   :  { %v6943_v60 = vpop.eup %6942 }
0x273b   :  { %v3704_v61 = vmul.f32 %v6943_v60, %v6939_v54 }
0x273d   :  { %v3707_v63 = vpack.c.bf16 %v3704_v61, %v3704_v61  ;;  %6579 = vmatmul.mubr.msk.bf16.vlgmr.msra.gmra.mxu0 %vm350_vm5, %v3856_v62 }
0x273e   :  { %6590 = vmatprep.mubr.msk.bf16.mxu0 %vm7161_vm0, %v7160_v1 }
0x273f   :  { %6561 = vmatmul.mubr.msk.bf16.vlgmr.msra.gmra.mxu1 %vm350_vm5, %v3707_v63 }
0x2740   :  { %6572 = vmatprep.mubr.msk.bf16.mxu1 %vm7161_vm0, %v7160_v1  ;;  %6571 = vmatpush3.bf16.msra.mxu1 %v3810_v47 }
0x2741   :  { %6582 = vmatprep.subr.bf16.mxu1 %v7160_v1 }
0x27f5   :  { %v3799_v24 = vpop.f32.mrf.mxu0 }
0x27f7   :  { %v6568_v51 = vpop.f32.mrf.mxu0 }
0x27f9   :  { %v3802_v31 = vpop.f32.mrf.mxu0 }
0x27fb   :  { %v6569_v33 = vpop.f32.mrf.mxu0 }
0x27fd   :  { %v3899_v53 = vpop.f32.mrf.mxu0 }
0x27fe   :  { %v3900_v0 = vadd.f32 %v3899_v53, %v7409_v40 }
0x27ff   :  { %v3751_v4 = vpop.f32.mrf.mxu1  ;;  %v6580_v29 = vpop.f32.mrf.mxu0 }
0x2800   :  { %v3805_v10 = vpack.c.bf16 %v3799_v24, %v3751_v4  ;;  %v3955_v12 = vsel %vm350_vm5, %v3900_v0, -inf }
0x2801   :  { %3956 = vmax.xlane.f32.xlu0 %v3955_v12  ;;  %v6562_v13 = vpop.f32.mrf.mxu1  ;;  %v3902_v32 = vpop.f32.mrf.mxu0 }
0x2802   :  { %6573 = vmatmul.mubr.msk.bf16.vlgmr.msra.gmra.mxu1 %vm350_vm5, %v3805_v10 }
0x2803   :  { %6583 = vmatpush3.bf16.xpose.msra.mxu1 %v3913_v14  ;;  %v3754_v15 = vpop.f32.mrf.mxu1  ;;  %v6581_v16 = vpop.f32.mrf.mxu0  ;;  %6584 = vmatprep.mubr.msk.bf16.mxu1 %vm7161_vm0, %v7160_v1 }
0x2804   :  { %6594 = vmatprep.subr.bf16.mxu1 %v7160_v1 }
0x2805   :  { %v6563_v40 = vpop.f32.mrf.mxu1 }
0x280a   :  { %6585 = vmatmul.mubr.msk.bf16.vlgmr.msra.gmra.mxu1 %vm350_vm5, %v3906_v17 }
0x280b   :  { %6596 = vmatprep.mubr.msk.bf16.mxu1 %vm7161_vm0, %v7160_v1 }
0x288a   :  { %v3957_v19 = vpop.xlane.xlu0 %3956 }
0x288b   :  { %v3961_v20 = vsub.f32 %v3900_v0, %v3957_v19  ;;  %v5874_v0 = vld [vmem:[#allocation8 + $0x1] ss:$0 sm:$0xff] }
0x288d   :  { %v3963_v22 = vmul.f32 1.442695, %v3961_v20 }
0x288f   :  { %6944 = vpow2.f32 %v3963_v22 }
0x289c   :  { %v6945_v23 = vpop.eup %6944 }
0x289d   :  { %v3967_v30 = vsel %vm350_vm5, %v6945_v23, 0.0 }
0x289e   :  { %3968 = vadd.xlane.f32.xlu0 %v3967_v30 }
0x28c2   :  { %v3846_v38 = vpop.f32.mrf.mxu1 }
0x28c3   :  { %v3853_v39 = vadd.f32 %v3846_v38, %v3579_v36 }
0x28c4   :  { %v6574_v8 = vpop.f32.mrf.mxu1 }
0x28c6   :  { %v3849_v42 = vpop.f32.mrf.mxu1 }
0x28c7   :  { %v3854_v43 = vadd.f32 %v3849_v42, %v3582_v41  ;;  %v6829_v42 = vld [vmem:[%s8502_s12 + $0x10] sm:$0xff]  }
0x28c8   :  { %v6575_v45 = vpop.f32.mrf.mxu1 }
0x28c9   :  { %v6830_v45 = vld [vmem:[%s8501_s11 + $0x18] sm:$0xff]  }
0x28ca   :  { %v3949_v46 = vpop.f32.mrf.mxu1 }
0x28cb   :  { %v3950_v48 = vadd.f32 %v3949_v46, %v7413_v44  ;;  %v6831_v46 = vld [vmem:[%s8501_s11 + $0x10] sm:$0xff]  }
0x28cc   :  { %v6586_v50 = vpop.f32.mrf.mxu1 }
0x28cd   :  { %v3958_v52 = vsel %vm350_vm5, %v3950_v48, -inf }
0x28ce   :  { %3959 = vmax.xlane.f32.xlu1 %v3958_v52  ;;  %v3952_v54 = vpop.f32.mrf.mxu1 }
0x28d0   :  { %v6587_v25 = vpop.f32.mrf.mxu1 }
0x28df   :  { %3979 = vrot.lane.b32.xlu1 %v7950_v5, %s8563_s8 }
0x2927   :  { %v3969_v11 = vpop.xlane.xlu0 %3968 }
0x2928   :  { %6946 = vrcp.f32 %v3969_v11 }
0x2935   :  { %v6947_v28 = vpop.eup %6946 }
0x2936   :  { %v3974_v35 = vmul.f32 %v6947_v28, %v6945_v23 }
0x2938   :  { %v3977_v56 = vpack.c.bf16 %v3974_v35, %v3974_v35 }
0x2957   :  { %v3960_v55 = vpop.xlane.xlu1 %3959 }
0x2958   :  { %v3962_v18 = vsub.f32 %v3950_v48, %v3960_v55 }
0x295a   :  { %v3965_v21 = vmul.f32 1.442695, %v3962_v18  ;;  %v5875_v18 = vld [vmem:[#allocation10 + $0x1] ss:$0 sm:$0xff] }
0x295b   :  { %v3980_v26 = vpop.permute.xlu1 %3979 }
0x295c   :  { %6948 = vpow2.f32 %v3965_v21  ;;  %v3985_v44 = vsel %vm475_vm8, %v3980_v26, 0 }
0x295d   :  { %6589 = vmatpush3.bf16.msra.mxu0 %v3985_v44  ;;  %v5876_v44 = vld [vmem:[#allocation11 + $0x1] ss:$0 sm:$0xff] }
0x295e   :  { %6600 = vmatprep.subr.bf16.mxu0 %v7160_v1 }
0x2960   :  { %6591 = vmatmul.mubr.msk.bf16.vlgmr.msra.gmra.mxu0 %vm350_vm5, %v3977_v56 }
0x2961   :  { %6602 = vmatprep.mubr.msk.bf16.mxu0 %vm7161_vm0, %v7160_v1  ;;  %6601 = vmatpush3.bf16.msra.mxu0 %v4080_v58 }
0x2962   :  { %6614 = vmatprep.subr.bf16.mxu0 %v7160_v1 }
0x2969   :  { %v6949_v5 = vpop.eup %6948 }
0x296a   :  { %v3970_v57 = vsel %vm350_vm5, %v6949_v5, 0.0 }
0x296b   :  { %3971 = vadd.xlane.f32.xlu0 %v3970_v57 }
0x2981   :  { %4027 = vrot.lane.b32.xlu0 %v7954_v9, %s8563_s8 }
0x29f4   :  { %v3972_v7 = vpop.xlane.xlu0 %3971 }
0x29f5   :  { %6950 = vrcp.f32 %v3972_v7 }
0x29f8   :  { %v4028_v59 = vpop.permute.xlu0 %4027 }
0x29f9   :  { %v4033_v60 = vsel %vm475_vm8, %v4028_v59, 0 }
0x29fa   :  { %6595 = vmatpush3.bf16.msra.mxu1 %v4033_v60 }
0x29fb   :  { %6606 = vmatprep.subr.bf16.mxu1 %v7160_v1 }
0x2a02   :  { %v6951_v61 = vpop.eup %6950 }
0x2a03   :  { %v3976_v62 = vmul.f32 %v6951_v61, %v6949_v5 }
0x2a05   :  { %v3978_v9 = vpack.c.bf16 %v3976_v62, %v3976_v62 }
0x2a07   :  { %6597 = vmatmul.mubr.msk.bf16.vlgmr.msra.gmra.mxu1 %vm350_vm5, %v3978_v9 }
0x2a08   :  { %6610 = vmatprep.mubr.msk.bf16.mxu1 %vm7161_vm0, %v7160_v1  ;;  %6607 = vmatpush3.bf16.msra.mxu1 %v6830_v45 }
0x2a09   :  { %6608 = vmatprep.subr.bf16.mxu1 %v7160_v1 }
0x2a0c   :  { %6609 = vmatpush3.bf16.msra.mxu1 %v6831_v46 }
0x2a0d   :  { %6622 = vmatprep.subr.bf16.mxu1 %v7160_v1 }
0x2a20   :  { %v4021_v63 = vpop.f32.mrf.mxu0 }
0x2a22   :  { %v6592_v27 = vpop.f32.mrf.mxu0 }
0x2a24   :  { %v4024_v47 = vpop.f32.mrf.mxu0 }
0x2a26   :  { %v6593_v24 = vpop.f32.mrf.mxu0 }
0x2ac7   :  { %v4069_v51 = vpop.f32.mrf.mxu1 }
0x2ac8   :  { %v4075_v31 = vpack.c.bf16 %v4069_v51, %v4021_v63 }
0x2ac9   :  { %v6598_v33 = vpop.f32.mrf.mxu1 }
0x2aca   :  { %6603 = vmatmul.mubr.msk.bf16.vlgmr.msra.gmra.mxu0 %vm350_vm5, %v4075_v31 }
0x2acb   :  { %v4072_v53 = vpop.f32.mrf.mxu1  ;;  %6618 = vmatprep.mubr.msk.bf16.mxu0 %vm7161_vm0, %v7160_v1 }
0x2acd   :  { %v6599_v49 = vpop.f32.mrf.mxu1 }
0x2b8a   :  { %v4116_v4 = vpop.f32.mrf.mxu0 }
0x2b8b   :  { %v4123_v29 = vadd.f32 %v4116_v4, %v3853_v39 }
0x2b8c   :  { %v6604_v10 = vpop.f32.mrf.mxu0 }
0x2b8d   :  { %v4131_v12 = vadd.f32 %v5874_v0, %v4123_v29 }
0x2b8e   :  { %v4119_v13 = vpop.f32.mrf.mxu0 }
0x2b8f   :  { %v4124_v32 = vadd.f32 %v4119_v13, %v3854_v43  ;;  %v4133_v14 = vadd.f32 %v4131_v12, %v7941_v2  ;;  %v6996_v43 = vld [vmem:[#allocation5] sm:$0xff]  }
0x2b90   :  { %v6605_v15 = vpop.f32.mrf.mxu0 }
0x2b91   :  { %v4132_v16 = vadd.f32 %v5874_v0, %v4124_v32  ;;  %v4139_v40 = vsel %vm295_vm4, %v4133_v14, 0.0 }
0x2b92   :  { %4140 = vadd.xlane.f32.xlu1 %v4139_v40 }
0x2b93   :  { %v4134_v17 = vadd.f32 %v4132_v16, %v7943_v3  ;;  %v6828_v3 = vld [vmem:[%s8502_s12 + $0x18] sm:$0xff]  }
0x2b94   :  { %6615 = vmatpush3.bf16.msra.mxu0 %v6828_v3 }
0x2b95   :  { %v4142_v19 = vsel %vm295_vm4, %v4134_v17, 0.0  ;;  %6616 = vmatprep.subr.bf16.mxu0 %v7160_v1 }
0x2b96   :  { %4143 = vadd.xlane.f32.xlu0 %v4142_v19 }
0x2b98   :  { %6617 = vmatpush3.bf16.msra.mxu0 %v6829_v42 }
0x2b99   :  { %6628 = vmatprep.subr.bf16.mxu0 %v7160_v1 }
0x2b9b   :  { %6619 = vmatmul.mubr.msk.bf16.vlgmr.msra.gmra.mxu0 %vm295_vm4, %v6996_v43 }
0x2b9c   :  { %6630 = vmatprep.mubr.msk.bf16.mxu0 %vm7161_vm0, %v7160_v1 }
0x2c1b   :  { %v4141_v20 = vpop.xlane.xlu1 %4140 }
0x2c1c   :  { %v4145_v22 = vmul.f32 0.03125, %v4141_v20 }
0x2c1e   :  { %v4147_v23 = vsub.f32 %v4133_v14, %v4145_v22 }
0x2c1f   :  { %v4144_v30 = vpop.xlane.xlu0 %4143 }
0x2c20   :  { %v4146_v36 = vmul.f32 0.03125, %v4144_v30  ;;  %v4149_v38 = vmul.f32 %v4147_v23, %v4147_v23 }
0x2c22   :  { %v4148_v39 = vsub.f32 %v4134_v17, %v4146_v36  ;;  %v4151_v8 = vsel %vm295_vm4, %v4149_v38, 0.0 }
0x2c23   :  { %4152 = vadd.xlane.f32.xlu1 %v4151_v8 }
0x2c24   :  { %v4150_v2 = vmul.f32 %v4148_v39, %v4148_v39 }
0x2c26   :  { %v4154_v41 = vsel %vm295_vm4, %v4150_v2, 0.0 }
0x2c27   :  { %4155 = vadd.xlane.f32.xlu0 %v4154_v41 }
0x2c5b   :  { %v4294_v58 = vpop.f32.mrf.mxu0 }
0x2c5c   :  { %v8191_v7 = vpack.c.bf16 %v4294_v58, %v4294_v58 }
0x2c5d   :  { %v6620_v59 = vpop.f32.mrf.mxu0 }
0x2c5e   :  { %v4316_v60 = vsel %vm350_vm5, %v8191_v7, 0 }
0x2c5f   :  { %v4297_v61 = vpop.f32.mrf.mxu0 }
0x2c60   :  { %v8195_v62 = vpack.c.bf16 %v4297_v61, %v4297_v61 }
0x2c61   :  { %v6621_v9 = vpop.f32.mrf.mxu0 }
0x2c62   :  { %v4362_v63 = vsel %vm350_vm5, %v8195_v62, 0 }
0x2c63   :  { %6629 = vmatpush3.bf16.xpose.msra.mxu0 %v4362_v63 }
0x2c64   :  { %6640 = vmatprep.subr.bf16.mxu0 %v7160_v1 }
0x2cac   :  { %v4153_v48 = vpop.xlane.xlu1 %4152 }
0x2cad   :  { %v4157_v50 = vmul.f32 0.03125, %v4153_v48 }
0x2caf   :  { %v4159_v52 = vadd.f32 1e-05, %v4157_v50 }
0x2cb0   :  { %v4156_v54 = vpop.xlane.xlu0 %4155 }
0x2cb1   :  { %6952 = vrsqrt.f32 %v4159_v52  ;;  %v4158_v25 = vmul.f32 0.03125, %v4156_v54 }
0x2cb3   :  { %v4160_v11 = vadd.f32 1e-05, %v4158_v25 }
0x2cb5   :  { %6954 = vrsqrt.f32 %v4160_v11 }
0x2cbe   :  { %v6953_v28 = vpop.eup %6952 }
0x2cbf   :  { %v4163_v55 = vmul.f32 %v6953_v28, %v4147_v23 }
0x2cc1   :  { %v4171_v21 = vmul.f32 %v5875_v18, %v4163_v55 }
0x2cc2   :  { %v6955_v35 = vpop.eup %6954 }
0x2cc3   :  { %v4164_v26 = vmul.f32 %v6955_v35, %v4148_v39  ;;  %v8182_v5 = vadd.f32 %v5876_v44, %v4171_v21 }
0x2cc5   :  { %v4172_v56 = vmul.f32 %v5875_v18, %v4164_v26 }
0x2cc7   :  { %v8184_v57 = vadd.f32 %v5876_v44, %v4172_v56 }
0x2cc9   :  { %v4181_v6 = vpack.c.bf16 %v8184_v57, %v8182_v5 }
0x2ccb   :  { %6611 = vmatmul.mubr.msk.bf16.vlgmr.msra.gmra.mxu1 %vm295_vm4, %v4181_v6 }
0x2ccc   :  { %6624 = vmatprep.mubr.msk.bf16.mxu1 %vm7161_vm0, %v7160_v1  ;;  %6623 = vmatpush3.bf16.xpose.msra.mxu1 %v4316_v60 }
0x2ccd   :  { %6634 = vmatprep.subr.bf16.mxu1 %v7160_v1 }
0x2d8b   :  { %v4236_v27 = vpop.f32.mrf.mxu1 }
0x2d8c   :  { %v8201_v47 = vpack.c.bf16 %v4236_v27, %v4236_v27 }
0x2d8d   :  { %v6612_v24 = vpop.f32.mrf.mxu1 }
0x2d8e   :  { %6625 = vmatmul.mubr.msk.bf16.vlgmr.msra.gmra.mxu1 %vm350_vm5, %v8201_v47 }
0x2d8f   :  { %v4239_v51 = vpop.f32.mrf.mxu1  ;;  %6636 = vmatprep.mubr.msk.bf16.mxu1 %vm7161_vm0, %v7160_v1 }
0x2d90   :  { %v8207_v31 = vpack.c.bf16 %v4239_v51, %v4239_v51 }
0x2d91   :  { %v6613_v33 = vpop.f32.mrf.mxu1 }
0x2d92   :  { %6631 = vmatmul.mubr.msk.bf16.vlgmr.msra.gmra.mxu0 %vm350_vm5, %v8207_v31 }
0x2d93   :  { %6642 = vmatprep.mubr.msk.bf16.mxu0 %vm7161_vm0, %v7160_v1 }
0x2e4e   :  { %v4352_v53 = vpop.f32.mrf.mxu1 }
0x2e4f   :  { %v4353_v49 = vadd.f32 %v4352_v53, %v7665_v34 }
0x2e50   :  { %v6626_v0 = vpop.f32.mrf.mxu1 }
0x2e51   :  { %v4404_v4 = vsel %vm350_vm5, %v4353_v49, -inf }
0x2e52   :  { %v4398_v29 = vpop.f32.mrf.mxu0  ;;  %4405 = vmax.xlane.f32.xlu1 %v4404_v4  ;;  %v4355_v10 = vpop.f32.mrf.mxu1 }
0x2e53   :  { %v4399_v12 = vadd.f32 %v4398_v29, %v7668_v37 }
0x2e54   :  { %v6627_v13 = vpop.f32.mrf.mxu1  ;;  %v6632_v32 = vpop.f32.mrf.mxu0 }
0x2e55   :  { %v4407_v14 = vsel %vm350_vm5, %v4399_v12, -inf }
0x2e56   :  { %4408 = vmax.xlane.f32.xlu0 %v4407_v14  ;;  %v4401_v15 = vpop.f32.mrf.mxu0 }
0x2e58   :  { %v6633_v16 = vpop.f32.mrf.mxu0 }
0x2e63   :  { %4429 = vrot.lane.b32.xlu1 %v8191_v7, %s7162_s1 }
0x2edb   :  { %v4406_v40 = vpop.xlane.xlu1 %4405 }
0x2edc   :  { %v4410_v17 = vsub.f32 %v4353_v49, %v4406_v40 }
0x2ede   :  { %v4412_v19 = vmul.f32 1.442695, %v4410_v17 }
0x2edf   :  { %v4409_v20 = vpop.xlane.xlu0 %4408  ;;  %v4430_v22 = vpop.permute.xlu1 %4429 }
0x2ee0   :  { %6956 = vpow2.f32 %v4412_v19  ;;  %v4411_v23 = vsub.f32 %v4399_v12, %v4409_v20  ;;  %v4435_v30 = vsel %vm475_vm8, %v4430_v22, 0 }
0x2ee1   :  { %6635 = vmatpush3.bf16.msra.mxu1 %v4435_v30 }
0x2ee2   :  { %v4414_v36 = vmul.f32 1.442695, %v4411_v23  ;;  %6646 = vmatprep.subr.bf16.mxu1 %v7160_v1 }
0x2ee4   :  { %6958 = vpow2.f32 %v4414_v36 }
0x2eed   :  { %v6957_v38 = vpop.eup %6956 }
0x2eee   :  { %v4416_v39 = vsel %vm350_vm5, %v6957_v38, 0.0 }
0x2eef   :  { %4417 = vadd.xlane.f32.xlu1 %v4416_v39 }
0x2ef1   :  { %v6959_v8 = vpop.eup %6958 }
0x2ef2   :  { %v4419_v2 = vsel %vm350_vm5, %v6959_v8, 0.0 }
0x2ef3   :  { %4420 = vadd.xlane.f32.xlu0 %v4419_v2 }
0x2f00   :  { %4530 = vrot.lane.b32.xlu1 %v8191_v7, %s7164_s27 }
0x2f04   :  { %4581 = vrot.lane.b32.xlu1 %v8195_v62, %s7164_s27 }
0x2f08   :  { %4579 = vrot.lane.b32.xlu1 %v8207_v31, %s7164_s27 }
0x2f09   :  { %4478 = vrot.lane.b32.xlu0 %v8195_v62, %s7162_s1 }
0x2f0d   :  { %4528 = vrot.lane.b32.xlu0 %v8201_v47, %s7164_s27 }
0x2f78   :  { %v4418_v41 = vpop.xlane.xlu1 %4417 }
0x2f79   :  { %6960 = vrcp.f32 %v4418_v41 }
0x2f7c   :  { %v4421_v3 = vpop.xlane.xlu0 %4420  ;;  %v4531_v46 = vpop.permute.xlu1 %4530 }
0x2f7d   :  { %6962 = vrcp.f32 %v4421_v3  ;;  %v4536_v25 = vsel %vm350_vm5, %v4531_v46, 0 }
0x2f80   :  { %v4479_v42 = vpop.permute.xlu0 %4478  ;;  %v4582_v11 = vpop.permute.xlu1 %4581 }
0x2f81   :  { %v4484_v43 = vsel %vm475_vm8, %v4479_v42, 0  ;;  %v4587_v55 = vsel %vm350_vm5, %v4582_v11, 0  ;;  %v5891_v42 = vld [vmem:[%s8503_s13 + $0x10] sm:$0xf] }
0x2f82   :  { %6641 = vmatpush3.bf16.msra.mxu0 %v4484_v43  ;;  %v4801_v46 = vsel %vm475_vm8, %v5891_v42, 0 }
0x2f83   :  { %6652 = vmatprep.subr.bf16.mxu0 %v7160_v1 }
0x2f84   :  { %v4529_v18 = vpop.permute.xlu0 %4528  ;;  %v4580_v35 = vpop.permute.xlu1 %4579 }
0x2f86   :  { %v6961_v45 = vpop.eup %6960 }
0x2f87   :  { %v4423_v48 = vmul.f32 %v6961_v45, %v6957_v38 }
0x2f89   :  { %v4426_v50 = vpack.c.bf16 %v4423_v48, %v4423_v48 }
0x2f8a   :  { %v6963_v52 = vpop.eup %6962 }
0x2f8b   :  { %v4425_v54 = vmul.f32 %v6963_v52, %v6959_v8  ;;  %6637 = vmatmul.mubr.msk.bf16.vlgmr.msra.gmra.mxu1 %vm350_vm5, %v4426_v50 }
0x2f8c   :  { %6647 = vmatpush3.bf16.xpose.msra.mxu1 %v4536_v25  ;;  %6648 = vmatprep.mubr.msk.bf16.mxu1 %vm7161_vm0, %v7160_v1  ;;  %v5892_v25 = vld [vmem:[%s8503_s13 + $0x14] sm:$0xf] }
0x2f8d   :  { %v4427_v28 = vpack.c.bf16 %v4425_v54, %v4425_v54  ;;  %6658 = vmatprep.subr.bf16.mxu1 %v7160_v1  ;;  %v4754_v11 = vsel %vm475_vm8, %v5892_v25, 0 }
0x2f8f   :  { %6643 = vmatmul.mubr.msk.bf16.vlgmr.msra.gmra.mxu0 %vm350_vm5, %v4427_v28 }
0x2f90   :  { %6653 = vmatpush3.bf16.xpose.msra.mxu0 %v4587_v55  ;;  %6654 = vmatprep.mubr.msk.bf16.mxu0 %vm7161_vm0, %v7160_v1 }
0x2f91   :  { %6664 = vmatprep.subr.bf16.mxu0 %v7160_v1 }
0x2f93   :  { %6649 = vmatmul.mubr.msk.bf16.vlgmr.msra.gmra.mxu1 %vm350_vm5, %v4529_v18 }
0x2f94   :  { %6660 = vmatprep.mubr.msk.bf16.mxu1 %vm7161_vm0, %v7160_v1 }
0x2f97   :  { %6655 = vmatmul.mubr.msk.bf16.vlgmr.msra.gmra.mxu0 %vm350_vm5, %v4580_v35 }
0x2f98   :  { %6666 = vmatprep.mubr.msk.bf16.mxu0 %vm7161_vm0, %v7160_v1 }
0x304b   :  { %v8251_v21 = vpop.f32.mrf.mxu1 }
0x304d   :  { %v6638_v26 = vpop.f32.mrf.mxu1 }
0x304f   :  { %v4474_v44 = vpop.f32.mrf.mxu1  ;;  %v8253_v56 = vpop.f32.mrf.mxu0 }
0x3050   :  { %v4526_v6 = vpack.c.bf16 %v8253_v56, %v8251_v21 }
0x3051   :  { %v6639_v58 = vpop.f32.mrf.mxu1  ;;  %v6644_v59 = vpop.f32.mrf.mxu0 }
0x3053   :  { %v4523_v60 = vpop.f32.mrf.mxu0  ;;  %v4572_v61 = vpop.f32.mrf.mxu1 }
0x3054   :  { %v4573_v9 = vadd.f32 %v4572_v61, %v7665_v34 }
0x3055   :  { %v6645_v63 = vpop.f32.mrf.mxu0  ;;  %v6650_v27 = vpop.f32.mrf.mxu1 }
0x3056   :  { %v4629_v24 = vsel %vm350_vm5, %v4573_v9, -inf }
0x3057   :  { %v4623_v51 = vpop.f32.mrf.mxu0  ;;  %4630 = vmax.xlane.f32.xlu0 %v4629_v24  ;;  %v4575_v33 = vpop.f32.mrf.mxu1 }
0x3058   :  { %v4624_v53 = vadd.f32 %v4623_v51, %v7668_v37 }
0x3059   :  { %v6651_v49 = vpop.f32.mrf.mxu1  ;;  %v6656_v0 = vpop.f32.mrf.mxu0 }
0x305a   :  { %v4632_v4 = vsel %vm350_vm5, %v4624_v53, -inf }
0x305b   :  { %4633 = vmax.xlane.f32.xlu1 %v4632_v4  ;;  %v4626_v29 = vpop.f32.mrf.mxu0 }
0x305d   :  { %v6657_v10 = vpop.f32.mrf.mxu0 }
0x306c   :  { %4653 = vrot.lane.b32.xlu1 %v8191_v7, %s7163_s4 }
0x3070   :  { %4846 = vrot.lane.b32.xlu1 %v8191_v7, %s7167_s30 }
0x3074   :  { %4896 = vrot.lane.b32.xlu1 %v8195_v62, %s7167_s30 }
0x3078   :  { %4894 = vrot.lane.b32.xlu1 %v8207_v31, %s7167_s30 }
0x30e0   :  { %v4631_v12 = vpop.xlane.xlu0 %4630 }
0x30e1   :  { %v4635_v13 = vsub.f32 %v4573_v9, %v4631_v12 }
0x30e3   :  { %v4637_v32 = vmul.f32 1.442695, %v4635_v13 }
0x30e4   :  { %v4634_v14 = vpop.xlane.xlu1 %4633 }
0x30e5   :  { %6964 = vpow2.f32 %v4637_v32  ;;  %v4636_v15 = vsub.f32 %v4624_v53, %v4634_v14 }
0x30e7   :  { %v4639_v16 = vmul.f32 1.442695, %v4636_v15 }
0x30e8   :  { %v4654_v40 = vpop.permute.xlu1 %4653 }
0x30e9   :  { %6966 = vpow2.f32 %v4639_v16  ;;  %v4659_v17 = vsel %vm475_vm8, %v4654_v40, 0 }
0x30ea   :  { %6659 = vmatpush3.bf16.msra.mxu1 %v4659_v17 }
0x30eb   :  { %6670 = vmatprep.subr.bf16.mxu1 %v7160_v1 }
0x30ec   :  { %v4847_v48 = vpop.permute.xlu1 %4846 }
0x30ed   :  { %v4852_v56 = vsel %vm350_vm5, %v4847_v48, 0 }
0x30f0   :  { %v4897_v50 = vpop.permute.xlu1 %4896 }
0x30f1   :  { %v4902_v52 = vsel %vm350_vm5, %v4897_v50, 0 }
0x30f2   :  { %v6965_v19 = vpop.eup %6964 }
0x30f3   :  { %v4641_v20 = vsel %vm350_vm5, %v6965_v19, 0.0 }
0x30f4   :  { %4642 = vadd.xlane.f32.xlu0 %v4641_v20  ;;  %v4895_v54 = vpop.permute.xlu1 %4894 }
0x30f6   :  { %v6967_v22 = vpop.eup %6966 }
0x30f7   :  { %v4644_v23 = vsel %vm350_vm5, %v6967_v22, 0.0 }
0x30f8   :  { %4645 = vadd.xlane.f32.xlu0 %v4644_v23 }
0x310e   :  { %4701 = vrot.lane.b32.xlu0 %v8195_v62, %s7163_s4 }
0x3112   :  { %4844 = vrot.lane.b32.xlu0 %v8201_v47, %s7167_s30 }
0x317d   :  { %v4643_v30 = vpop.xlane.xlu0 %4642 }
0x317e   :  { %6968 = vrcp.f32 %v4643_v30 }
0x3181   :  { %v4646_v36 = vpop.xlane.xlu0 %4645 }
0x3182   :  { %6970 = vrcp.f32 %v4646_v36 }
0x3185   :  { %v4702_v38 = vpop.permute.xlu0 %4701 }
0x3186   :  { %v4707_v39 = vsel %vm475_vm8, %v4702_v38, 0 }
0x3187   :  { %6665 = vmatpush3.bf16.msra.mxu0 %v4707_v39 }
0x3188   :  { %6676 = vmatprep.subr.bf16.mxu0 %v7160_v1 }
0x3189   :  { %v4845_v60 = vpop.permute.xlu0 %4844 }
0x318b   :  { %v6969_v8 = vpop.eup %6968 }
0x318c   :  { %v4648_v2 = vmul.f32 %v6969_v8, %v6965_v19 }
0x318e   :  { %v4651_v41 = vpack.c.bf16 %v4648_v2, %v4648_v2 }
0x318f   :  { %v6971_v3 = vpop.eup %6970 }
0x3190   :  { %v4650_v43 = vmul.f32 %v6971_v3, %v6967_v22  ;;  %6661 = vmatmul.mubr.msk.bf16.vlgmr.msra.gmra.mxu1 %vm350_vm5, %v4651_v41 }
0x3191   :  { %6672 = vmatprep.mubr.msk.bf16.mxu1 %vm7161_vm0, %v7160_v1  ;;  %6671 = vmatpush3.bf16.msra.mxu1 %v4754_v11  ;;  %v5893_v11 = vld [vmem:[%s8503_s13 + $0x18] sm:$0xf] }
0x3192   :  { %v4652_v45 = vpack.c.bf16 %v4650_v43, %v4650_v43  ;;  %6682 = vmatprep.subr.bf16.mxu1 %v7160_v1 }
0x3194   :  { %6667 = vmatmul.mubr.msk.bf16.vlgmr.msra.gmra.mxu0 %vm350_vm5, %v4652_v45 }
0x3195   :  { %6677 = vmatpush3.bf16.msra.mxu0 %v4801_v46  ;;  %6678 = vmatprep.mubr.msk.bf16.mxu0 %vm7161_vm0, %v7160_v1 }
0x3196   :  { %6688 = vmatprep.subr.bf16.mxu0 %v7160_v1 }
0x319c   :  { %6679 = vmatmul.mubr.msk.bf16.vlgmr.msra.gmra.mxu0 %vm350_vm5, %v4526_v6 }
0x319d   :  { %6689 = vmatpush3.bf16.xpose.msra.mxu0 %v4902_v52  ;;  %6690 = vmatprep.mubr.msk.bf16.mxu0 %vm7161_vm0, %v7160_v1 }
0x319e   :  { %6700 = vmatprep.subr.bf16.mxu0 %v7160_v1 }
0x31a4   :  { %6691 = vmatmul.mubr.msk.bf16.vlgmr.msra.gmra.mxu0 %vm350_vm5, %v4895_v54 }
0x31a5   :  { %6702 = vmatprep.mubr.msk.bf16.mxu0 %vm7161_vm0, %v7160_v1 }
0x3250   :  { %v4695_v28 = vpop.f32.mrf.mxu1 }
0x3252   :  { %v6662_v55 = vpop.f32.mrf.mxu1 }
0x3254   :  { %v4698_v18 = vpop.f32.mrf.mxu1  ;;  %v4743_v35 = vpop.f32.mrf.mxu0 }
0x3255   :  { %v4749_v21 = vpack.c.bf16 %v4743_v35, %v4695_v28  ;;  %v5069_v28 = vsel %vm475_vm8, %v5893_v11, 0 }
0x3256   :  { %v6663_v26 = vpop.f32.mrf.mxu1  ;;  %v6668_v44 = vpop.f32.mrf.mxu0 }
0x3257   :  { %6673 = vmatmul.mubr.msk.bf16.vlgmr.msra.gmra.mxu1 %vm350_vm5, %v4749_v21 }
0x3258   :  { %6683 = vmatpush3.bf16.xpose.msra.mxu1 %v4852_v56  ;;  %v4746_v6 = vpop.f32.mrf.mxu0  ;;  %6684 = vmatprep.mubr.msk.bf16.mxu1 %vm7161_vm0, %v7160_v1 }
0x3259   :  { %6694 = vmatprep.subr.bf16.mxu1 %v7160_v1 }
0x325a   :  { %v6669_v58 = vpop.f32.mrf.mxu0 }
0x325c   :  { %v8311_v59 = vpop.f32.mrf.mxu0 }
0x325e   :  { %v6680_v61 = vpop.f32.mrf.mxu0 }
0x325f   :  { %6685 = vmatmul.mubr.msk.bf16.vlgmr.msra.gmra.mxu1 %vm350_vm5, %v4845_v60 }
0x3260   :  { %v8314_v9 = vpop.f32.mrf.mxu0  ;;  %6696 = vmatprep.mubr.msk.bf16.mxu1 %vm7161_vm0, %v7160_v1 }
0x3262   :  { %v6681_v63 = vpop.f32.mrf.mxu0 }
0x3264   :  { %v4938_v27 = vpop.f32.mrf.mxu0 }
0x3265   :  { %v4939_v24 = vadd.f32 %v4938_v27, %v7668_v37 }
0x3266   :  { %v6692_v51 = vpop.f32.mrf.mxu0 }
0x3267   :  { %v4947_v33 = vsel %vm350_vm5, %v4939_v24, -inf }
0x3268   :  { %4948 = vmax.xlane.f32.xlu1 %v4947_v33  ;;  %v4941_v53 = vpop.f32.mrf.mxu0 }
0x326a   :  { %v6693_v49 = vpop.f32.mrf.mxu0 }
0x3279   :  { %4968 = vrot.lane.b32.xlu1 %v8191_v7, %s7166_s2 }
0x327d   :  { %5116 = vrot.lane.b32.xlu1 %v8191_v7, %s8562_s3 }
0x3281   :  { %5166 = vrot.lane.b32.xlu1 %v8195_v62, %s8562_s3 }
0x3285   :  { %5164 = vrot.lane.b32.xlu1 %v8207_v31, %s8562_s3 }
0x32f1   :  { %v4949_v0 = vpop.xlane.xlu1 %4948 }
0x32f2   :  { %v4951_v10 = vsub.f32 %v4939_v24, %v4949_v0 }
0x32f4   :  { %v4954_v12 = vmul.f32 1.442695, %v4951_v10 }
0x32f5   :  { %v4969_v4 = vpop.permute.xlu1 %4968 }
0x32f6   :  { %v4974_v29 = vsel %vm475_vm8, %v4969_v4, 0  ;;  %6972 = vpow2.f32 %v4954_v12 }
0x32f7   :  { %6695 = vmatpush3.bf16.msra.mxu1 %v4974_v29 }
0x32f8   :  { %6706 = vmatprep.subr.bf16.mxu1 %v7160_v1 }
0x32f9   :  { %v5117_v46 = vpop.permute.xlu1 %5116 }
0x32fa   :  { %v5122_v50 = vsel %vm350_vm5, %v5117_v46, 0 }
0x32fd   :  { %v5167_v44 = vpop.permute.xlu1 %5166 }
0x32fe   :  { %v5172_v24 = vsel %vm350_vm5, %v5167_v44, 0 }
0x3301   :  { %v5165_v53 = vpop.permute.xlu1 %5164 }
0x3303   :  { %v6973_v19 = vpop.eup %6972 }
0x3304   :  { %v4959_v23 = vsel %vm350_vm5, %v6973_v19, 0.0 }
0x3317   :  { %v8330_v13 = vpop.f32.mrf.mxu1 }
0x3318   :  { %v4838_v12 = vadd.f32 %v8311_v59, %v8330_v13 }
0x3319   :  { %v6674_v32 = vpop.f32.mrf.mxu1 }
0x331b   :  { %v8332_v14 = vpop.f32.mrf.mxu1 }
0x331d   :  { %v6675_v15 = vpop.f32.mrf.mxu1 }
0x331f   :  { %v4888_v16 = vpop.f32.mrf.mxu1 }
0x3320   :  { %v4889_v40 = vadd.f32 %v4888_v16, %v7665_v34 }
0x3321   :  { %v6686_v31 = vpop.f32.mrf.mxu1 }
0x3322   :  { %v4944_v17 = vsel %vm350_vm5, %v4889_v40, -inf }
0x3323   :  { %4945 = vmax.xlane.f32.xlu0 %v4944_v17  ;;  %v4891_v20 = vpop.f32.mrf.mxu1 }
0x3325   :  { %v6687_v22 = vpop.f32.mrf.mxu1 }
0x3327   :  { %4960 = vadd.xlane.f32.xlu0 %v4959_v23 }
0x33ac   :  { %v4946_v30 = vpop.xlane.xlu0 %4945 }
0x33ad   :  { %v4950_v36 = vsub.f32 %v4889_v40, %v4946_v30  ;;  %v4841_v40 = vadd.f32 %v8314_v9, %v8332_v14 }
0x33af   :  { %v4952_v38 = vmul.f32 1.442695, %v4950_v36 }
0x33b0   :  { %v4961_v2 = vpop.xlane.xlu0 %4960 }
0x33b1   :  { %6974 = vpow2.f32 %v4952_v38 }
0x33b2   :  { %6976 = vrcp.f32 %v4961_v2 }
0x33be   :  { %v6975_v39 = vpop.eup %6974 }
0x33bf   :  { %v4956_v8 = vsel %vm350_vm5, %v6975_v39, 0.0  ;;  %v6977_v41 = vpop.eup %6976 }
0x33c0   :  { %4957 = vadd.xlane.f32.xlu0 %v4956_v8  ;;  %v4965_v42 = vmul.f32 %v6977_v41, %v6973_v19 }
0x33c2   :  { %v4967_v48 = vpack.c.bf16 %v4965_v42, %v4965_v42  ;;  %v5894_v42 = vld [vmem:[%s8503_s13 + $0x1c] sm:$0xf] }
0x33d6   :  { %5016 = vrot.lane.b32.xlu0 %v8195_v62, %s7166_s2 }
0x33da   :  { %5114 = vrot.lane.b32.xlu0 %v8201_v47, %s8562_s3 }
0x3449   :  { %v4958_v3 = vpop.xlane.xlu0 %4957 }
0x344a   :  { %6978 = vrcp.f32 %v4958_v3 }
0x344d   :  { %v5017_v43 = vpop.permute.xlu0 %5016 }
0x344e   :  { %v5022_v45 = vsel %vm475_vm8, %v5017_v43, 0  ;;  %v5339_v43 = vsel %vm475_vm8, %v5894_v42, 0 }
0x344f   :  { %6701 = vmatpush3.bf16.msra.mxu0 %v5022_v45 }
0x3450   :  { %6712 = vmatprep.subr.bf16.mxu0 %v7160_v1 }
0x3451   :  { %v5115_v54 = vpop.permute.xlu0 %5114 }
0x3452   :  { %6703 = vmatmul.mubr.msk.bf16.vlgmr.msra.gmra.mxu0 %vm350_vm5, %v4967_v48 }
0x3453   :  { %6713 = vmatpush3.bf16.xpose.msra.mxu0 %v5122_v50  ;;  %6714 = vmatprep.mubr.msk.bf16.mxu0 %vm7161_vm0, %v7160_v1 }
0x3454   :  { %6724 = vmatprep.subr.bf16.mxu0 %v7160_v1 }
0x3457   :  { %v6979_v47 = vpop.eup %6978 }
0x3458   :  { %v4963_v52 = vmul.f32 %v6979_v47, %v6975_v39 }
0x345a   :  { %v4966_v25 = vpack.c.bf16 %v4963_v52, %v4963_v52  ;;  %6715 = vmatmul.mubr.msk.bf16.vlgmr.msra.gmra.mxu0 %vm350_vm5, %v5115_v54 }
0x345b   :  { %6726 = vmatprep.mubr.msk.bf16.mxu0 %vm7161_vm0, %v7160_v1 }
0x345c   :  { %6697 = vmatmul.mubr.msk.bf16.vlgmr.msra.gmra.mxu1 %vm350_vm5, %v4966_v25 }
0x345d   :  { %6708 = vmatprep.mubr.msk.bf16.mxu1 %vm7161_vm0, %v7160_v1  ;;  %6707 = vmatpush3.bf16.msra.mxu1 %v5069_v28 }
0x345e   :  { %6718 = vmatprep.subr.bf16.mxu1 %v7160_v1 }
0x3512   :  { %v5058_v55 = vpop.f32.mrf.mxu0 }
0x3514   :  { %v6704_v18 = vpop.f32.mrf.mxu0 }
0x3516   :  { %v5061_v35 = vpop.f32.mrf.mxu0 }
0x3518   :  { %v6705_v21 = vpop.f32.mrf.mxu0 }
0x351a   :  { %v5158_v26 = vpop.f32.mrf.mxu0 }
0x351b   :  { %v5159_v56 = vadd.f32 %v5158_v26, %v7665_v34  ;;  %v5916_v26 = vld [vmem:[%s8504_s14 + $0x1] ss:$0 sm:$0xff] }
0x351c   :  { %v5010_v6 = vpop.f32.mrf.mxu1  ;;  %v6716_v58 = vpop.f32.mrf.mxu0 }
0x351d   :  { %v5064_v60 = vpack.c.bf16 %v5058_v55, %v5010_v6  ;;  %v5214_v61 = vsel %vm350_vm5, %v5159_v56, -inf }
0x351e   :  { %5215 = vmax.xlane.f32.xlu0 %v5214_v61  ;;  %v6698_v63 = vpop.f32.mrf.mxu1  ;;  %v5161_v27 = vpop.f32.mrf.mxu0 }
0x351f   :  { %6709 = vmatmul.mubr.msk.bf16.vlgmr.msra.gmra.mxu1 %vm350_vm5, %v5064_v60 }
0x3520   :  { %6719 = vmatpush3.bf16.xpose.msra.mxu1 %v5172_v24  ;;  %v5013_v51 = vpop.f32.mrf.mxu1  ;;  %v6717_v33 = vpop.f32.mrf.mxu0  ;;  %6720 = vmatprep.mubr.msk.bf16.mxu1 %vm7161_vm0, %v7160_v1 }
0x3521   :  { %6730 = vmatprep.subr.bf16.mxu1 %v7160_v1 }
0x3522   :  { %v6699_v34 = vpop.f32.mrf.mxu1 }
0x3527   :  { %6721 = vmatmul.mubr.msk.bf16.vlgmr.msra.gmra.mxu1 %vm350_vm5, %v5165_v53 }
0x3528   :  { %6732 = vmatprep.mubr.msk.bf16.mxu1 %vm7161_vm0, %v7160_v1 }
0x35a7   :  { %v5216_v49 = vpop.xlane.xlu0 %5215 }
0x35a8   :  { %v5220_v0 = vsub.f32 %v5159_v56, %v5216_v49 }
0x35aa   :  { %v5222_v4 = vmul.f32 1.442695, %v5220_v0 }
0x35ac   :  { %6980 = vpow2.f32 %v5222_v4 }
0x35b9   :  { %v6981_v29 = vpop.eup %6980 }
0x35ba   :  { %v5226_v10 = vsel %vm350_vm5, %v6981_v29, 0.0 }
0x35bb   :  { %5227 = vadd.xlane.f32.xlu0 %v5226_v10 }
0x35df   :  { %v5105_v32 = vpop.f32.mrf.mxu1 }
0x35e0   :  { %v5112_v15 = vadd.f32 %v5105_v32, %v4838_v12 }
0x35e1   :  { %v6710_v16 = vpop.f32.mrf.mxu1 }
0x35e2   :  { %v6833_v16 = vld [vmem:[%s8507_s17 + $0x10] sm:$0xff]  }
0x35e3   :  { %v5108_v31 = vpop.f32.mrf.mxu1 }
0x35e4   :  { %v5113_v17 = vadd.f32 %v5108_v31, %v4841_v40  ;;  %v6834_v40 = vld [vmem:[%s8509_s19 + $0x78] sm:$0xff]   ;;  %v6835_v31 = vld [vmem:[%s8509_s19 + $0x70] sm:$0xff]  }
0x35e5   :  { %v6711_v19 = vpop.f32.mrf.mxu1 }
0x35e6   :  { %v6837_v19 = vld [vmem:[%s8509_s19 + $0x60] sm:$0xff]  }
0x35e7   :  { %v5208_v20 = vpop.f32.mrf.mxu1 }
0x35e8   :  { %v5209_v22 = vadd.f32 %v5208_v20, %v7668_v37  ;;  %v6838_v20 = vld [vmem:[%s8509_s19 + $0x58] sm:$0xff]  }
0x35e9   :  { %v6722_v23 = vpop.f32.mrf.mxu1 }
0x35ea   :  { %v5217_v30 = vsel %vm350_vm5, %v5209_v22, -inf }
0x35eb   :  { %5218 = vmax.xlane.f32.xlu1 %v5217_v30  ;;  %v5211_v36 = vpop.f32.mrf.mxu1 }
0x35ed   :  { %v6723_v38 = vpop.f32.mrf.mxu1 }
0x35fc   :  { %5238 = vrot.lane.b32.xlu1 %v8191_v7, %s8561_s7 }
0x3644   :  { %v5228_v59 = vpop.xlane.xlu0 %5227 }
0x3645   :  { %6982 = vrcp.f32 %v5228_v59 }
0x3652   :  { %v6983_v13 = vpop.eup %6982 }
0x3653   :  { %v5233_v14 = vmul.f32 %v6983_v13, %v6981_v29 }
0x3655   :  { %v5236_v41 = vpack.c.bf16 %v5233_v14, %v5233_v14 }
0x3674   :  { %v5219_v39 = vpop.xlane.xlu1 %5218 }
0x3675   :  { %v5221_v9 = vsub.f32 %v5209_v22, %v5219_v39 }
0x3677   :  { %v5224_v8 = vmul.f32 1.442695, %v5221_v9  ;;  %v5919_v9 = vld [vmem:[%s8505_s15 + $0x1] ss:$0 sm:$0xff] }
0x3678   :  { %v5239_v2 = vpop.permute.xlu1 %5238 }
0x3679   :  { %6984 = vpow2.f32 %v5224_v8  ;;  %v5244_v37 = vsel %vm475_vm8, %v5239_v2, 0 }
0x367a   :  { %6725 = vmatpush3.bf16.msra.mxu0 %v5244_v37  ;;  %v5920_v37 = vld [vmem:[%s8506_s16 + $0x1] ss:$0 sm:$0xff] }
0x367b   :  { %6736 = vmatprep.subr.bf16.mxu0 %v7160_v1 }
0x367d   :  { %6727 = vmatmul.mubr.msk.bf16.vlgmr.msra.gmra.mxu0 %vm350_vm5, %v5236_v41 }
0x367e   :  { %6738 = vmatprep.mubr.msk.bf16.mxu0 %vm7161_vm0, %v7160_v1  ;;  %6737 = vmatpush3.bf16.msra.mxu0 %v5339_v43  ;;  %v6839_v43 = vld [vmem:[%s8509_s19 + $0x50] sm:$0xff]  }
0x367f   :  { %6750 = vmatprep.subr.bf16.mxu0 %v7160_v1 }
0x3686   :  { %v6985_v7 = vpop.eup %6984 }
0x3687   :  { %v5229_v3 = vsel %vm350_vm5, %v6985_v7, 0.0 }
0x3688   :  { %5230 = vadd.xlane.f32.xlu0 %v5229_v3 }
0x369e   :  { %5286 = vrot.lane.b32.xlu0 %v8195_v62, %s8561_s7 }
0x3711   :  { %v5231_v45 = vpop.xlane.xlu0 %5230 }
0x3712   :  { %6986 = vrcp.f32 %v5231_v45  ;;  %v6840_v45 = vld [vmem:[%s8509_s19 + $0x48] sm:$0xff]  }
0x3715   :  { %v5287_v46 = vpop.permute.xlu0 %5286 }
0x3716   :  { %v5292_v48 = vsel %vm475_vm8, %v5287_v46, 0  ;;  %v6841_v46 = vld [vmem:[%s8509_s19 + $0x40] sm:$0xff]  }
0x3717   :  { %6731 = vmatpush3.bf16.msra.mxu1 %v5292_v48  ;;  %v5926_v48 = vld [vmem:[%s8508_s18 + $0x1] ss:$0 sm:$0xff] }
0x3718   :  { %6742 = vmatprep.subr.bf16.mxu1 %v7160_v1 }
0x371f   :  { %v6987_v50 = vpop.eup %6986 }
0x3720   :  { %v5235_v47 = vmul.f32 %v6987_v50, %v6985_v7 }
0x3722   :  { %v5237_v62 = vpack.c.bf16 %v5235_v47, %v5235_v47 }
0x3724   :  { %6733 = vmatmul.mubr.msk.bf16.vlgmr.msra.gmra.mxu1 %vm350_vm5, %v5237_v62 }
0x3725   :  { %6746 = vmatprep.mubr.msk.bf16.mxu1 %vm7161_vm0, %v7160_v1 }
0x373d   :  { %v5280_v52 = vpop.f32.mrf.mxu0 }
0x373f   :  { %v6728_v54 = vpop.f32.mrf.mxu0 }
0x3741   :  { %v5283_v25 = vpop.f32.mrf.mxu0 }
0x3743   :  { %v6729_v11 = vpop.f32.mrf.mxu0 }
0x37e4   :  { %v5328_v28 = vpop.f32.mrf.mxu1 }
0x37e5   :  { %v5334_v55 = vpack.c.bf16 %v5328_v28, %v5280_v52 }
0x37e6   :  { %v6734_v18 = vpop.f32.mrf.mxu1 }
0x37e7   :  { %6739 = vmatmul.mubr.msk.bf16.vlgmr.msra.gmra.mxu0 %vm350_vm5, %v5334_v55  ;;  %v5947_v18 = vld [vmem:[%s8510_s20 + $0x1] ss:$0 sm:$0xff] }
0x37e8   :  { %v5331_v35 = vpop.f32.mrf.mxu1  ;;  %6766 = vmatprep.mubr.msk.bf16.mxu0 %vm7161_vm0, %v7160_v1  ;;  %6751 = vmatpush3.bf16.msra.mxu0 %v6834_v40 }
0x37e9   :  { %6752 = vmatprep.subr.bf16.mxu0 %v7160_v1 }
0x37ea   :  { %v6735_v21 = vpop.f32.mrf.mxu1 }
0x37ec   :  { %6753 = vmatpush3.bf16.msra.mxu0 %v6835_v31 }
0x37ed   :  { %6754 = vmatprep.subr.bf16.mxu0 %v7160_v1 }
0x38a7   :  { %v5375_v44 = vpop.f32.mrf.mxu0 }
0x38a8   :  { %v5382_v56 = vadd.f32 %v5375_v44, %v5112_v15 }
0x38a9   :  { %v6740_v6 = vpop.f32.mrf.mxu0 }
0x38aa   :  { %v5390_v58 = vadd.f32 %v5916_v26, %v5382_v56 }
0x38ab   :  { %v5378_v60 = vpop.f32.mrf.mxu0 }
0x38ac   :  { %v5383_v61 = vadd.f32 %v5378_v60, %v5113_v17  ;;  %v5392_v63 = vadd.f32 %v5390_v58, %v8182_v5  ;;  %v6836_v17 = vld [vmem:[%s8509_s19 + $0x68] sm:$0xff]  }
0x38ad   :  { %v6741_v27 = vpop.f32.mrf.mxu0  ;;  %6755 = vmatpush3.bf16.msra.mxu0 %v6836_v17 }
0x38ae   :  { %v5391_v24 = vadd.f32 %v5916_v26, %v5383_v61  ;;  %v5398_v51 = vsel %vm295_vm4, %v5392_v63, 0.0  ;;  %6756 = vmatprep.subr.bf16.mxu0 %v7160_v1 }
0x38af   :  { %5399 = vadd.xlane.f32.xlu1 %v5398_v51 }
0x38b0   :  { %v5393_v33 = vadd.f32 %v5391_v24, %v8184_v57  ;;  %v6832_v57 = vld [vmem:[%s8507_s17 + $0x18] sm:$0xff]  }
0x38b1   :  { %6743 = vmatpush3.bf16.msra.mxu1 %v6832_v57  ;;  %6757 = vmatpush3.bf16.msra.mxu0 %v6837_v19  ;;  %v5958_v19 = vld [vmem:[%s8511_s21 + $0x1] ss:$0 sm:$0xff]  ;;  %s7172_s21 = smov [#allocation13]  }
0x38b2   :  { %v5401_v34 = vsel %vm295_vm4, %v5393_v33, 0.0  ;;  %6744 = vmatprep.subr.bf16.mxu1 %v7160_v1  ;;  %6758 = vmatprep.subr.bf16.mxu0 %v7160_v1  ;;  %s5750_s11 = sshll.u32 %s7172_s21, 4  ;;  %s5751_s11 = int_to_ptr.vmem [resolvable:$true] %s5750_s11 }
0x38b3   :  { %5402 = vadd.xlane.f32.xlu0 %v5401_v34  ;;  %p7122_p3 = scmp.lt.s32.totalorder %s5751_s11, %s5751_s11 }
0x38b5   :  { %6745 = vmatpush3.bf16.msra.mxu1 %v6833_v16  ;;  %6759 = vmatpush3.bf16.msra.mxu0 %v6838_v20 }
0x38b6   :  { %6770 = vmatprep.subr.bf16.mxu1 %v7160_v1  ;;  %6760 = vmatprep.subr.bf16.mxu0 %v7160_v1 }
0x38b9   :  { %6761 = vmatpush3.bf16.msra.mxu0 %v6839_v43 }
0x38ba   :  { %6762 = vmatprep.subr.bf16.mxu0 %v7160_v1 }
0x38bd   :  { %6763 = vmatpush3.bf16.msra.mxu0 %v6840_v45 }
0x38be   :  { %6764 = vmatprep.subr.bf16.mxu0 %v7160_v1 }
0x38c1   :  { %6765 = vmatpush3.bf16.msra.mxu0 %v6841_v46 }
0x3938   :  { %v5400_v53 = vpop.xlane.xlu1 %5399 }
0x3939   :  { %v5404_v49 = vmul.f32 0.03125, %v5400_v53 }
0x393b   :  { %v5406_v0 = vsub.f32 %v5392_v63, %v5404_v49 }
0x393c   :  { %v5403_v4 = vpop.xlane.xlu0 %5402 }
0x393d   :  { %v5405_v29 = vmul.f32 0.03125, %v5403_v4  ;;  %v5408_v10 = vmul.f32 %v5406_v0, %v5406_v0 }
0x393f   :  { %v5407_v12 = vsub.f32 %v5393_v33, %v5405_v29  ;;  %v5410_v32 = vsel %vm295_vm4, %v5408_v10, 0.0  ;;  %v6842_v10 = vld [vmem:[%s8513_s23 + $0x8] sm:$0xff]  }
0x3940   :  { %5411 = vadd.xlane.f32.xlu1 %v5410_v32 }
0x3941   :  { %v5409_v5 = vmul.f32 %v5407_v12, %v5407_v12 }
0x3943   :  { %v5413_v15 = vsel %vm295_vm4, %v5409_v5, 0.0 }
0x3944   :  { %5414 = vadd.xlane.f32.xlu0 %v5413_v15 }
0x39c9   :  { %v5412_v22 = vpop.xlane.xlu1 %5411 }
0x39ca   :  { %v5416_v23 = vmul.f32 0.03125, %v5412_v22 }
0x39cc   :  { %v5418_v30 = vadd.f32 1e-05, %v5416_v23  ;;  %v5959_v23 = vld [vmem:[%s8512_s22 + $0x1] ss:$0 sm:$0xff]  ;;  %s7117_s22 = scalar_lea.vmem %s5751_s11, 256 }
0x39cd   :  { %v5415_v36 = vpop.xlane.xlu0 %5414  ;;  %p7118_p2 = scmp.ne.s32.totalorder %s5751_s11, %s7117_s22  ;;  %p7123_p4 = scmp.lt.s32.totalorder %s7117_s22, %s7117_s22 }
0x39ce   :  { %6988 = vrsqrt.f32 %v5418_v30  ;;  %v5417_v38 = vmul.f32 0.03125, %v5415_v36 }
0x39cf   :  { %p7124_p5 = por %p7123_p4, %p7122_p3 }
0x39d0   :  { %v5419_v59 = vadd.f32 1e-05, %v5417_v38 }
0x39d1   :  { %p7125_p6 = pnand %p7124_p5, %p7118_p2 }
0x39d2   :  { %6990 = vrsqrt.f32 %v5419_v59 }
0x39db   :  { %v6989_v13 = vpop.eup %6988 }
0x39dc   :  { %v5422_v39 = vmul.f32 %v6989_v13, %v5406_v0  ;;  %v5960_v13 = vld [vmem:[%s8514_s24] ss:$0 sm:$0xff] }
0x39de   :  { %v5430_v8 = vmul.f32 %v5919_v9, %v5422_v39 }
0x39df   :  { %v6991_v14 = vpop.eup %6990 }
0x39e0   :  { %v5423_v2 = vmul.f32 %v6991_v14, %v5407_v12  ;;  %v5438_v7 = vadd.f32 %v5920_v37, %v5430_v8  ;;  %v6843_v12 = vld [vmem:[%s8513_s23] sm:$0xff]  }
0x39e2   :  { %v5431_v41 = vmul.f32 %v5919_v9, %v5423_v2 }
0x39e4   :  { %v5439_v3 = vadd.f32 %v5920_v37, %v5431_v41 }
0x39e6   :  { %v5440_v42 = vpack.c.bf16 %v5439_v3, %v5438_v7 }
0x39e8   :  { %6747 = vmatmul.mubr.msk.bf16.vlgmr.msra.gmra.mxu1 %vm295_vm4, %v5440_v42 }
0x39e9   :  { %6774 = vmatprep.mubr.msk.bf16.mxu1 %vm7161_vm0, %v7160_v1  ;;  %6771 = vmatpush3.bf16.msra.mxu1 %v6842_v10 }
0x39ea   :  { %6772 = vmatprep.subr.bf16.mxu1 %v7160_v1 }
0x39ed   :  { %6773 = vmatpush3.bf16.msra.mxu1 %v6843_v12 }
0x3aa8   :  { %v5503_v50 = vpop.f32.mrf.mxu1 }
0x3aa9   :  { %v5504_v62 = vadd.f32 %v5926_v48, %v5503_v50 }
0x3aaa   :  { %v6748_v47 = vpop.f32.mrf.mxu1 }
0x3aab   :  { %v5510_v11 = vmax.f32 %v5504_v62, 0.0 }
0x3aac   :  { %v5506_v52 = vpop.f32.mrf.mxu1 }
0x3aad   :  { %v5507_v54 = vadd.f32 %v5926_v48, %v5506_v52 }
0x3aae   :  { %v6749_v25 = vpop.f32.mrf.mxu1 }
0x3aaf   :  { %v5511_v28 = vmax.f32 %v5507_v54, 0.0 }
0x3ab1   :  { %v5512_v55 = vpack.c.bf16 %v5511_v28, %v5510_v11 }
0x3ab3   :  { %6767 = vmatmul.mubr.bf16.vlgmr.msra.gmra.mxu0 %v5512_v55 }
0x3b73   :  { %v5620_v35 = vpop.f32.mrf.mxu0 }
0x3b74   :  { %v5621_v21 = vadd.f32 %v5947_v18, %v5620_v35 }
0x3b75   :  { %v6768_v26 = vpop.f32.mrf.mxu0 }
0x3b76   :  { %v5627_v44 = vadd.f32 %v5621_v21, %v5438_v7 }
0x3b77   :  { %v5623_v56 = vpop.f32.mrf.mxu0 }
0x3b78   :  { %v5624_v6 = vadd.f32 %v5947_v18, %v5623_v56  ;;  %v5633_v58 = vsel %vm295_vm4, %v5627_v44, 0.0 }
0x3b79   :  { %5634 = vadd.xlane.f32.xlu1 %v5633_v58  ;;  %v6769_v60 = vpop.f32.mrf.mxu0 }
0x3b7a   :  { %v5628_v61 = vadd.f32 %v5624_v6, %v5439_v3 }
0x3b7c   :  { %v5636_v63 = vsel %vm295_vm4, %v5628_v61, 0.0 }
0x3b7d   :  { %5637 = vadd.xlane.f32.xlu0 %v5636_v63 }
0x3c02   :  { %v5635_v27 = vpop.xlane.xlu1 %5634 }
0x3c03   :  { %v5639_v24 = vmul.f32 0.03125, %v5635_v27 }
0x3c05   :  { %v5641_v51 = vsub.f32 %v5627_v44, %v5639_v24 }
0x3c06   :  { %v5638_v33 = vpop.xlane.xlu0 %5637 }
0x3c07   :  { %v5640_v34 = vmul.f32 0.03125, %v5638_v33  ;;  %v5643_v53 = vmul.f32 %v5641_v51, %v5641_v51 }
0x3c09   :  { %v5642_v49 = vsub.f32 %v5628_v61, %v5640_v34  ;;  %v5645_v0 = vsel %vm295_vm4, %v5643_v53, 0.0 }
0x3c0a   :  { %5646 = vadd.xlane.f32.xlu1 %v5645_v0 }
0x3c0b   :  { %v5644_v4 = vmul.f32 %v5642_v49, %v5642_v49 }
0x3c0d   :  { %v5648_v29 = vsel %vm295_vm4, %v5644_v4, 0.0 }
0x3c0e   :  { %5649 = vadd.xlane.f32.xlu0 %v5648_v29 }
0x3c93   :  { %v5647_v32 = vpop.xlane.xlu1 %5646 }
0x3c94   :  { %v5651_v5 = vmul.f32 0.03125, %v5647_v32 }
0x3c96   :  { %v5653_v15 = vadd.f32 1e-05, %v5651_v5 }
0x3c97   :  { %v5650_v57 = vpop.xlane.xlu0 %5649 }
0x3c98   :  { %6992 = vrsqrt.f32 %v5653_v15  ;;  %v5652_v16 = vmul.f32 0.03125, %v5650_v57 }
0x3c9a   :  { %v5654_v40 = vadd.f32 1e-05, %v5652_v16 }
0x3c9c   :  { %6994 = vrsqrt.f32 %v5654_v40 }
0x3ca5   :  { %v6993_v31 = vpop.eup %6992 }
0x3ca6   :  { %v5657_v17 = vmul.f32 %v6993_v31, %v5641_v51 }
0x3ca8   :  { %v5665_v20 = vmul.f32 %v5958_v19, %v5657_v17 }
0x3ca9   :  { %v6995_v1 = vpop.eup %6994 }
0x3caa   :  { %v5658_v22 = vmul.f32 %v6995_v1, %v5642_v49  ;;  %v5673_v36 = vadd.f32 %v5959_v23, %v5665_v20 }
0x3cac   :  { %v5666_v30 = vmul.f32 %v5958_v19, %v5658_v22 }
0x3cae   :  { %v5674_v38 = vadd.f32 %v5959_v23, %v5666_v30 }
0x3cb0   :  { %v5675_v59 = vpack.c.bf16 %v5674_v38, %v5673_v36 }
0x3cb2   :  { %6775 = vmatmul.mubr.msk.bf16.vlgmr.msra.gmra.mxu1 %vm295_vm4, %v5675_v59 }
0x3d72   :  { %v5736_v39 = vpop.f32.mrf.mxu1 }
0x3d73   :  { %v5737_v9 = vadd.f32 %v5960_v13, %v5736_v39 }
0x3d74   :  { %v6776_v14 = vpop.f32.mrf.mxu1 }
0x3d75   :  { %5743 = vst [vmem:[#allocation13] sm:$0xff] %v5737_v9 }
0x3d76   :  { %v5739_v8 = vpop.f32.mrf.mxu1 }
0x3d77   :  { %v5740_v2 = vadd.f32 %v5960_v13, %v5739_v8 }
0x3d78   :  { %v6777_v37 = vpop.f32.mrf.mxu1 }
0x3d79   :  { %5744 = vst [vmem:[#allocation13 + $0x8] sm:$0xff] %v5740_v2 }
0x3d7a   :  { %7128 = shalt.err (!%p7125_p6)
}
0x3d7b   :  { %s8564_s12 = smov 8   ;;  %s8565_s24 = smov 128  }
0x3d7c   :  { %5756 = dma.vmem_to_hbm [thread:$0]  %s5751_s11, 256, %s8515_s25, [#allocation4], %s8565_s24, %s8565_s24, %s8564_s12  }
0x3d7d   :  { %7145 = dma.done.wait [#allocation4], 256  }
0x3d7e   :  { %7146 = vsyncadd [#allocation4], 4294967040 }
0x3d7f   :  { %5760 = vsyncpa [#allocation3], 1 }
0x3d80   :  { %5761 = vsyncpa [#allocation6], 1 }
0x3d81   :  { %5762 = vsyncpa [#allocation9], 1 }
0x3d82   :  { %5763 = vsyncpa [#allocation12], 1 }
0x3d83   :  { %5764 = vsyncpa [#allocation4], 1 }

</bundles_post_ra>
